<compile_context>
chip_gen: v7x
topology: tpu7x:2x2x1
jax: 0.10.0
libtpu: 0.0.40
codegen_flags: <defaults>
</compile_context>

<pallas_src>
import functools

import jax
import jax.numpy as jnp
from jax.experimental import pallas as pl
from jax.experimental.pallas import tpu as pltpu


def _phase_conv_kernel(x_ref, w_ref, b_ref, o_ref, acc_ref, *, wp, tile_n, margin):
    """Fused nearest-2x upsample + 3x3 conv, one (image, row-tile) grid step.

    x_ref   : (1, Ntot, C)         whole zero-padded flattened image (channels-last)
    w_ref   : (4, 4, C, Cout)      [phase, tap] effective 2x2 kernels
    b_ref   : (1, Cout)            conv bias (f32)
    o_ref   : (1, 4, tile_n, Cout) per-phase outputs for this tile
    acc_ref : (4, tile_n, Cout)    f32 VMEM accumulator scratch
    """
    t = pl.program_id(1)
    base = margin + t * tile_n
    bias = b_ref[...].astype(jnp.float32)                 # (1, Cout)

    done = [False, False, False, False]
    for ey in (-1, 0, 1):                                  # 9 distinct flat shifts
        for ex in (-1, 0, 1):
            slab = x_ref[0, pl.ds(base + ey * wp + ex, tile_n), :]
            for pr in range(2):                            # phases consuming it
                dy = ey + 1 - pr
                if dy < 0 or dy > 1:
                    continue
                for pc in range(2):
                    dx = ex + 1 - pc
                    if dx < 0 or dx > 1:
                        continue
                    ph = pr * 2 + pc
                    contrib = jnp.dot(slab, w_ref[ph, dy * 2 + dx],
                                      preferred_element_type=jnp.float32)
                    if done[ph]:
                        acc_ref[ph] += contrib
                    else:
                        acc_ref[ph] = contrib + bias       # init with 1st dot + bias
                        done[ph] = True

    o_ref[0] = acc_ref[...].astype(o_ref.dtype)


def upsample_forward(x, w, b, *, compute_dtype=jnp.bfloat16,
                     tile_n_target=2048, vmem_limit_bytes=None):
    """Equivalent of Upsample(channels=C, use_conv=True, dims=2).forward(x).

    x : (B, C, H, W)     NCHW, like PyTorch
    w : (Cout, C, 3, 3)  OIHW, like PyTorch
    b : (Cout,)
    returns (B, Cout, 2H, 2W) in x.dtype
    """
    B, C, H, W = x.shape
    Cout = w.shape[0]

    Hp, Wp = H + 2, W + 2            # 1-pixel zero pad at ORIGINAL resolution
    Np = Hp * Wp
    margin = Wp + 1                  # max |tap shift| in the flattened layout

    # Row-tile size (flattened padded positions), a multiple of 8 sublanes.
    num_tiles = max(1, pl.cdiv(Np, tile_n_target))
    tile_n = pl.cdiv(pl.cdiv(Np, num_tiles), 8) * 8
    np_pad = num_tiles * tile_n
    n_tot = np_pad + 2 * margin

    # Pad the channel (matmul K) dim to a multiple of 8 (exact: zero channels).
    C_pad = pl.cdiv(C, 8) * 8

    # Effective 2x2-tap weights of the fused (nearest-2x o conv3x3) operator,
    # one per output sub-pixel phase.  Tap summation in f32, then cast.
    R = jnp.array([[[1., 0., 0.], [0., 1., 1.]],
                   [[1., 1., 0.], [0., 0., 1.]]], dtype=jnp.float32)
    w_f32 = w.astype(jnp.float32)
    if C_pad != C:
        w_f32 = jnp.pad(w_f32, ((0, 0), (0, C_pad - C), (0, 0), (0, 0)))
    w_t = w_f32.transpose(2, 3, 1, 0)                       # (3,3,C_pad,Cout)
    w_eff = jnp.einsum('pik,qjl,klco->pqijco', R, R, w_t)   # (2,2,2,2,C_pad,Cout)
    w_eff = w_eff.reshape(4, 4, C_pad, Cout).astype(compute_dtype)

    # Channels-last, spatially zero-padded (pad=1 at ORIGINAL resolution),
    # flattened, plus a flat margin so every tap window is an in-bounds slice.
    x_nhwc = x.transpose(0, 2, 3, 1).astype(compute_dtype)  # (B,H,W,C)
    if C_pad != C:
        x_nhwc = jnp.pad(x_nhwc, ((0, 0), (0, 0), (0, 0), (0, C_pad - C)))
    x_sp = jnp.pad(x_nhwc, ((0, 0), (1, 1), (1, 1), (0, 0)))
    x_flat = x_sp.reshape(B, Np, C_pad)
    x_flat = jnp.pad(x_flat, ((0, 0), (margin, margin + (np_pad - Np)), (0, 0)))

    b2 = b.astype(jnp.float32).reshape(1, Cout)

    if vmem_limit_bytes is None:
        try:   # ~48 MiB on v7x (64 MiB physical), ~100 MiB on v5e/v6e (128 MiB)
            cap = pltpu.get_tpu_info().vmem_capacity_bytes
        except Exception:
            cap = 64 * 1024 * 1024
        vmem_limit_bytes = int(min(cap - 16 * 1024 * 1024, 100 * 1024 * 1024))

    kernel = functools.partial(_phase_conv_kernel,
                               wp=Wp, tile_n=tile_n, margin=margin)

    out = pl.pallas_call(
        kernel,
        out_shape=jax.ShapeDtypeStruct((B, 4, np_pad, Cout), compute_dtype),
        grid=(B, num_tiles),
        in_specs=[
            # Whole padded image; block index constant along the tile axis so
            # it is DMA'd into VMEM once per image and reused by every tile.
            pl.BlockSpec((1, n_tot, C_pad), lambda i, t: (i, 0, 0)),
            pl.BlockSpec((4, 4, C_pad, Cout), lambda i, t: (0, 0, 0, 0)),
            pl.BlockSpec((1, Cout), lambda i, t: (0, 0)),
        ],
        out_specs=pl.BlockSpec((1, 4, tile_n, Cout), lambda i, t: (i, 0, t, 0)),
        scratch_shapes=[pltpu.VMEM((4, tile_n, Cout), jnp.float32)],
        compiler_params=pltpu.CompilerParams(
            dimension_semantics=("parallel", "arbitrary"),
            vmem_limit_bytes=vmem_limit_bytes),
    )(x_flat, w_eff, b2)

    # De-interleave the 4 sub-pixel phases back to NCHW at 2x resolution and
    # drop the padded border (layout plumbing, done at compute dtype width).
    out = out[:, :, :Np, :].reshape(B, 2, 2, Hp, Wp, Cout)
    out = out[:, :, :, 1:H + 1, 1:W + 1, :]
    out = out.transpose(0, 5, 3, 1, 4, 2).reshape(B, Cout, 2 * H, 2 * W)
    return out.astype(x.dtype)


def _nearest_up2(x):
    """2x nearest-neighbor upsample on the last two dims of an NCHW tensor."""
    B, C, H, W = x.shape
    x = jnp.broadcast_to(x[:, :, :, None, :, None], (B, C, H, 2, W, 2))
    return x.reshape(B, C, 2 * H, 2 * W)


def _reference(x, w, b):
    """Plain-JAX reference: nearest 2x upsample + conv2d(pad=1)."""
    x_up = _nearest_up2(x)
    y = jax.lax.conv_general_dilated(
        x_up, w,
        window_strides=(1, 1),
        padding=((1, 1), (1, 1)),
        dimension_numbers=("NCHW", "OIHW", "NCHW"),
    )
    return y + b[None, :, None, None]


if __name__ == "__main__":
    key = jax.random.PRNGKey(0)
    kx, kw, kb = jax.random.split(key, 3)

    # Small shapes consistent with the module: channels == out_channels.
    B, C, H, W = 2, 4, 16, 16
    Cout = C

    x = jax.random.normal(kx, (B, C, H, W), dtype=jnp.float32)

    # Deterministic conv parameter init (PyTorch-style uniform bounds).
    fan_in = C * 3 * 3
    bound = 1.0 / (fan_in ** 0.5)
    w = jax.random.uniform(kw, (Cout, C, 3, 3), jnp.float32, -bound, bound)
    b = jax.random.uniform(kb, (Cout,), jnp.float32, -bound, bound)

    ref = _reference(x, w, b)

    # 1) f32 compute, small tile target -> exercises the multi-tile grid path.
    out_f32 = upsample_forward(x, w, b, compute_dtype=jnp.float32,
                               tile_n_target=128)
    out_f32 = jax.block_until_ready(out_f32)
    assert out_f32.shape == (B, Cout, 2 * H, 2 * W), out_f32.shape
    assert jnp.allclose(out_f32, ref, atol=1e-4, rtol=1e-4), float(
        jnp.max(jnp.abs(out_f32 - ref)))

    # 2) default bf16 compute path (f32 accumulation) -> looser tolerance.
    out_bf16 = upsample_forward(x, w, b)
    out_bf16 = jax.block_until_ready(out_bf16)
    assert out_bf16.shape == (B, Cout, 2 * H, 2 * W), out_bf16.shape
    assert jnp.allclose(out_bf16, ref, atol=5e-2, rtol=5e-2), float(
        jnp.max(jnp.abs(out_bf16 - ref)))

    print("KERNEL_OK")
</pallas_src>

<mosaic_0001>
module attributes {stable_mosaic.version = 11 : i64} {
  func.func @_phase_conv_kernel(%arg0: i32, %arg1: i32, %arg2: memref<1x374x8xf32, #tpu.memory_space<vmem>>, %arg3: memref<4x4x8x4xf32, #tpu.memory_space<vmem>>, %arg4: memref<1x4xf32, #tpu.memory_space<vmem>>, %arg5: memref<1x4x112x4xf32, #tpu.memory_space<vmem>>, %arg6: memref<4x112x4xf32, #tpu.memory_space<vmem>>) attributes {dimension_semantics = [#tpu.dimension_semantics<parallel>, #tpu.dimension_semantics<arbitrary>], iteration_bounds = array<i64: 2, 3>, scalar_prefetch = 0 : i64, scratch_operands = 1 : i64, tpu.core_type = #tpu.core_type<tc>, window_params = [{transform_indices = @transform_0, window_bounds = array<i64: 1, 374, 8>}, {pipeline_mode = #tpu.pipeline_mode<synchronous>, transform_indices = @transform_1, window_bounds = array<i64: 4, 4, 8, 4>}, {pipeline_mode = #tpu.pipeline_mode<synchronous>, transform_indices = @transform_2, window_bounds = array<i64: 1, 4>}, {transform_indices = @transform_3, window_bounds = array<i64: 1, 4, 112, 4>}]} {
    %c112_i32 = arith.constant 112 : i32
    %0 = arith.muli %arg1, %c112_i32 : i32
    %c19_i32 = arith.constant 19 : i32
    %1 = arith.addi %c19_i32, %0 : i32
    %c0 = arith.constant 0 : index
    %c0_0 = arith.constant 0 : index
    %2 = vector.load %arg4[%c0, %c0_0] : memref<1x4xf32, #tpu.memory_space<vmem>>, vector<1x4xf32>
    %c-18_i32 = arith.constant -18 : i32
    %3 = arith.addi %1, %c-18_i32 : i32
    %c-1_i32 = arith.constant -1 : i32
    %4 = arith.addi %3, %c-1_i32 : i32
    %c0_1 = arith.constant 0 : index
    %5 = arith.index_cast %4 : i32 to index
    %c0_2 = arith.constant 0 : index
    %6 = vector.load %arg2[%c0_1, %5, %c0_2] : memref<1x374x8xf32, #tpu.memory_space<vmem>>, vector<1x112x8xf32>
    %7 = vector.shape_cast %6 : vector<1x112x8xf32> to vector<112x8xf32>
    %c0_3 = arith.constant 0 : index
    %c0_4 = arith.constant 0 : index
    %c0_5 = arith.constant 0 : index
    %c0_6 = arith.constant 0 : index
    %8 = vector.load %arg3[%c0_3, %c0_4, %c0_5, %c0_6] : memref<4x4x8x4xf32, #tpu.memory_space<vmem>>, vector<1x1x8x4xf32>
    %9 = vector.shape_cast %8 : vector<1x1x8x4xf32> to vector<8x4xf32>
    %cst = arith.constant dense<0.000000e+00> : vector<112x4xf32>
    %10 = tpu.matmul %7, %9, %cst {dimension_numbers = #tpu.dot_dimension_numbers<[1], [0], [0], [1], [0, 0, 1, 1], [], []>} : vector<112x8xf32>, vector<8x4xf32>, vector<112x4xf32> -> vector<112x4xf32>
    %11 = vector.broadcast %2 : vector<1x4xf32> to vector<112x4xf32>
    %12 = arith.addf %10, %11 : vector<112x4xf32>
    %c0_7 = arith.constant 0 : index
    %c0_8 = arith.constant 0 : index
    %c0_9 = arith.constant 0 : index
    %13 = vector.load %arg6[%c0_7, %c0_8, %c0_9] : memref<4x112x4xf32, #tpu.memory_space<vmem>>, vector<1x112x4xf32>
    %14 = vector.shape_cast %13 : vector<1x112x4xf32> to vector<112x4xf32>
    %15 = vector.shape_cast %12 : vector<112x4xf32> to vector<1x112x4xf32>
    tpu.vector_store %arg6[%c0_7, %c0_8, %c0_9], %15 {strides = array<i32>} : memref<4x112x4xf32, #tpu.memory_space<vmem>>, vector<1x112x4xf32>,
    %c-18_i32_10 = arith.constant -18 : i32
    %16 = arith.addi %1, %c-18_i32_10 : i32
    %c0_i32 = arith.constant 0 : i32
    %17 = arith.addi %16, %c0_i32 : i32
    %c0_11 = arith.constant 0 : index
    %18 = arith.index_cast %17 : i32 to index
    %c0_12 = arith.constant 0 : index
    %19 = vector.load %arg2[%c0_11, %18, %c0_12] : memref<1x374x8xf32, #tpu.memory_space<vmem>>, vector<1x112x8xf32>
    %20 = vector.shape_cast %19 : vector<1x112x8xf32> to vector<112x8xf32>
    %c0_13 = arith.constant 0 : index
    %c1 = arith.constant 1 : index
    %c0_14 = arith.constant 0 : index
    %c0_15 = arith.constant 0 : index
    %21 = vector.load %arg3[%c0_13, %c1, %c0_14, %c0_15] : memref<4x4x8x4xf32, #tpu.memory_space<vmem>>, vector<1x1x8x4xf32>
    %22 = vector.shape_cast %21 : vector<1x1x8x4xf32> to vector<8x4xf32>
    %cst_16 = arith.constant dense<0.000000e+00> : vector<112x4xf32>
    %23 = tpu.matmul %20, %22, %cst_16 {dimension_numbers = #tpu.dot_dimension_numbers<[1], [0], [0], [1], [0, 0, 1, 1], [], []>} : vector<112x8xf32>, vector<8x4xf32>, vector<112x4xf32> -> vector<112x4xf32>
    %c0_17 = arith.constant 0 : index
    %c0_18 = arith.constant 0 : index
    %c0_19 = arith.constant 0 : index
    %24 = vector.load %arg6[%c0_17, %c0_18, %c0_19] : memref<4x112x4xf32, #tpu.memory_space<vmem>>, vector<1x112x4xf32>
    %25 = vector.shape_cast %24 : vector<1x112x4xf32> to vector<112x4xf32>
    %26 = arith.addf %25, %23 : vector<112x4xf32>
    %c0_20 = arith.constant 0 : index
    %c0_21 = arith.constant 0 : index
    %c0_22 = arith.constant 0 : index
    %27 = vector.load %arg6[%c0_20, %c0_21, %c0_22] : memref<4x112x4xf32, #tpu.memory_space<vmem>>, vector<1x112x4xf32>
    %28 = vector.shape_cast %27 : vector<1x112x4xf32> to vector<112x4xf32>
    %29 = vector.shape_cast %26 : vector<112x4xf32> to vector<1x112x4xf32>
    tpu.vector_store %arg6[%c0_20, %c0_21, %c0_22], %29 {strides = array<i32>} : memref<4x112x4xf32, #tpu.memory_space<vmem>>, vector<1x112x4xf32>,
    %c1_23 = arith.constant 1 : index
    %c0_24 = arith.constant 0 : index
    %c0_25 = arith.constant 0 : index
    %c0_26 = arith.constant 0 : index
    %30 = vector.load %arg3[%c1_23, %c0_24, %c0_25, %c0_26] : memref<4x4x8x4xf32, #tpu.memory_space<vmem>>, vector<1x1x8x4xf32>
    %31 = vector.shape_cast %30 : vector<1x1x8x4xf32> to vector<8x4xf32>
    %cst_27 = arith.constant dense<0.000000e+00> : vector<112x4xf32>
    %32 = tpu.matmul %20, %31, %cst_27 {dimension_numbers = #tpu.dot_dimension_numbers<[1], [0], [0], [1], [0, 0, 1, 1], [], []>} : vector<112x8xf32>, vector<8x4xf32>, vector<112x4xf32> -> vector<112x4xf32>
    %33 = vector.broadcast %2 : vector<1x4xf32> to vector<112x4xf32>
    %34 = arith.addf %32, %33 : vector<112x4xf32>
    %c1_28 = arith.constant 1 : index
    %c0_29 = arith.constant 0 : index
    %c0_30 = arith.constant 0 : index
    %35 = vector.load %arg6[%c1_28, %c0_29, %c0_30] : memref<4x112x4xf32, #tpu.memory_space<vmem>>, vector<1x112x4xf32>
    %36 = vector.shape_cast %35 : vector<1x112x4xf32> to vector<112x4xf32>
    %37 = vector.shape_cast %34 : vector<112x4xf32> to vector<1x112x4xf32>
    tpu.vector_store %arg6[%c1_28, %c0_29, %c0_30], %37 {strides = array<i32>} : memref<4x112x4xf32, #tpu.memory_space<vmem>>, vector<1x112x4xf32>,
    %c-18_i32_31 = arith.constant -18 : i32
    %38 = arith.addi %1, %c-18_i32_31 : i32
    %c1_i32 = arith.constant 1 : i32
    %39 = arith.addi %38, %c1_i32 : i32
    %c0_32 = arith.constant 0 : index
    %40 = arith.index_cast %39 : i32 to index
    %c0_33 = arith.constant 0 : index
    %41 = vector.load %arg2[%c0_32, %40, %c0_33] : memref<1x374x8xf32, #tpu.memory_space<vmem>>, vector<1x112x8xf32>
    %42 = vector.shape_cast %41 : vector<1x112x8xf32> to vector<112x8xf32>
    %c1_34 = arith.constant 1 : index
    %c1_35 = arith.constant 1 : index
    %c0_36 = arith.constant 0 : index
    %c0_37 = arith.constant 0 : index
    %43 = vector.load %arg3[%c1_34, %c1_35, %c0_36, %c0_37] : memref<4x4x8x4xf32, #tpu.memory_space<vmem>>, vector<1x1x8x4xf32>
    %44 = vector.shape_cast %43 : vector<1x1x8x4xf32> to vector<8x4xf32>
    %cst_38 = arith.constant dense<0.000000e+00> : vector<112x4xf32>
    %45 = tpu.matmul %42, %44, %cst_38 {dimension_numbers = #tpu.dot_dimension_numbers<[1], [0], [0], [1], [0, 0, 1, 1], [], []>} : vector<112x8xf32>, vector<8x4xf32>, vector<112x4xf32> -> vector<112x4xf32>
    %c1_39 = arith.constant 1 : index
    %c0_40 = arith.constant 0 : index
    %c0_41 = arith.constant 0 : index
    %46 = vector.load %arg6[%c1_39, %c0_40, %c0_41] : memref<4x112x4xf32, #tpu.memory_space<vmem>>, vector<1x112x4xf32>
    %47 = vector.shape_cast %46 : vector<1x112x4xf32> to vector<112x4xf32>
    %48 = arith.addf %47, %45 : vector<112x4xf32>
    %c1_42 = arith.constant 1 : index
    %c0_43 = arith.constant 0 : index
    %c0_44 = arith.constant 0 : index
    %49 = vector.load %arg6[%c1_42, %c0_43, %c0_44] : memref<4x112x4xf32, #tpu.memory_space<vmem>>, vector<1x112x4xf32>
    %50 = vector.shape_cast %49 : vector<1x112x4xf32> to vector<112x4xf32>
    %51 = vector.shape_cast %48 : vector<112x4xf32> to vector<1x112x4xf32>
    tpu.vector_store %arg6[%c1_42, %c0_43, %c0_44], %51 {strides = array<i32>} : memref<4x112x4xf32, #tpu.memory_space<vmem>>, vector<1x112x4xf32>,
    %c0_i32_45 = arith.constant 0 : i32
    %52 = arith.addi %1, %c0_i32_45 : i32
    %c-1_i32_46 = arith.constant -1 : i32
    %53 = arith.addi %52, %c-1_i32_46 : i32
    %c0_47 = arith.constant 0 : index
    %54 = arith.index_cast %53 : i32 to index
    %c0_48 = arith.constant 0 : index
    %55 = vector.load %arg2[%c0_47, %54, %c0_48] : memref<1x374x8xf32, #tpu.memory_space<vmem>>, vector<1x112x8xf32>
    %56 = vector.shape_cast %55 : vector<1x112x8xf32> to vector<112x8xf32>
    %c0_49 = arith.constant 0 : index
    %c2 = arith.constant 2 : index
    %c0_50 = arith.constant 0 : index
    %c0_51 = arith.constant 0 : index
    %57 = vector.load %arg3[%c0_49, %c2, %c0_50, %c0_51] : memref<4x4x8x4xf32, #tpu.memory_space<vmem>>, vector<1x1x8x4xf32>
    %58 = vector.shape_cast %57 : vector<1x1x8x4xf32> to vector<8x4xf32>
    %cst_52 = arith.constant dense<0.000000e+00> : vector<112x4xf32>
    %59 = tpu.matmul %56, %58, %cst_52 {dimension_numbers = #tpu.dot_dimension_numbers<[1], [0], [0], [1], [0, 0, 1, 1], [], []>} : vector<112x8xf32>, vector<8x4xf32>, vector<112x4xf32> -> vector<112x4xf32>
    %c0_53 = arith.constant 0 : index
    %c0_54 = arith.constant 0 : index
    %c0_55 = arith.constant 0 : index
    %60 = vector.load %arg6[%c0_53, %c0_54, %c0_55] : memref<4x112x4xf32, #tpu.memory_space<vmem>>, vector<1x112x4xf32>
    %61 = vector.shape_cast %60 : vector<1x112x4xf32> to vector<112x4xf32>
    %62 = arith.addf %61, %59 : vector<112x4xf32>
    %c0_56 = arith.constant 0 : index
    %c0_57 = arith.constant 0 : index
    %c0_58 = arith.constant 0 : index
    %63 = vector.load %arg6[%c0_56, %c0_57, %c0_58] : memref<4x112x4xf32, #tpu.memory_space<vmem>>, vector<1x112x4xf32>
    %64 = vector.shape_cast %63 : vector<1x112x4xf32> to vector<112x4xf32>
    %65 = vector.shape_cast %62 : vector<112x4xf32> to vector<1x112x4xf32>
    tpu.vector_store %arg6[%c0_56, %c0_57, %c0_58], %65 {strides = array<i32>} : memref<4x112x4xf32, #tpu.memory_space<vmem>>, vector<1x112x4xf32>,
    %c2_59 = arith.constant 2 : index
    %c0_60 = arith.constant 0 : index
    %c0_61 = arith.constant 0 : index
    %c0_62 = arith.constant 0 : index
    %66 = vector.load %arg3[%c2_59, %c0_60, %c0_61, %c0_62] : memref<4x4x8x4xf32, #tpu.memory_space<vmem>>, vector<1x1x8x4xf32>
    %67 = vector.shape_cast %66 : vector<1x1x8x4xf32> to vector<8x4xf32>
    %cst_63 = arith.constant dense<0.000000e+00> : vector<112x4xf32>
    %68 = tpu.matmul %56, %67, %cst_63 {dimension_numbers = #tpu.dot_dimension_numbers<[1], [0], [0], [1], [0, 0, 1, 1], [], []>} : vector<112x8xf32>, vector<8x4xf32>, vector<112x4xf32> -> vector<112x4xf32>
    %69 = vector.broadcast %2 : vector<1x4xf32> to vector<112x4xf32>
    %70 = arith.addf %68, %69 : vector<112x4xf32>
    %c2_64 = arith.constant 2 : index
    %c0_65 = arith.constant 0 : index
    %c0_66 = arith.constant 0 : index
    %71 = vector.load %arg6[%c2_64, %c0_65, %c0_66] : memref<4x112x4xf32, #tpu.memory_space<vmem>>, vector<1x112x4xf32>
    %72 = vector.shape_cast %71 : vector<1x112x4xf32> to vector<112x4xf32>
    %73 = vector.shape_cast %70 : vector<112x4xf32> to vector<1x112x4xf32>
    tpu.vector_store %arg6[%c2_64, %c0_65, %c0_66], %73 {strides = array<i32>} : memref<4x112x4xf32, #tpu.memory_space<vmem>>, vector<1x112x4xf32>,
    %c0_i32_67 = arith.constant 0 : i32
    %74 = arith.addi %1, %c0_i32_67 : i32
    %c0_i32_68 = arith.constant 0 : i32
    %75 = arith.addi %74, %c0_i32_68 : i32
    %c0_69 = arith.constant 0 : index
    %76 = arith.index_cast %75 : i32 to index
    %c0_70 = arith.constant 0 : index
    %77 = vector.load %arg2[%c0_69, %76, %c0_70] : memref<1x374x8xf32, #tpu.memory_space<vmem>>, vector<1x112x8xf32>
    %78 = vector.shape_cast %77 : vector<1x112x8xf32> to vector<112x8xf32>
    %c0_71 = arith.constant 0 : index
    %c3 = arith.constant 3 : index
    %c0_72 = arith.constant 0 : index
    %c0_73 = arith.constant 0 : index
    %79 = vector.load %arg3[%c0_71, %c3, %c0_72, %c0_73] : memref<4x4x8x4xf32, #tpu.memory_space<vmem>>, vector<1x1x8x4xf32>
    %80 = vector.shape_cast %79 : vector<1x1x8x4xf32> to vector<8x4xf32>
    %cst_74 = arith.constant dense<0.000000e+00> : vector<112x4xf32>
    %81 = tpu.matmul %78, %80, %cst_74 {dimension_numbers = #tpu.dot_dimension_numbers<[1], [0], [0], [1], [0, 0, 1, 1], [], []>} : vector<112x8xf32>, vector<8x4xf32>, vector<112x4xf32> -> vector<112x4xf32>
    %c0_75 = arith.constant 0 : index
    %c0_76 = arith.constant 0 : index
    %c0_77 = arith.constant 0 : index
    %82 = vector.load %arg6[%c0_75, %c0_76, %c0_77] : memref<4x112x4xf32, #tpu.memory_space<vmem>>, vector<1x112x4xf32>
    %83 = vector.shape_cast %82 : vector<1x112x4xf32> to vector<112x4xf32>
    %84 = arith.addf %83, %81 : vector<112x4xf32>
    %c0_78 = arith.constant 0 : index
    %c0_79 = arith.constant 0 : index
    %c0_80 = arith.constant 0 : index
    %85 = vector.load %arg6[%c0_78, %c0_79, %c0_80] : memref<4x112x4xf32, #tpu.memory_space<vmem>>, vector<1x112x4xf32>
    %86 = vector.shape_cast %85 : vector<1x112x4xf32> to vector<112x4xf32>
    %87 = vector.shape_cast %84 : vector<112x4xf32> to vector<1x112x4xf32>
    tpu.vector_store %arg6[%c0_78, %c0_79, %c0_80], %87 {strides = array<i32>} : memref<4x112x4xf32, #tpu.memory_space<vmem>>, vector<1x112x4xf32>,
    %c1_81 = arith.constant 1 : index
    %c2_82 = arith.constant 2 : index
    %c0_83 = arith.constant 0 : index
    %c0_84 = arith.constant 0 : index
    %88 = vector.load %arg3[%c1_81, %c2_82, %c0_83, %c0_84] : memref<4x4x8x4xf32, #tpu.memory_space<vmem>>, vector<1x1x8x4xf32>
    %89 = vector.shape_cast %88 : vector<1x1x8x4xf32> to vector<8x4xf32>
    %cst_85 = arith.constant dense<0.000000e+00> : vector<112x4xf32>
    %90 = tpu.matmul %78, %89, %cst_85 {dimension_numbers = #tpu.dot_dimension_numbers<[1], [0], [0], [1], [0, 0, 1, 1], [], []>} : vector<112x8xf32>, vector<8x4xf32>, vector<112x4xf32> -> vector<112x4xf32>
    %c1_86 = arith.constant 1 : index
    %c0_87 = arith.constant 0 : index
    %c0_88 = arith.constant 0 : index
    %91 = vector.load %arg6[%c1_86, %c0_87, %c0_88] : memref<4x112x4xf32, #tpu.memory_space<vmem>>, vector<1x112x4xf32>
    %92 = vector.shape_cast %91 : vector<1x112x4xf32> to vector<112x4xf32>
    %93 = arith.addf %92, %90 : vector<112x4xf32>
    %c1_89 = arith.constant 1 : index
    %c0_90 = arith.constant 0 : index
    %c0_91 = arith.constant 0 : index
    %94 = vector.load %arg6[%c1_89, %c0_90, %c0_91] : memref<4x112x4xf32, #tpu.memory_space<vmem>>, vector<1x112x4xf32>
    %95 = vector.shape_cast %94 : vector<1x112x4xf32> to vector<112x4xf32>
    %96 = vector.shape_cast %93 : vector<112x4xf32> to vector<1x112x4xf32>
    tpu.vector_store %arg6[%c1_89, %c0_90, %c0_91], %96 {strides = array<i32>} : memref<4x112x4xf32, #tpu.memory_space<vmem>>, vector<1x112x4xf32>,
    %c2_92 = arith.constant 2 : index
    %c1_93 = arith.constant 1 : index
    %c0_94 = arith.constant 0 : index
    %c0_95 = arith.constant 0 : index
    %97 = vector.load %arg3[%c2_92, %c1_93, %c0_94, %c0_95] : memref<4x4x8x4xf32, #tpu.memory_space<vmem>>, vector<1x1x8x4xf32>
    %98 = vector.shape_cast %97 : vector<1x1x8x4xf32> to vector<8x4xf32>
    %cst_96 = arith.constant dense<0.000000e+00> : vector<112x4xf32>
    %99 = tpu.matmul %78, %98, %cst_96 {dimension_numbers = #tpu.dot_dimension_numbers<[1], [0], [0], [1], [0, 0, 1, 1], [], []>} : vector<112x8xf32>, vector<8x4xf32>, vector<112x4xf32> -> vector<112x4xf32>
    %c2_97 = arith.constant 2 : index
    %c0_98 = arith.constant 0 : index
    %c0_99 = arith.constant 0 : index
    %100 = vector.load %arg6[%c2_97, %c0_98, %c0_99] : memref<4x112x4xf32, #tpu.memory_space<vmem>>, vector<1x112x4xf32>
    %101 = vector.shape_cast %100 : vector<1x112x4xf32> to vector<112x4xf32>
    %102 = arith.addf %101, %99 : vector<112x4xf32>
    %c2_100 = arith.constant 2 : index
    %c0_101 = arith.constant 0 : index
    %c0_102 = arith.constant 0 : index
    %103 = vector.load %arg6[%c2_100, %c0_101, %c0_102] : memref<4x112x4xf32, #tpu.memory_space<vmem>>, vector<1x112x4xf32>
    %104 = vector.shape_cast %103 : vector<1x112x4xf32> to vector<112x4xf32>
    %105 = vector.shape_cast %102 : vector<112x4xf32> to vector<1x112x4xf32>
    tpu.vector_store %arg6[%c2_100, %c0_101, %c0_102], %105 {strides = array<i32>} : memref<4x112x4xf32, #tpu.memory_space<vmem>>, vector<1x112x4xf32>,
    %c3_103 = arith.constant 3 : index
    %c0_104 = arith.constant 0 : index
    %c0_105 = arith.constant 0 : index
    %c0_106 = arith.constant 0 : index
    %106 = vector.load %arg3[%c3_103, %c0_104, %c0_105, %c0_106] : memref<4x4x8x4xf32, #tpu.memory_space<vmem>>, vector<1x1x8x4xf32>
    %107 = vector.shape_cast %106 : vector<1x1x8x4xf32> to vector<8x4xf32>
    %cst_107 = arith.constant dense<0.000000e+00> : vector<112x4xf32>
    %108 = tpu.matmul %78, %107, %cst_107 {dimension_numbers = #tpu.dot_dimension_numbers<[1], [0], [0], [1], [0, 0, 1, 1], [], []>} : vector<112x8xf32>, vector<8x4xf32>, vector<112x4xf32> -> vector<112x4xf32>
    %109 = vector.broadcast %2 : vector<1x4xf32> to vector<112x4xf32>
    %110 = arith.addf %108, %109 : vector<112x4xf32>
    %c3_108 = arith.constant 3 : index
    %c0_109 = arith.constant 0 : index
    %c0_110 = arith.constant 0 : index
    %111 = vector.load %arg6[%c3_108, %c0_109, %c0_110] : memref<4x112x4xf32, #tpu.memory_space<vmem>>, vector<1x112x4xf32>
    %112 = vector.shape_cast %111 : vector<1x112x4xf32> to vector<112x4xf32>
    %113 = vector.shape_cast %110 : vector<112x4xf32> to vector<1x112x4xf32>
    tpu.vector_store %arg6[%c3_108, %c0_109, %c0_110], %113 {strides = array<i32>} : memref<4x112x4xf32, #tpu.memory_space<vmem>>, vector<1x112x4xf32>,
    %c0_i32_111 = arith.constant 0 : i32
    %114 = arith.addi %1, %c0_i32_111 : i32
    %c1_i32_112 = arith.constant 1 : i32
    %115 = arith.addi %114, %c1_i32_112 : i32
    %c0_113 = arith.constant 0 : index
    %116 = arith.index_cast %115 : i32 to index
    %c0_114 = arith.constant 0 : index
    %117 = vector.load %arg2[%c0_113, %116, %c0_114] : memref<1x374x8xf32, #tpu.memory_space<vmem>>, vector<1x112x8xf32>
    %118 = vector.shape_cast %117 : vector<1x112x8xf32> to vector<112x8xf32>
    %c1_115 = arith.constant 1 : index
    %c3_116 = arith.constant 3 : index
    %c0_117 = arith.constant 0 : index
    %c0_118 = arith.constant 0 : index
    %119 = vector.load %arg3[%c1_115, %c3_116, %c0_117, %c0_118] : memref<4x4x8x4xf32, #tpu.memory_space<vmem>>, vector<1x1x8x4xf32>
    %120 = vector.shape_cast %119 : vector<1x1x8x4xf32> to vector<8x4xf32>
    %cst_119 = arith.constant dense<0.000000e+00> : vector<112x4xf32>
    %121 = tpu.matmul %118, %120, %cst_119 {dimension_numbers = #tpu.dot_dimension_numbers<[1], [0], [0], [1], [0, 0, 1, 1], [], []>} : vector<112x8xf32>, vector<8x4xf32>, vector<112x4xf32> -> vector<112x4xf32>
    %c1_120 = arith.constant 1 : index
    %c0_121 = arith.constant 0 : index
    %c0_122 = arith.constant 0 : index
    %122 = vector.load %arg6[%c1_120, %c0_121, %c0_122] : memref<4x112x4xf32, #tpu.memory_space<vmem>>, vector<1x112x4xf32>
    %123 = vector.shape_cast %122 : vector<1x112x4xf32> to vector<112x4xf32>
    %124 = arith.addf %123, %121 : vector<112x4xf32>
    %c1_123 = arith.constant 1 : index
    %c0_124 = arith.constant 0 : index
    %c0_125 = arith.constant 0 : index
    %125 = vector.load %arg6[%c1_123, %c0_124, %c0_125] : memref<4x112x4xf32, #tpu.memory_space<vmem>>, vector<1x112x4xf32>
    %126 = vector.shape_cast %125 : vector<1x112x4xf32> to vector<112x4xf32>
    %127 = vector.shape_cast %124 : vector<112x4xf32> to vector<1x112x4xf32>
    tpu.vector_store %arg6[%c1_123, %c0_124, %c0_125], %127 {strides = array<i32>} : memref<4x112x4xf32, #tpu.memory_space<vmem>>, vector<1x112x4xf32>,
    %c3_126 = arith.constant 3 : index
    %c1_127 = arith.constant 1 : index
    %c0_128 = arith.constant 0 : index
    %c0_129 = arith.constant 0 : index
    %128 = vector.load %arg3[%c3_126, %c1_127, %c0_128, %c0_129] : memref<4x4x8x4xf32, #tpu.memory_space<vmem>>, vector<1x1x8x4xf32>
    %129 = vector.shape_cast %128 : vector<1x1x8x4xf32> to vector<8x4xf32>
    %cst_130 = arith.constant dense<0.000000e+00> : vector<112x4xf32>
    %130 = tpu.matmul %118, %129, %cst_130 {dimension_numbers = #tpu.dot_dimension_numbers<[1], [0], [0], [1], [0, 0, 1, 1], [], []>} : vector<112x8xf32>, vector<8x4xf32>, vector<112x4xf32> -> vector<112x4xf32>
    %c3_131 = arith.constant 3 : index
    %c0_132 = arith.constant 0 : index
    %c0_133 = arith.constant 0 : index
    %131 = vector.load %arg6[%c3_131, %c0_132, %c0_133] : memref<4x112x4xf32, #tpu.memory_space<vmem>>, vector<1x112x4xf32>
    %132 = vector.shape_cast %131 : vector<1x112x4xf32> to vector<112x4xf32>
    %133 = arith.addf %132, %130 : vector<112x4xf32>
    %c3_134 = arith.constant 3 : index
    %c0_135 = arith.constant 0 : index
    %c0_136 = arith.constant 0 : index
    %134 = vector.load %arg6[%c3_134, %c0_135, %c0_136] : memref<4x112x4xf32, #tpu.memory_space<vmem>>, vector<1x112x4xf32>
    %135 = vector.shape_cast %134 : vector<1x112x4xf32> to vector<112x4xf32>
    %136 = vector.shape_cast %133 : vector<112x4xf32> to vector<1x112x4xf32>
    tpu.vector_store %arg6[%c3_134, %c0_135, %c0_136], %136 {strides = array<i32>} : memref<4x112x4xf32, #tpu.memory_space<vmem>>, vector<1x112x4xf32>,
    %c18_i32 = arith.constant 18 : i32
    %137 = arith.addi %1, %c18_i32 : i32
    %c-1_i32_137 = arith.constant -1 : i32
    %138 = arith.addi %137, %c-1_i32_137 : i32
    %c0_138 = arith.constant 0 : index
    %139 = arith.index_cast %138 : i32 to index
    %c0_139 = arith.constant 0 : index
    %140 = vector.load %arg2[%c0_138, %139, %c0_139] : memref<1x374x8xf32, #tpu.memory_space<vmem>>, vector<1x112x8xf32>
    %141 = vector.shape_cast %140 : vector<1x112x8xf32> to vector<112x8xf32>
    %c2_140 = arith.constant 2 : index
    %c2_141 = arith.constant 2 : index
    %c0_142 = arith.constant 0 : index
    %c0_143 = arith.constant 0 : index
    %142 = vector.load %arg3[%c2_140, %c2_141, %c0_142, %c0_143] : memref<4x4x8x4xf32, #tpu.memory_space<vmem>>, vector<1x1x8x4xf32>
    %143 = vector.shape_cast %142 : vector<1x1x8x4xf32> to vector<8x4xf32>
    %cst_144 = arith.constant dense<0.000000e+00> : vector<112x4xf32>
    %144 = tpu.matmul %141, %143, %cst_144 {dimension_numbers = #tpu.dot_dimension_numbers<[1], [0], [0], [1], [0, 0, 1, 1], [], []>} : vector<112x8xf32>, vector<8x4xf32>, vector<112x4xf32> -> vector<112x4xf32>
    %c2_145 = arith.constant 2 : index
    %c0_146 = arith.constant 0 : index
    %c0_147 = arith.constant 0 : index
    %145 = vector.load %arg6[%c2_145, %c0_146, %c0_147] : memref<4x112x4xf32, #tpu.memory_space<vmem>>, vector<1x112x4xf32>
    %146 = vector.shape_cast %145 : vector<1x112x4xf32> to vector<112x4xf32>
    %147 = arith.addf %146, %144 : vector<112x4xf32>
    %c2_148 = arith.constant 2 : index
    %c0_149 = arith.constant 0 : index
    %c0_150 = arith.constant 0 : index
    %148 = vector.load %arg6[%c2_148, %c0_149, %c0_150] : memref<4x112x4xf32, #tpu.memory_space<vmem>>, vector<1x112x4xf32>
    %149 = vector.shape_cast %148 : vector<1x112x4xf32> to vector<112x4xf32>
    %150 = vector.shape_cast %147 : vector<112x4xf32> to vector<1x112x4xf32>
    tpu.vector_store %arg6[%c2_148, %c0_149, %c0_150], %150 {strides = array<i32>} : memref<4x112x4xf32, #tpu.memory_space<vmem>>, vector<1x112x4xf32>,
    %c18_i32_151 = arith.constant 18 : i32
    %151 = arith.addi %1, %c18_i32_151 : i32
    %c0_i32_152 = arith.constant 0 : i32
    %152 = arith.addi %151, %c0_i32_152 : i32
    %c0_153 = arith.constant 0 : index
    %153 = arith.index_cast %152 : i32 to index
    %c0_154 = arith.constant 0 : index
    %154 = vector.load %arg2[%c0_153, %153, %c0_154] : memref<1x374x8xf32, #tpu.memory_space<vmem>>, vector<1x112x8xf32>
    %155 = vector.shape_cast %154 : vector<1x112x8xf32> to vector<112x8xf32>
    %c2_155 = arith.constant 2 : index
    %c3_156 = arith.constant 3 : index
    %c0_157 = arith.constant 0 : index
    %c0_158 = arith.constant 0 : index
    %156 = vector.load %arg3[%c2_155, %c3_156, %c0_157, %c0_158] : memref<4x4x8x4xf32, #tpu.memory_space<vmem>>, vector<1x1x8x4xf32>
    %157 = vector.shape_cast %156 : vector<1x1x8x4xf32> to vector<8x4xf32>
    %cst_159 = arith.constant dense<0.000000e+00> : vector<112x4xf32>
    %158 = tpu.matmul %155, %157, %cst_159 {dimension_numbers = #tpu.dot_dimension_numbers<[1], [0], [0], [1], [0, 0, 1, 1], [], []>} : vector<112x8xf32>, vector<8x4xf32>, vector<112x4xf32> -> vector<112x4xf32>
    %c2_160 = arith.constant 2 : index
    %c0_161 = arith.constant 0 : index
    %c0_162 = arith.constant 0 : index
    %159 = vector.load %arg6[%c2_160, %c0_161, %c0_162] : memref<4x112x4xf32, #tpu.memory_space<vmem>>, vector<1x112x4xf32>
    %160 = vector.shape_cast %159 : vector<1x112x4xf32> to vector<112x4xf32>
    %161 = arith.addf %160, %158 : vector<112x4xf32>
    %c2_163 = arith.constant 2 : index
    %c0_164 = arith.constant 0 : index
    %c0_165 = arith.constant 0 : index
    %162 = vector.load %arg6[%c2_163, %c0_164, %c0_165] : memref<4x112x4xf32, #tpu.memory_space<vmem>>, vector<1x112x4xf32>
    %163 = vector.shape_cast %162 : vector<1x112x4xf32> to vector<112x4xf32>
    %164 = vector.shape_cast %161 : vector<112x4xf32> to vector<1x112x4xf32>
    tpu.vector_store %arg6[%c2_163, %c0_164, %c0_165], %164 {strides = array<i32>} : memref<4x112x4xf32, #tpu.memory_space<vmem>>, vector<1x112x4xf32>,
    %c3_166 = arith.constant 3 : index
    %c2_167 = arith.constant 2 : index
    %c0_168 = arith.constant 0 : index
    %c0_169 = arith.constant 0 : index
    %165 = vector.load %arg3[%c3_166, %c2_167, %c0_168, %c0_169] : memref<4x4x8x4xf32, #tpu.memory_space<vmem>>, vector<1x1x8x4xf32>
    %166 = vector.shape_cast %165 : vector<1x1x8x4xf32> to vector<8x4xf32>
    %cst_170 = arith.constant dense<0.000000e+00> : vector<112x4xf32>
    %167 = tpu.matmul %155, %166, %cst_170 {dimension_numbers = #tpu.dot_dimension_numbers<[1], [0], [0], [1], [0, 0, 1, 1], [], []>} : vector<112x8xf32>, vector<8x4xf32>, vector<112x4xf32> -> vector<112x4xf32>
    %c3_171 = arith.constant 3 : index
    %c0_172 = arith.constant 0 : index
    %c0_173 = arith.constant 0 : index
    %168 = vector.load %arg6[%c3_171, %c0_172, %c0_173] : memref<4x112x4xf32, #tpu.memory_space<vmem>>, vector<1x112x4xf32>
    %169 = vector.shape_cast %168 : vector<1x112x4xf32> to vector<112x4xf32>
    %170 = arith.addf %169, %167 : vector<112x4xf32>
    %c3_174 = arith.constant 3 : index
    %c0_175 = arith.constant 0 : index
    %c0_176 = arith.constant 0 : index
    %171 = vector.load %arg6[%c3_174, %c0_175, %c0_176] : memref<4x112x4xf32, #tpu.memory_space<vmem>>, vector<1x112x4xf32>
    %172 = vector.shape_cast %171 : vector<1x112x4xf32> to vector<112x4xf32>
    %173 = vector.shape_cast %170 : vector<112x4xf32> to vector<1x112x4xf32>
    tpu.vector_store %arg6[%c3_174, %c0_175, %c0_176], %173 {strides = array<i32>} : memref<4x112x4xf32, #tpu.memory_space<vmem>>, vector<1x112x4xf32>,
    %c18_i32_177 = arith.constant 18 : i32
    %174 = arith.addi %1, %c18_i32_177 : i32
    %c1_i32_178 = arith.constant 1 : i32
    %175 = arith.addi %174, %c1_i32_178 : i32
    %c0_179 = arith.constant 0 : index
    %176 = arith.index_cast %175 : i32 to index
    %c0_180 = arith.constant 0 : index
    %177 = vector.load %arg2[%c0_179, %176, %c0_180] : memref<1x374x8xf32, #tpu.memory_space<vmem>>, vector<1x112x8xf32>
    %178 = vector.shape_cast %177 : vector<1x112x8xf32> to vector<112x8xf32>
    %c3_181 = arith.constant 3 : index
    %c3_182 = arith.constant 3 : index
    %c0_183 = arith.constant 0 : index
    %c0_184 = arith.constant 0 : index
    %179 = vector.load %arg3[%c3_181, %c3_182, %c0_183, %c0_184] : memref<4x4x8x4xf32, #tpu.memory_space<vmem>>, vector<1x1x8x4xf32>
    %180 = vector.shape_cast %179 : vector<1x1x8x4xf32> to vector<8x4xf32>
    %cst_185 = arith.constant dense<0.000000e+00> : vector<112x4xf32>
    %181 = tpu.matmul %178, %180, %cst_185 {dimension_numbers = #tpu.dot_dimension_numbers<[1], [0], [0], [1], [0, 0, 1, 1], [], []>} : vector<112x8xf32>, vector<8x4xf32>, vector<112x4xf32> -> vector<112x4xf32>
    %c3_186 = arith.constant 3 : index
    %c0_187 = arith.constant 0 : index
    %c0_188 = arith.constant 0 : index
    %182 = vector.load %arg6[%c3_186, %c0_187, %c0_188] : memref<4x112x4xf32, #tpu.memory_space<vmem>>, vector<1x112x4xf32>
    %183 = vector.shape_cast %182 : vector<1x112x4xf32> to vector<112x4xf32>
    %184 = arith.addf %183, %181 : vector<112x4xf32>
    %c3_189 = arith.constant 3 : index
    %c0_190 = arith.constant 0 : index
    %c0_191 = arith.constant 0 : index
    %185 = vector.load %arg6[%c3_189, %c0_190, %c0_191] : memref<4x112x4xf32, #tpu.memory_space<vmem>>, vector<1x112x4xf32>
    %186 = vector.shape_cast %185 : vector<1x112x4xf32> to vector<112x4xf32>
    %187 = vector.shape_cast %184 : vector<112x4xf32> to vector<1x112x4xf32>
    tpu.vector_store %arg6[%c3_189, %c0_190, %c0_191], %187 {strides = array<i32>} : memref<4x112x4xf32, #tpu.memory_space<vmem>>, vector<1x112x4xf32>,
    %c0_192 = arith.constant 0 : index
    %c0_193 = arith.constant 0 : index
    %c0_194 = arith.constant 0 : index
    %188 = vector.load %arg6[%c0_192, %c0_193, %c0_194] : memref<4x112x4xf32, #tpu.memory_space<vmem>>, vector<4x112x4xf32>
    %c0_195 = arith.constant 0 : index
    %c0_196 = arith.constant 0 : index
    %c0_197 = arith.constant 0 : index
    %c0_198 = arith.constant 0 : index
    %189 = vector.load %arg5[%c0_195, %c0_196, %c0_197, %c0_198] : memref<1x4x112x4xf32, #tpu.memory_space<vmem>>, vector<1x4x112x4xf32>
    %190 = vector.shape_cast %189 : vector<1x4x112x4xf32> to vector<4x112x4xf32>
    %191 = vector.shape_cast %188 : vector<4x112x4xf32> to vector<1x4x112x4xf32>
    tpu.vector_store %arg5[%c0_195, %c0_196, %c0_197, %c0_198], %191 {strides = array<i32>} : memref<1x4x112x4xf32, #tpu.memory_space<vmem>>, vector<1x4x112x4xf32>,
    return
  }
  func.func @transform_0(%arg0: i32, %arg1: i32) -> (i32, i32, i32) {
    %c0_i32 = arith.constant 0 : i32
    %c0_i32_0 = arith.constant 0 : i32
    %c0_i32_1 = arith.constant 0 : i32
    return %arg0, %c0_i32, %c0_i32_0 : i32, i32, i32
  }
  func.func @transform_1(%arg0: i32, %arg1: i32) -> (i32, i32, i32, i32) {
    %c0_i32 = arith.constant 0 : i32
    %c0_i32_0 = arith.constant 0 : i32
    %c0_i32_1 = arith.constant 0 : i32
    %c0_i32_2 = arith.constant 0 : i32
    %c0_i32_3 = arith.constant 0 : i32
    return %c0_i32, %c0_i32_0, %c0_i32_1, %c0_i32_2 : i32, i32, i32, i32
  }
  func.func @transform_2(%arg0: i32, %arg1: i32) -> (i32, i32) {
    %c0_i32 = arith.constant 0 : i32
    %c0_i32_0 = arith.constant 0 : i32
    %c0_i32_1 = arith.constant 0 : i32
    return %c0_i32, %c0_i32_0 : i32, i32
  }
  func.func @transform_3(%arg0: i32, %arg1: i32) -> (i32, i32, i32, i32) {
    %c0_i32 = arith.constant 0 : i32
    %c0_i32_0 = arith.constant 0 : i32
    %c0_i32_1 = arith.constant 0 : i32
    return %arg0, %c0_i32, %arg1, %c0_i32_0 : i32, i32, i32, i32
  }
}

</mosaic_0001>

<bundles_post_ra>
// kernel: tpu_custom_call.1
= control target key start
LH: loop header
LB: loop body
LE: loop exit
PB: predicated region body
PF: predicated region fallthrough
CT: control target
= control target key end

     0   :  { %8 = vsyncpa [#allocation4], 0  ;;  %s5108_s12 = smov 0   ;;  %s5110_s13 = smov 0   ;;  %s6155_s0 = inlined_call_operand.vmem [shape: f32[2,374,8], index: 0, kind: input, shape index: {}]   ;;  %s6156_s1 = inlined_call_operand.vmem [shape: f32[4,4,8,4], index: 1, kind: input, shape index: {}]   ;;  %s6157_s2 = inlined_call_operand.hbm [shape: f32[1,4], index: 2, kind: input, shape index: {}]   ;;  %s6158_s3 = inlined_call_operand.vmem [shape: f32[2,4,336,4], index: 3, kind: output, shape index: {}]  }
   0x1   :  { %s5112_s14 = smov 0   ;;  %s5114_s15 = smov 0  }
   0x2   :  { %s5116_s16 = smov 0   ;;  %s5118_s17 = smov 0  }
   0x3   :  { %s5120_s18 = smov 0  }
   0x4 LB: > { %s3957_s19 = sadd.s32 4294967295, %s5085_s18   ;;  %s23_s20 = sadd.s32 1, %s5077_s16  ;;  %s5085_s18 = sphi %s5120_s18, %s14_s18   ;;  %s5081_s17 = sphi %s5118_s17, %s6174_s17   ;;  %s5077_s16 = sphi %s5116_s16, %s6173_s16   ;;  %s5073_s15 = sphi %s5114_s15, %s6172_s15   ;;  %s5069_s14 = sphi %s5112_s14, %s6171_s14   ;;  %s5065_s13 = sphi %s5110_s13, %s6170_s13   ;;  %s5061_s12 = sphi %s5108_s12, %s6169_s12  }
   0x5   : > { %p24_p0 = scmp.ge.s32.totalorder %s23_s20, 3  ;;  %s26_s21 = sadd.s32 1, %s5081_s17 }
   0x6   : > { %s103_s22 = sadd.s32 1, %s5065_s13  ;;  %p113_p1 = scmp.ne.s32.totalorder %s5065_s13, %s5061_s12 }
   0x7   : > { %s6176_s20 = smov (%p24_p0, %s23_s20), 0  ;;  %s6178_s21 = smov (!%p24_p0, %s26_s21), %s5081_s17 }
   0x8   : > { %s99_s23 = ssub.s32 %s5077_s16, %s6176_s20  ;;  %p114_p2 = scmp.eq.s32.totalorder %s3957_s19, 5 }
   0x9   : > { %p28_p3 = scmp.ge.s32.totalorder %s6178_s21, 2  ;;  %p3959_p4 = scmp.ge.s32.totalorder %s5085_s18, 1 }
   0xa   : > { %p5155_p5 = por %p114_p2, %p113_p1  ;;  %p127_p6 = scmp.lt.s32.totalorder %s5085_s18, 7 }
   0xb   : > { %s6180_s21 = smov (%p28_p3, %s6178_s21), 0  ;;  %p5168_p8 = scmp.eq.s32.totalorder %s3957_s19, 0 }
   0xc   : > { %s6162_s24 = scalar_select %p5155_p5, 1, 0 }
   0xd   : > { %p5162_p7 = pnand %p3959_p4, %p127_p6  ;;  %s98_s26 = ssub.s32 %s5081_s17, %s6180_s21 }
   0xe   : > { %s6164_s27 = scalar_select %p5168_p8, 1, 0 }
   0xf   : > { %s6163_s25 = scalar_select %p5162_p7, 1, 0 }
  0x10   : > { %s100_s28 = sor.u32 %s99_s23, %s98_s26  ;;  %p4935_p9 = pneg %p5162_p7 }
  0x11   : > { %p101_p10 = scmp.eq.s32.totalorder %s100_s28, 0  ;;  %s5087_s29 = smov [#allocation3]  }
  0x12   : > { %s143_s30 = sshll.u32 %s5087_s29, 4  ;;  %p5176_p11 = pnand %p5168_p8, %p4935_p9  ;;  %s144_s30 = int_to_ptr.vmem [resolvable:$true] %s143_s30 }
  0x13   : > { %s5181_s5 = scalar_select %p101_p10, %s5065_s13, %s103_s22  }
  0x14   : > { %s4999_s8 = scalar_lea.hbm %s6157_s2, 16  ;;  %p5001_p13 = pneg %p5176_p11 }
  0x15   : > { %p5000_p12 = scmp.ne.s32.totalorder %s6157_s2, %s4999_s8  ;;  %p5006_p2 = scmp.lt.u32.totalorder %s4999_s8, %s6157_s2 }
  0x17   : > { %p5002_p0 = pnand %p5001_p13, %p5000_p12 }
  0x19   : > { %p5003_p1 = pneg %p5002_p0 }
  0x1b   : > { %p5008_p3 = pnand %p5006_p2, %p5003_p1 }
  0x1d   : > { %5011 = shalt.err (!%p5008_p3)
}
  0x1e   : > { %s5012_s22 = scalar_lea.vmem %s144_s30, 16  ;;  %s5019_s23 = scalar_lea.vmem %s144_s30, 32 }
  0x1f   : > { %p5013_p4 = scmp.ne.s32.totalorder %s144_s30, %s5012_s22  ;;  %p5020_p10 = scmp.lt.s32.totalorder %s144_s30, %s144_s30 }
  0x20   : > { %p5021_p5 = scmp.lt.s32.totalorder %s5019_s23, %s5012_s22 }
  0x21   : > { %p5015_p6 = pnand %p5013_p4, %p5001_p13 }
  0x22   : > { %p5022_p8 = por %p5021_p5, %p5020_p10 }
  0x23   : > { %p5016_p9 = pneg %p5015_p6 }
  0x25   : > { %p5023_p7 = pnand %p5022_p8, %p5016_p9 }
  0x27   : > { %5026 = shalt.err (!%p5023_p7)
}
  0x28   : > { %4938 = dma.hbm_to_vmem [thread:$0]  (!%p5176_p11), %s6157_s2, 16, %s144_s30, [#allocation4]  }
  0x29   : > { %p6166_p12 = scmp.ne.s32.totalorder %s6163_s25, 0 }
  0x2a   : > { %p6167_p0 = scmp.ne.s32.totalorder (!%p6166_p12), %s6164_s27, 0 }
  0x2b   : > { %164 = sbr.rel (%p6166_p12) target bundleno = 533 (0x215), region = 32 }
  0x32   : > { %5056 = dma.done.wait (%p6167_p0), [#allocation4], 16  }
  0x33   : > { %5058 = vsyncadd (%p6167_p0), [#allocation4], 4294967280  ;;  %p187_p5 = scmp.lt.s32.totalorder %s5073_s15, 1  ;;  %s193_s6 = smul.u32 112, %s5069_s14  ;;  %vm218_vm0 = vcmask 64512   ;;  %v211_v0 = vld [vmem:[%s6156_s1] sm:$0xff] }
  0x34   : > { %v3994_v1 = vld [vmem:[%s6156_s1 + $0x8] sm:$0xff]  ;;  %4560 = vmatprep.subr.mxu0 %v211_v0  ;;  %v4009_v6 = vld [vmem:[%s6156_s1 + $0x20] sm:$0xff]  ;;  %v4067_v18 = vld [vmem:[%s6156_s1 + $0x10] sm:$0xff]  ;;  %vm396_vm1 = vcmask 31744   ;;  %p6168_p7 = scmp.ne.s32.totalorder %s6162_s24, 0 }
  0x35   : > { %s188_s29 = scalar_select %p187_p5, %s5073_s15, 1  ;;  %4583 = vmatprep.subr.mxu1 %v3994_v1  ;;  %4561 = vmatpush3.msra.mxu0 %v211_v0  ;;  %v4038_v11 = vld [vmem:[%s6156_s1 + $0x28] sm:$0xff]  ;;  %v4082_v21 = vld [vmem:[%s6156_s1 + $0x40] sm:$0xff]  ;;  %v4111_v37 = vld [vmem:[%s6156_s1 + $0x18] sm:$0xff] }
  0x36   : > { %4584 = vmatpush3.msra.mxu1 %v3994_v1  ;;  %4606 = vmatprep.subr.mxu0 %v4009_v6  ;;  %v4126_v38 = vld [vmem:[%s6156_s1 + $0x30] sm:$0xff]  ;;  %v4141_v50 = vld [vmem:[%s6156_s1 + $0x48] sm:$0xff]  ;;  %v4156_v51 = vld [vmem:[%s6156_s1 + $0x60] sm:$0xff]  ;;  %s3597_s11 = smul.u32 (%p6168_p7), 14, %s5069_s14 }
  0x37   : > { %s4929_s4 = smul.u32 376, %s188_s29  ;;  %4629 = vmatprep.subr.mxu1 %v4038_v11  ;;  %v4185_v57 = vld [vmem:[%s6156_s1 + $0x38] sm:$0xff]  ;;  %v4200_v58 = vld [vmem:[%s6156_s1 + $0x68] sm:$0xff] }
  0x38   : > { %s4930_s19 = smul.u32 (%p6168_p7), 168, %s5073_s15 }
  0x39   : > { %s191_s30 = scalar_lea.vmem %s6155_s0, %s4929_s4 }
  0x3a   : > { %s5217_s27 = scalar_lea.vmem %s191_s30, %s193_s6  ;;  %s3599_s24 = sadd.s32 (%p6168_p7), %s4930_s19, %s3597_s11 }
  0x3b   : > { %v197_v2 = vld [vmem:[%s5217_s27] sm:$0xff]  ;;  %v198_v4 = vld [vmem:[%s5217_s27 + $0x8] sm:$0xff]  ;;  %v199_v7 = vld [vmem:[%s5217_s27 + $0x10] sm:$0xff]  ;;  %s4317_s14 = sshll.u32 (%p6168_p7), %s3599_s24, 3 }
  0x3c   : > { %v5221_v3 = vld [vmem:[%s5217_s27 + $0x1] sm:$0xff]  ;;  %4562 = vmatprep.mubr.msk.f32.mxu0 %vm218_vm0, %v197_v2  ;;  %v5226_v5 = vld [vmem:[%s5217_s27 + $0x9] sm:$0xff]  ;;  %v5235_v8 = vld [vmem:[%s5217_s27 + $0x11] sm:$0xff]  ;;  %s6035_s23 = scalar_lea.vmem (%p6168_p7), %s6158_s3, %s4317_s14 }
  0x3d   : > { %4585 = vmatprep.mubr.msk.f32.mxu1 %vm218_vm0, %v5221_v3  ;;  %4563 = vmatmul.mubr.msk.f32.vlgmr.msra.gmra.mrb[0].mxu0 %vm218_vm0, %v198_v4  ;;  %v200_v9 = vld [vmem:[%s5217_s27 + $0x18] sm:$0xff]  ;;  %v201_v12 = vld [vmem:[%s5217_s27 + $0x20] sm:$0xff]  ;;  %v202_v14 = vld [vmem:[%s5217_s27 + $0x28] sm:$0xff] }
  0x3e   : > { %4586 = vmatmul.mubr.msk.f32.vlgmr.msra.gmra.mrb[0].mxu1 %vm218_vm0, %v5226_v5  ;;  %4565 = vmatprep.mubr.msk.f32.mxu0 %vm218_vm0, %v199_v7  ;;  %v5243_v10 = vld [vmem:[%s5217_s27 + $0x19] sm:$0xff]  ;;  %v5252_v13 = vld [vmem:[%s5217_s27 + $0x21] sm:$0xff]  ;;  %v5262_v15 = vld [vmem:[%s5217_s27 + $0x29] sm:$0xff] }
  0x3f   : > { %4607 = vmatpush3.msra.mxu0 %v4009_v6  ;;  %4588 = vmatprep.mubr.msk.f32.mxu1 %vm218_vm0, %v5235_v8  ;;  %v203_v16 = vld [vmem:[%s5217_s27 + $0x30] sm:$0xff]  ;;  %v204_v19 = vld [vmem:[%s5217_s27 + $0x38] sm:$0xff]  ;;  %v205_v22 = vld [vmem:[%s5217_s27 + $0x40] sm:$0xff] }
  0x40   : > { %v5266_v17 = vld [vmem:[%s5217_s27 + $0x31] sm:$0xff]  ;;  %4630 = vmatpush3.msra.mxu1 %v4038_v11  ;;  %v3987_v20 = vld [vmem:[%s5217_s27 + $0x39] sm:$0xff]  ;;  %v3988_v23 = vld [vmem:[%s5217_s27 + $0x41] sm:$0xff]  ;;  %4652 = vmatprep.subr.mxu0 %v4067_v18 }
  0x41   : > { %4566 = vmatmul.mubr.msk.f32.gmra.mrb[2].mxu0 %vm218_vm0, %v200_v9  ;;  %4675 = vmatprep.subr.mxu1 %v4082_v21  ;;  %v206_v24 = vld [vmem:[%s5217_s27 + $0x48] sm:$0xff]  ;;  %v207_v26 = vld [vmem:[%s5217_s27 + $0x50] sm:$0xff]  ;;  %v208_v28 = vld [vmem:[%s5217_s27 + $0x58] sm:$0xff] }
  0x42   : > { %4589 = vmatmul.mubr.msk.f32.gmra.mrb[2].mxu1 %vm218_vm0, %v5243_v10  ;;  %4568 = vmatprep.mubr.msk.f32.mxu0 %vm218_vm0, %v201_v12  ;;  %v3989_v25 = vld [vmem:[%s5217_s27 + $0x49] sm:$0xff]  ;;  %v3990_v27 = vld [vmem:[%s5217_s27 + $0x51] sm:$0xff]  ;;  %v3991_v29 = vld [vmem:[%s5217_s27 + $0x59] sm:$0xff] }
  0x43   : > { %4591 = vmatprep.mubr.msk.f32.mxu1 %vm218_vm0, %v5252_v13  ;;  %v209_v30 = vld [vmem:[%s5217_s27 + $0x60] sm:$0xff]  ;;  %v210_v32 = vld [vmem:[%s5217_s27 + $0x68] sm:$0xff]  ;;  %v4026_v36 = vld [vmem:[%s5217_s27 + $0x12] sm:$0xff] }
  0x44   : > { %v3992_v31 = vld [vmem:[%s5217_s27 + $0x61] sm:$0xff]  ;;  %v3993_v33 = vld [vmem:[%s5217_s27 + $0x69] sm:$0xff]  ;;  %v4030_v42 = vld [vmem:[%s5217_s27 + $0x32] sm:$0xff] }
  0x45   : > { %4569 = vmatmul.mubr.msk.f32.gmra.mrb[4].mxu0 %vm218_vm0, %v202_v14  ;;  %v4024_v34 = vld [vmem:[%s5217_s27 + $0x2] sm:$0xff]  ;;  %v4025_v35 = vld [vmem:[%s5217_s27 + $0xa] sm:$0xff]  ;;  %v4027_v39 = vld [vmem:[%s5217_s27 + $0x1a] sm:$0xff] }
  0x46   : > { %4592 = vmatmul.mubr.msk.f32.gmra.mrb[4].mxu1 %vm218_vm0, %v5262_v15  ;;  %4571 = vmatprep.mubr.msk.f32.mxu0 %vm218_vm0, %v203_v16  ;;  %v4028_v40 = vld [vmem:[%s5217_s27 + $0x22] sm:$0xff]  ;;  %v4029_v41 = vld [vmem:[%s5217_s27 + $0x2a] sm:$0xff]  ;;  %v4031_v43 = vld [vmem:[%s5217_s27 + $0x3a] sm:$0xff] }
  0x47   : > { %4594 = vmatprep.mubr.msk.f32.mxu1 %vm218_vm0, %v5266_v17  ;;  %v4032_v44 = vld [vmem:[%s5217_s27 + $0x42] sm:$0xff]  ;;  %v4033_v45 = vld [vmem:[%s5217_s27 + $0x4a] sm:$0xff]  ;;  %v4034_v46 = vld [vmem:[%s5217_s27 + $0x52] sm:$0xff] }
  0x48   : > { %v4035_v47 = vld [vmem:[%s5217_s27 + $0x5a] sm:$0xff]  ;;  %v4036_v48 = vld [vmem:[%s5217_s27 + $0x62] sm:$0xff]  ;;  %v4037_v49 = vld [vmem:[%s5217_s27 + $0x6a] sm:$0xff] }
  0x49   : > { %4572 = vmatmul.mubr.msk.f32.gmra.mrb[6].mxu0 %vm218_vm0, %v204_v19  ;;  %v4065_v52 = vld [vmem:[%s5217_s27 + $0x72] sm:$0xff]  ;;  %v4066_v53 = vld [vmem:[%s5217_s27 + $0x7a] sm:$0xff]  ;;  %v4099_v56 = vld [vmem:[%s5217_s27 + $0x23] sm:$0xff] }
  0x4a   : > { %4595 = vmatmul.mubr.msk.f32.gmra.mrb[6].mxu1 %vm218_vm0, %v3987_v20  ;;  %4574 = vmatprep.mubr.msk.f32.mxu0 %vm218_vm0, %v205_v22  ;;  %v4097_v54 = vld [vmem:[%s5217_s27 + $0x13] sm:$0xff]  ;;  %v4098_v55 = vld [vmem:[%s5217_s27 + $0x1b] sm:$0xff]  ;;  %v4100_v59 = vld [vmem:[%s5217_s27 + $0x2b] sm:$0xff] }
  0x4b   : > { %4597 = vmatprep.mubr.msk.f32.mxu1 %vm218_vm0, %v3988_v23  ;;  %v4101_v60 = vld [vmem:[%s5217_s27 + $0x33] sm:$0xff]  ;;  %v4102_v61 = vld [vmem:[%s5217_s27 + $0x3b] sm:$0xff]  ;;  %v4103_v62 = vld [vmem:[%s5217_s27 + $0x43] sm:$0xff] }
  0x4c   : > { %v4104_v63 = vld [vmem:[%s5217_s27 + $0x4b] sm:$0xff]  ;;  %v4105_v0 = vld [vmem:[%s5217_s27 + $0x53] sm:$0xff]  ;;  %v4106_v1 = vld [vmem:[%s5217_s27 + $0x5b] sm:$0xff] }
  0x4d   : > { %4575 = vmatmul.mubr.msk.f32.gmra.mrb[8].mxu0 %vm218_vm0, %v206_v24  ;;  %v4107_v2 = vld [vmem:[%s5217_s27 + $0x63] sm:$0xff]  ;;  %v4109_v4 = vld [vmem:[%s5217_s27 + $0x73] sm:$0xff] }
  0x4e   : > { %4598 = vmatmul.mubr.msk.f32.gmra.mrb[8].mxu1 %vm218_vm0, %v3989_v25  ;;  %4577 = vmatprep.mubr.msk.f32.mxu0 %vm218_vm0, %v207_v26  ;;  %v4229_v6 = vld [vmem:[%s6156_s1 + $0x50] sm:$0xff]  ;;  %v4258_v7 = vld [vmem:[%s6156_s1 + $0x58] sm:$0xff]  ;;  %v4177_v16 = vld [vmem:[%s5217_s27 + $0x44] sm:$0xff] }
  0x4f   : > { %4600 = vmatprep.mubr.msk.f32.mxu1 %vm218_vm0, %v3990_v27  ;;  %v4172_v9 = vld [vmem:[%s5217_s27 + $0x1c] sm:$0xff]  ;;  %v4273_v11 = vld [vmem:[%s6156_s1 + $0x70] sm:$0xff]  ;;  %v4244_v24 = vld [vmem:[%s5217_s27 + $0x25] sm:$0xff] }
  0x50   : > { %v4302_v12 = vld [vmem:[%s6156_s1 + $0x78] sm:$0xff] }
  0x51   : > { %4578 = vmatmul.mubr.msk.f32.gmra.mrb[10].mxu0 %vm218_vm0, %v208_v28  ;;  %v4175_v14 = vld [vmem:[%s5217_s27 + $0x34] sm:$0xff]  ;;  %v4180_v19 = vld [vmem:[%s5217_s27 + $0x5c] sm:$0xff]  ;;  %v4248_v28 = vld [vmem:[%s5217_s27 + $0x45] sm:$0xff] }
  0x52   : > { %4601 = vmatmul.mubr.msk.f32.gmra.mrb[10].mxu1 %vm218_vm0, %v3991_v29  ;;  %4580 = vmatprep.mubr.msk.f32.mxu0 %vm218_vm0, %v209_v30  ;;  %v4183_v22 = vld [vmem:[%s5217_s27 + $0x74] sm:$0xff] }
  0x53   : > { %4603 = vmatprep.mubr.msk.f32.mxu1 %vm218_vm0, %v3992_v31  ;;  %v4246_v26 = vld [vmem:[%s5217_s27 + $0x35] sm:$0xff] }
  0x54   : > { %v4250_v30 = vld [vmem:[%s5217_s27 + $0x55] sm:$0xff] }
  0x55   : > { %4581 = vmatmul.mubr.msk.f32.gmra.mrb[12].mxu0 %vm218_vm0, %v210_v32  ;;  %v4252_v32 = vld [vmem:[%s5217_s27 + $0x65] sm:$0xff] }
  0x56   : > { %4604 = vmatmul.mubr.msk.f32.gmra.mrb[12].mxu1 %vm218_vm0, %v3993_v33  ;;  %4608 = vmatprep.mubr.msk.f32.mxu0 %vm218_vm0, %v5221_v3  ;;  %v4108_v3 = vld [vmem:[%s5217_s27 + $0x6b] sm:$0xff] }
  0x57   : > { %4631 = vmatprep.mubr.msk.f32.mxu1 %vm218_vm0, %v4024_v34  ;;  %v4254_v34 = vld [vmem:[%s5217_s27 + $0x75] sm:$0xff] }
  0x59   : > { %4609 = vmatmul.mubr.msk.f32.vlgmr.msra.gmra.mrb[14].mxu0 %vm218_vm0, %v5226_v5  ;;  %v4110_v5 = vld [vmem:[%s5217_s27 + $0x7b] sm:$0xff] }
  0x5a   : > { %4632 = vmatmul.mubr.msk.f32.vlgmr.msra.gmra.mrb[14].mxu1 %vm218_vm0, %v4025_v35  ;;  %4653 = vmatpush3.msra.mxu0 %v4067_v18  ;;  %v4179_v18 = vld [vmem:[%s5217_s27 + $0x54] sm:$0xff]  ;;  %v4255_v35 = vld [vmem:[%s5217_s27 + $0x7d] sm:$0xff] }
  0x5b   : > { %4611 = vmatprep.mubr.msk.f32.mxu0 %vm218_vm0, %v5235_v8  ;;  %4634 = vmatprep.mubr.msk.f32.mxu1 %vm218_vm0, %v4026_v36  ;;  %v4171_v8 = vld [vmem:[%s5217_s27 + $0x14] sm:$0xff] }
  0x5c   : > { %4676 = vmatpush3.msra.mxu1 %v4082_v21  ;;  %4698 = vmatprep.subr.mxu0 %v4111_v37  ;;  %v4182_v21 = vld [vmem:[%s5217_s27 + $0x6c] sm:$0xff] }
  0x5d   : > { %4721 = vmatprep.subr.mxu1 %v4126_v38  ;;  %4612 = vmatmul.mubr.msk.f32.gmra.mrb[16].mxu0 %vm218_vm0, %v5243_v10  ;;  %v4173_v10 = vld [vmem:[%s5217_s27 + $0x24] sm:$0xff] }
  0x5e   : > { %4635 = vmatmul.mubr.msk.f32.gmra.mrb[16].mxu1 %vm218_vm0, %v4027_v39  ;;  %4614 = vmatprep.mubr.msk.f32.mxu0 %vm218_vm0, %v5252_v13  ;;  %v4174_v13 = vld [vmem:[%s5217_s27 + $0x2c] sm:$0xff] }
  0x5f   : > { %4637 = vmatprep.mubr.msk.f32.mxu1 %vm218_vm0, %v4028_v40 }
  0x61   : > { %4615 = vmatmul.mubr.msk.f32.gmra.mrb[18].mxu0 %vm218_vm0, %v5262_v15  ;;  %v4176_v15 = vld [vmem:[%s5217_s27 + $0x3c] sm:$0xff] }
  0x62   : > { %4638 = vmatmul.mubr.msk.f32.gmra.mrb[18].mxu1 %vm218_vm0, %v4029_v41  ;;  %4617 = vmatprep.mubr.msk.f32.mxu0 %vm218_vm0, %v5266_v17  ;;  %v4178_v17 = vld [vmem:[%s5217_s27 + $0x4c] sm:$0xff] }
  0x63   : > { %4640 = vmatprep.mubr.msk.f32.mxu1 %vm218_vm0, %v4030_v42 }
  0x65   : > { %4618 = vmatmul.mubr.msk.f32.gmra.mrb[20].mxu0 %vm218_vm0, %v3987_v20  ;;  %v4181_v20 = vld [vmem:[%s5217_s27 + $0x64] sm:$0xff] }
  0x66   : > { %4641 = vmatmul.mubr.msk.f32.gmra.mrb[20].mxu1 %vm218_vm0, %v4031_v43  ;;  %4620 = vmatprep.mubr.msk.f32.mxu0 %vm218_vm0, %v3988_v23  ;;  %v4184_v23 = vld [vmem:[%s5217_s27 + $0x7c] sm:$0xff] }
  0x67   : > { %4643 = vmatprep.mubr.msk.f32.mxu1 %vm218_vm0, %v4032_v44 }
  0x69   : > { %4621 = vmatmul.mubr.msk.f32.gmra.mrb[22].mxu0 %vm218_vm0, %v3989_v25  ;;  %v4245_v25 = vld [vmem:[%s5217_s27 + $0x2d] sm:$0xff] }
  0x6a   : > { %4644 = vmatmul.mubr.msk.f32.gmra.mrb[22].mxu1 %vm218_vm0, %v4033_v45  ;;  %4623 = vmatprep.mubr.msk.f32.mxu0 %vm218_vm0, %v3990_v27  ;;  %v4247_v27 = vld [vmem:[%s5217_s27 + $0x3d] sm:$0xff] }
  0x6b   : > { %4646 = vmatprep.mubr.msk.f32.mxu1 %vm218_vm0, %v4034_v46 }
  0x6d   : > { %4624 = vmatmul.mubr.msk.f32.gmra.mrb[24].mxu0 %vm218_vm0, %v3991_v29  ;;  %v4249_v29 = vld [vmem:[%s5217_s27 + $0x4d] sm:$0xff] }
  0x6e   : > { %4647 = vmatmul.mubr.msk.f32.gmra.mrb[24].mxu1 %vm218_vm0, %v4035_v47  ;;  %4626 = vmatprep.mubr.msk.f32.mxu0 %vm218_vm0, %v3992_v31  ;;  %v4251_v31 = vld [vmem:[%s5217_s27 + $0x5d] sm:$0xff] }
  0x6f   : > { %4649 = vmatprep.mubr.msk.f32.mxu1 %vm218_vm0, %v4036_v48 }
  0x71   : > { %4627 = vmatmul.mubr.msk.f32.gmra.mrb[26].mxu0 %vm218_vm0, %v3993_v33  ;;  %v4253_v33 = vld [vmem:[%s5217_s27 + $0x6d] sm:$0xff] }
  0x72   : > { %4650 = vmatmul.mubr.msk.f32.gmra.mrb[26].mxu1 %vm218_vm0, %v4037_v49  ;;  %4654 = vmatprep.mubr.msk.f32.mxu0 %vm218_vm0, %v4026_v36 }
  0x73   : > { %4677 = vmatprep.mubr.msk.f32.mxu1 %vm218_vm0, %v4026_v36  ;;  %v4227_v36 = vld [vmem:[%s5217_s27 + $0x84] sm:$0xff] }
  0x75   : > { %4655 = vmatmul.mubr.msk.f32.vlgmr.msra.gmra.mrb[28].mxu0 %vm218_vm0, %v4027_v39 }
  0x76   : > { %4678 = vmatmul.mubr.msk.f32.vlgmr.msra.gmra.mrb[28].mxu1 %vm218_vm0, %v4027_v39  ;;  %4699 = vmatpush3.msra.mxu0 %v4111_v37  ;;  %v4256_v37 = vld [vmem:[%s5217_s27 + $0x85] sm:$0xff]  ;;  %v5571_v39 = vld [vmem:[%s5217_s27 + $0x8d] sm:$0xff] }
  0x77   : > { %4657 = vmatprep.mubr.msk.f32.mxu0 %vm218_vm0, %v4028_v40  ;;  %4680 = vmatprep.mubr.msk.f32.mxu1 %vm218_vm0, %v4028_v40  ;;  %v4288_v40 = vld [vmem:[%s5217_s27 + $0x26] sm:$0xff] }
  0x78   : > { %4722 = vmatpush3.msra.mxu1 %v4126_v38  ;;  %4744 = vmatprep.subr.mxu0 %v4141_v50  ;;  %v4228_v38 = vld [vmem:[%s5217_s27 + $0x8c] sm:$0xff] }
  0x79   : > { %4767 = vmatprep.subr.mxu1 %v4156_v51  ;;  %4658 = vmatmul.mubr.msk.f32.gmra.mrb[30].mxu0 %vm218_vm0, %v4029_v41 }
  0x7a   : > { %4681 = vmatmul.mubr.msk.f32.gmra.mrb[30].mxu1 %vm218_vm0, %v4029_v41  ;;  %4660 = vmatprep.mubr.msk.f32.mxu0 %vm218_vm0, %v4030_v42  ;;  %v4289_v41 = vld [vmem:[%s5217_s27 + $0x2e] sm:$0xff] }
  0x7b   : > { %4683 = vmatprep.mubr.msk.f32.mxu1 %vm218_vm0, %v4030_v42  ;;  %v4290_v42 = vld [vmem:[%s5217_s27 + $0x36] sm:$0xff] }
  0x7d   : > { %4661 = vmatmul.mubr.msk.f32.gmra.mrb[32].mxu0 %vm218_vm0, %v4031_v43 }
  0x7e   : > { %4684 = vmatmul.mubr.msk.f32.gmra.mrb[32].mxu1 %vm218_vm0, %v4031_v43  ;;  %4663 = vmatprep.mubr.msk.f32.mxu0 %vm218_vm0, %v4032_v44  ;;  %v4291_v43 = vld [vmem:[%s5217_s27 + $0x3e] sm:$0xff] }
  0x7f   : > { %4686 = vmatprep.mubr.msk.f32.mxu1 %vm218_vm0, %v4032_v44  ;;  %v4292_v44 = vld [vmem:[%s5217_s27 + $0x46] sm:$0xff] }
  0x81   : > { %4664 = vmatmul.mubr.msk.f32.gmra.mrb[34].mxu0 %vm218_vm0, %v4033_v45 }
  0x82   : > { %4687 = vmatmul.mubr.msk.f32.gmra.mrb[34].mxu1 %vm218_vm0, %v4033_v45  ;;  %4666 = vmatprep.mubr.msk.f32.mxu0 %vm218_vm0, %v4034_v46  ;;  %v4293_v45 = vld [vmem:[%s5217_s27 + $0x4e] sm:$0xff] }
  0x83   : > { %4689 = vmatprep.mubr.msk.f32.mxu1 %vm218_vm0, %v4034_v46  ;;  %v4294_v46 = vld [vmem:[%s5217_s27 + $0x56] sm:$0xff] }
  0x85   : > { %4667 = vmatmul.mubr.msk.f32.gmra.mrb[36].mxu0 %vm218_vm0, %v4035_v47 }
  0x86   : > { %4690 = vmatmul.mubr.msk.f32.gmra.mrb[36].mxu1 %vm218_vm0, %v4035_v47  ;;  %4669 = vmatprep.mubr.msk.f32.mxu0 %vm218_vm0, %v4036_v48  ;;  %v4295_v47 = vld [vmem:[%s5217_s27 + $0x5e] sm:$0xff] }
  0x87   : > { %4692 = vmatprep.mubr.msk.f32.mxu1 %vm218_vm0, %v4036_v48  ;;  %v4296_v48 = vld [vmem:[%s5217_s27 + $0x66] sm:$0xff] }
  0x89   : > { %4670 = vmatmul.mubr.msk.f32.gmra.mrb[38].mxu0 %vm218_vm0, %v4037_v49 }
  0x8a   : > { %4693 = vmatmul.mubr.msk.f32.gmra.mrb[38].mxu1 %vm218_vm0, %v4037_v49  ;;  %4672 = vmatprep.mubr.msk.f32.mxu0 %vm218_vm0, %v4065_v52  ;;  %v5601_v49 = vld [vmem:[#allocation3] ss:$0 sm:$0xff] }
  0x8b   : > { %4695 = vmatprep.mubr.msk.f32.mxu1 %vm218_vm0, %v4065_v52 }
  0x8d   : > { %4673 = vmatmul.mubr.msk.f32.gmra.mrb[40].mxu0 %vm218_vm0, %v4066_v53 }
  0x8e   : > { %4696 = vmatmul.mubr.msk.f32.gmra.mrb[40].mxu1 %vm218_vm0, %v4066_v53  ;;  %4700 = vmatprep.mubr.msk.f32.mxu0 %vm218_vm0, %v4097_v54 }
  0x8f   : > { %4723 = vmatprep.mubr.msk.f32.mxu1 %vm218_vm0, %v4097_v54 }
  0x91   : > { %4701 = vmatmul.mubr.msk.f32.vlgmr.msra.gmra.mrb[42].mxu0 %vm218_vm0, %v4098_v55 }
  0x92   : > { %4724 = vmatmul.mubr.msk.f32.vlgmr.msra.gmra.mrb[42].mxu1 %vm218_vm0, %v4098_v55  ;;  %4745 = vmatpush3.msra.mxu0 %v4141_v50  ;;  %v4297_v50 = vld [vmem:[%s5217_s27 + $0x6e] sm:$0xff] }
  0x93   : > { %4703 = vmatprep.mubr.msk.f32.mxu0 %vm218_vm0, %v4099_v56  ;;  %4726 = vmatprep.mubr.msk.f32.mxu1 %vm218_vm0, %v4099_v56 }
  0x94   : > { %4768 = vmatpush3.msra.mxu1 %v4156_v51  ;;  %4790 = vmatprep.subr.mxu0 %v4185_v57  ;;  %v4298_v51 = vld [vmem:[%s5217_s27 + $0x76] sm:$0xff] }
  0x95   : > { %4813 = vmatprep.subr.mxu1 %v4200_v58  ;;  %4704 = vmatmul.mubr.msk.f32.gmra.mrb[44].mxu0 %vm218_vm0, %v4100_v59 }
  0x96   : > { %4727 = vmatmul.mubr.msk.f32.gmra.mrb[44].mxu1 %vm218_vm0, %v4100_v59  ;;  %4706 = vmatprep.mubr.msk.f32.mxu0 %vm218_vm0, %v4101_v60 }
  0x97   : > { %4729 = vmatprep.mubr.msk.f32.mxu1 %vm218_vm0, %v4101_v60 }
  0x99   : > { %4707 = vmatmul.mubr.msk.f32.gmra.mrb[46].mxu0 %vm218_vm0, %v4102_v61 }
  0x9a   : > { %4730 = vmatmul.mubr.msk.f32.gmra.mrb[46].mxu1 %vm218_vm0, %v4102_v61  ;;  %4709 = vmatprep.mubr.msk.f32.mxu0 %vm218_vm0, %v4103_v62 }
  0x9b   : > { %4732 = vmatprep.mubr.msk.f32.mxu1 %vm218_vm0, %v4103_v62 }
  0x9d   : > { %4710 = vmatmul.mubr.msk.f32.gmra.mrb[48].mxu0 %vm218_vm0, %v4104_v63 }
  0x9e   : > { %4733 = vmatmul.mubr.msk.f32.gmra.mrb[48].mxu1 %vm218_vm0, %v4104_v63  ;;  %4712 = vmatprep.mubr.msk.f32.mxu0 %vm218_vm0, %v4105_v0 }
  0x9f   : > { %4735 = vmatprep.mubr.msk.f32.mxu1 %vm218_vm0, %v4105_v0 }
  0xa1   : > { %4713 = vmatmul.mubr.msk.f32.gmra.mrb[50].mxu0 %vm218_vm0, %v4106_v1 }
  0xa2   : > { %4736 = vmatmul.mubr.msk.f32.gmra.mrb[50].mxu1 %vm218_vm0, %v4106_v1  ;;  %4715 = vmatprep.mubr.msk.f32.mxu0 %vm218_vm0, %v4107_v2 }
  0xa3   : > { %4738 = vmatprep.mubr.msk.f32.mxu1 %vm218_vm0, %v4107_v2 }
  0xa5   : > { %4716 = vmatmul.mubr.msk.f32.gmra.mrb[52].mxu0 %vm218_vm0, %v4108_v3 }
  0xa6   : > { %4739 = vmatmul.mubr.msk.f32.gmra.mrb[52].mxu1 %vm218_vm0, %v4108_v3  ;;  %4718 = vmatprep.mubr.msk.f32.mxu0 %vm218_vm0, %v4109_v4 }
  0xa7   : > { %4741 = vmatprep.mubr.msk.f32.mxu1 %vm218_vm0, %v4109_v4 }
  0xa9   : > { %4719 = vmatmul.mubr.msk.f32.gmra.mrb[54].mxu0 %vm218_vm0, %v4110_v5 }
  0xaa   : > { %4742 = vmatmul.mubr.msk.f32.gmra.mrb[54].mxu1 %vm218_vm0, %v4110_v5  ;;  %4746 = vmatprep.mubr.msk.f32.mxu0 %vm218_vm0, %v4097_v54 }
  0xab   : > { %4769 = vmatprep.mubr.msk.f32.mxu1 %vm218_vm0, %v4097_v54 }
  0xad   : > { %4747 = vmatmul.mubr.msk.f32.vlgmr.msra.gmra.mrb[56].mxu0 %vm218_vm0, %v4098_v55 }
  0xae   : > { %4770 = vmatmul.mubr.msk.f32.vlgmr.msra.gmra.mrb[56].mxu1 %vm218_vm0, %v4098_v55  ;;  %4791 = vmatpush3.msra.mxu0 %v4185_v57 }
  0xaf   : > { %4749 = vmatprep.mubr.msk.f32.mxu0 %vm218_vm0, %v4099_v56  ;;  %4772 = vmatprep.mubr.msk.f32.mxu1 %vm218_vm0, %v4099_v56 }
  0xb0   : > { %4814 = vmatpush3.msra.mxu1 %v4200_v58  ;;  %4836 = vmatprep.subr.mxu0 %v4229_v6  ;;  %v4299_v58 = vld [vmem:[%s5217_s27 + $0x7e] sm:$0xff] }
  0xb1   : > { %4859 = vmatprep.subr.mxu1 %v4258_v7  ;;  %4750 = vmatmul.mubr.msk.f32.gmra.mrb[58].mxu0 %vm218_vm0, %v4100_v59 }
  0xb2   : > { %4773 = vmatmul.mubr.msk.f32.gmra.mrb[58].mxu1 %vm218_vm0, %v4100_v59  ;;  %4752 = vmatprep.mubr.msk.f32.mxu0 %vm218_vm0, %v4101_v60  ;;  %v4300_v59 = vld [vmem:[%s5217_s27 + $0x86] sm:$0xff] }
  0xb3   : > { %4775 = vmatprep.mubr.msk.f32.mxu1 %vm218_vm0, %v4101_v60 }
  0xb5   : > { %4753 = vmatmul.mubr.msk.f32.gmra.mrb[60].mxu0 %vm218_vm0, %v4102_v61 }
  0xb6   : > { %4776 = vmatmul.mubr.msk.f32.gmra.mrb[60].mxu1 %vm218_vm0, %v4102_v61  ;;  %4755 = vmatprep.mubr.msk.f32.mxu0 %vm218_vm0, %v4103_v62 }
  0xb7   : > { %4778 = vmatprep.mubr.msk.f32.mxu1 %vm218_vm0, %v4103_v62 }
  0xb9   : > { %4756 = vmatmul.mubr.msk.f32.gmra.mrb[62].mxu0 %vm218_vm0, %v4104_v63 }
  0xba   : > { %4779 = vmatmul.mubr.msk.f32.gmra.mrb[62].mxu1 %vm218_vm0, %v4104_v63  ;;  %4758 = vmatprep.mubr.msk.f32.mxu0 %vm218_vm0, %v4105_v0 }
  0xbb   : > { %4781 = vmatprep.mubr.msk.f32.mxu1 %vm218_vm0, %v4105_v0 }
  0xbd   : > { %4759 = vmatmul.mubr.msk.f32.gmra.mrb[64].mxu0 %vm218_vm0, %v4106_v1 }
  0xbe   : > { %4782 = vmatmul.mubr.msk.f32.gmra.mrb[64].mxu1 %vm218_vm0, %v4106_v1  ;;  %4761 = vmatprep.mubr.msk.f32.mxu0 %vm218_vm0, %v4107_v2 }
  0xbf   : > { %4784 = vmatprep.mubr.msk.f32.mxu1 %vm218_vm0, %v4107_v2  ;;  %v4301_v2 = vld [vmem:[%s5217_s27 + $0x8e] sm:$0xff]  ;;  %s184_s27 = sand.u32 1, %s5061_s12  }
  0xc0   : > { %s5750_s10 = smul.u32 448, %s184_s27 }
  0xc1   : > { %4762 = vmatmul.mubr.msk.f32.gmra.mrb[66].mxu0 %vm218_vm0, %v4108_v3 }
  0xc2   : > { %4785 = vmatmul.mubr.msk.f32.gmra.mrb[66].mxu1 %vm218_vm0, %v4108_v3  ;;  %4764 = vmatprep.mubr.msk.f32.mxu0 %vm218_vm0, %v4109_v4  ;;  %s5759_s12 = scalar_lea.vmem [#allocation5], %s5750_s10 }
  0xc3   : > { %4787 = vmatprep.mubr.msk.f32.mxu1 %vm218_vm0, %v4109_v4 }
  0xc5   : > { %4765 = vmatmul.mubr.msk.f32.gmra.mrb[68].mxu0 %vm218_vm0, %v4110_v5 }
  0xc6   : > { %4788 = vmatmul.mubr.msk.f32.gmra.mrb[68].mxu1 %vm218_vm0, %v4110_v5  ;;  %4792 = vmatprep.mubr.msk.f32.mxu0 %vm218_vm0, %v4171_v8 }
  0xc7   : > { %4815 = vmatprep.mubr.msk.f32.mxu1 %vm218_vm0, %v4171_v8 }
  0xc9   : > { %4793 = vmatmul.mubr.msk.f32.vlgmr.msra.gmra.mrb[70].mxu0 %vm218_vm0, %v4172_v9 }
  0xca   : > { %4816 = vmatmul.mubr.msk.f32.vlgmr.msra.gmra.mrb[70].mxu1 %vm218_vm0, %v4172_v9  ;;  %4837 = vmatpush3.msra.mxu0 %v4229_v6 }
  0xcb   : > { %4795 = vmatprep.mubr.msk.f32.mxu0 %vm218_vm0, %v4173_v10  ;;  %4818 = vmatprep.mubr.msk.f32.mxu1 %vm218_vm0, %v4173_v10 }
  0xcc   : > { %4860 = vmatpush3.msra.mxu1 %v4258_v7  ;;  %4882 = vmatprep.subr.mxu0 %v4273_v11 }
  0xcd   : > { %4905 = vmatprep.subr.mxu1 %v4302_v12  ;;  %4796 = vmatmul.mubr.msk.f32.gmra.mrb[72].mxu0 %vm218_vm0, %v4174_v13 }
  0xce   : > { %4819 = vmatmul.mubr.msk.f32.gmra.mrb[72].mxu1 %vm218_vm0, %v4174_v13  ;;  %4798 = vmatprep.mubr.msk.f32.mxu0 %vm218_vm0, %v4175_v14 }
  0xcf   : > { %4821 = vmatprep.mubr.msk.f32.mxu1 %vm218_vm0, %v4175_v14 }
  0xd1   : > { %4799 = vmatmul.mubr.msk.f32.gmra.mrb[74].mxu0 %vm218_vm0, %v4176_v15 }
  0xd2   : > { %4822 = vmatmul.mubr.msk.f32.gmra.mrb[74].mxu1 %vm218_vm0, %v4176_v15  ;;  %4801 = vmatprep.mubr.msk.f32.mxu0 %vm218_vm0, %v4177_v16 }
  0xd3   : > { %4824 = vmatprep.mubr.msk.f32.mxu1 %vm218_vm0, %v4177_v16 }
  0xd5   : > { %4802 = vmatmul.mubr.msk.f32.gmra.mrb[76].mxu0 %vm218_vm0, %v4178_v17 }
  0xd6   : > { %4825 = vmatmul.mubr.msk.f32.gmra.mrb[76].mxu1 %vm218_vm0, %v4178_v17  ;;  %4804 = vmatprep.mubr.msk.f32.mxu0 %vm218_vm0, %v4179_v18 }
  0xd7   : > { %4827 = vmatprep.mubr.msk.f32.mxu1 %vm218_vm0, %v4179_v18 }
  0xd9   : > { %4805 = vmatmul.mubr.msk.f32.gmra.mrb[78].mxu0 %vm218_vm0, %v4180_v19 }
  0xda   : > { %4828 = vmatmul.mubr.msk.f32.gmra.mrb[78].mxu1 %vm218_vm0, %v4180_v19  ;;  %4807 = vmatprep.mubr.msk.f32.mxu0 %vm218_vm0, %v4181_v20 }
  0xdb   : > { %4830 = vmatprep.mubr.msk.f32.mxu1 %vm218_vm0, %v4181_v20 }
  0xdd   : > { %4808 = vmatmul.mubr.msk.f32.gmra.mrb[80].mxu0 %vm218_vm0, %v4182_v21 }
  0xde   : > { %4831 = vmatmul.mubr.msk.f32.gmra.mrb[80].mxu1 %vm218_vm0, %v4182_v21  ;;  %4810 = vmatprep.mubr.msk.f32.mxu0 %vm218_vm0, %v4183_v22 }
  0xdf   : > { %4833 = vmatprep.mubr.msk.f32.mxu1 %vm218_vm0, %v4183_v22 }
  0xe1   : > { %4811 = vmatmul.mubr.msk.f32.gmra.mrb[82].mxu0 %vm218_vm0, %v4184_v23 }
  0xe2   : > { %4834 = vmatmul.mubr.msk.f32.gmra.mrb[82].mxu1 %vm218_vm0, %v4184_v23  ;;  %4838 = vmatprep.mubr.msk.f32.mxu0 %vm218_vm0, %v4173_v10 }
  0xe3   : > { %4861 = vmatprep.mubr.msk.f32.mxu1 %vm218_vm0, %v4244_v24 }
  0xe5   : > { %4839 = vmatmul.mubr.msk.f32.vlgmr.msra.gmra.mrb[84].mxu0 %vm218_vm0, %v4174_v13 }
  0xe6   : > { %4862 = vmatmul.mubr.msk.f32.vlgmr.msra.gmra.mrb[84].mxu1 %vm218_vm0, %v4245_v25  ;;  %4883 = vmatpush3.msra.mxu0 %v4273_v11 }
  0xe7   : > { %4841 = vmatprep.mubr.msk.f32.mxu0 %vm218_vm0, %v4175_v14  ;;  %4906 = vmatpush3.msra.mxu1 %v4302_v12 }
  0xe8   : > { %4864 = vmatprep.mubr.msk.f32.mxu1 %vm218_vm0, %v4246_v26 }
  0xe9   : > { %4842 = vmatmul.mubr.msk.f32.gmra.mrb[86].mxu0 %vm218_vm0, %v4176_v15 }
  0xea   : > { %4865 = vmatmul.mubr.msk.f32.gmra.mrb[86].mxu1 %vm218_vm0, %v4247_v27  ;;  %4844 = vmatprep.mubr.msk.f32.mxu0 %vm218_vm0, %v4177_v16 }
  0xeb   : > { %4867 = vmatprep.mubr.msk.f32.mxu1 %vm218_vm0, %v4248_v28 }
  0xed   : > { %4845 = vmatmul.mubr.msk.f32.gmra.mrb[88].mxu0 %vm218_vm0, %v4178_v17 }
  0xee   : > { %4868 = vmatmul.mubr.msk.f32.gmra.mrb[88].mxu1 %vm218_vm0, %v4249_v29  ;;  %4847 = vmatprep.mubr.msk.f32.mxu0 %vm218_vm0, %v4179_v18 }
  0xef   : > { %4870 = vmatprep.mubr.msk.f32.mxu1 %vm218_vm0, %v4250_v30 }
  0xf1   : > { %4848 = vmatmul.mubr.msk.f32.gmra.mrb[90].mxu0 %vm218_vm0, %v4180_v19 }
  0xf2   : > { %4871 = vmatmul.mubr.msk.f32.gmra.mrb[90].mxu1 %vm218_vm0, %v4251_v31  ;;  %4850 = vmatprep.mubr.msk.f32.mxu0 %vm218_vm0, %v4181_v20 }
  0xf3   : > { %4873 = vmatprep.mubr.msk.f32.mxu1 %vm218_vm0, %v4252_v32 }
  0xf5   : > { %4851 = vmatmul.mubr.msk.f32.gmra.mrb[92].mxu0 %vm218_vm0, %v4182_v21 }
  0xf6   : > { %4874 = vmatmul.mubr.msk.f32.gmra.mrb[92].mxu1 %vm218_vm0, %v4253_v33  ;;  %4853 = vmatprep.mubr.msk.f32.mxu0 %vm218_vm0, %v4183_v22 }
  0xf7   : > { %4876 = vmatprep.mubr.msk.f32.mxu1 %vm218_vm0, %v4254_v34 }
  0xf9   : > { %4854 = vmatmul.mubr.msk.f32.gmra.mrb[94].mxu0 %vm218_vm0, %v4184_v23 }
  0xfa   : > { %4877 = vmatmul.mubr.msk.f32.gmra.mrb[94].mxu1 %vm218_vm0, %v4255_v35  ;;  %4856 = vmatprep.mubr.msk.f32.mxu0 %vm218_vm0, %v4227_v36 }
  0xfb   : > { %4879 = vmatprep.mubr.msk.f32.mxu1 %vm218_vm0, %v4256_v37 }
  0xfd   : > { %4857 = vmatmul.mubr.msk.f32.gmra.mrb[96].mxu0 %vm218_vm0, %v4228_v38 }
  0xfe   : > { %4880 = vmatmul.mubr.msk.f32.gmra.mrb[96].mxu1 %vm218_vm0, %v5571_v39  ;;  %4884 = vmatprep.mubr.msk.f32.mxu0 %vm218_vm0, %v4244_v24 }
  0xff   : > { %4907 = vmatprep.mubr.msk.f32.mxu1 %vm218_vm0, %v4288_v40 }
 0x101   : > { %4885 = vmatmul.mubr.msk.f32.vlgmr.msra.gmra.mrb[98].mxu0 %vm218_vm0, %v4245_v25 }
 0x102   : > { %4908 = vmatmul.mubr.msk.f32.vlgmr.msra.gmra.mrb[98].mxu1 %vm218_vm0, %v4289_v41  ;;  %4887 = vmatprep.mubr.msk.f32.mxu0 %vm218_vm0, %v4246_v26 }
 0x103   : > { %4910 = vmatprep.mubr.msk.f32.mxu1 %vm218_vm0, %v4290_v42 }
 0x105   : > { %4888 = vmatmul.mubr.msk.f32.gmra.mrb[100].mxu0 %vm218_vm0, %v4247_v27 }
 0x106   : > { %4911 = vmatmul.mubr.msk.f32.gmra.mrb[100].mxu1 %vm218_vm0, %v4291_v43  ;;  %4890 = vmatprep.mubr.msk.f32.mxu0 %vm218_vm0, %v4248_v28 }
 0x107   : > { %4913 = vmatprep.mubr.msk.f32.mxu1 %vm218_vm0, %v4292_v44 }
 0x109   : > { %4891 = vmatmul.mubr.msk.f32.gmra.mrb[102].mxu0 %vm218_vm0, %v4249_v29 }
 0x10a   : > { %4914 = vmatmul.mubr.msk.f32.gmra.mrb[102].mxu1 %vm218_vm0, %v4293_v45  ;;  %4893 = vmatprep.mubr.msk.f32.mxu0 %vm218_vm0, %v4250_v30 }
 0x10b   : > { %4916 = vmatprep.mubr.msk.f32.mxu1 %vm218_vm0, %v4294_v46 }
 0x10d   : > { %4894 = vmatmul.mubr.msk.f32.gmra.mrb[104].mxu0 %vm218_vm0, %v4251_v31 }
 0x10e   : > { %4917 = vmatmul.mubr.msk.f32.gmra.mrb[104].mxu1 %vm218_vm0, %v4295_v47  ;;  %4896 = vmatprep.mubr.msk.f32.mxu0 %vm218_vm0, %v4252_v32 }
 0x10f   : > { %4919 = vmatprep.mubr.msk.f32.mxu1 %vm218_vm0, %v4296_v48 }
 0x110   : > { %v4564_v52 = vpop.f32.mrb[0].mxu0 }
 0x111   : > { %v4587_v53 = vpop.f32.mrb[0].mxu1  ;;  %v333_v54 = vadd.f32 %v4564_v52, %v5601_v49  ;;  %v327_v55 = vpop.f32.mrb[1].mxu0  ;;  %4897 = vmatmul.mubr.msk.f32.gmra.mrb[106].mxu0 %vm218_vm0, %v4253_v33 }
 0x112   : > { %v537_v56 = vpop.f32.mrb[1].mxu1  ;;  %4920 = vmatmul.mubr.msk.f32.gmra.mrb[106].mxu1 %vm218_vm0, %v4297_v50  ;;  %v328_v57 = vadd.f32 %v5601_v49, %v327_v55  ;;  %4899 = vmatprep.mubr.msk.f32.mxu0 %vm218_vm0, %v4254_v34 }
 0x113   : > { %4922 = vmatprep.mubr.msk.f32.mxu1 %vm218_vm0, %v4298_v51  ;;  %398 = vst.msk [vmem:[#allocation2 + $0x8] sm:$0xff] %vm396_vm1, %v333_v54 }
 0x114   : > { %397 = vst.msk [vmem:[#allocation2] sm:$0xff] %vm396_vm1, %v328_v57  ;;  %v4567_v60 = vpop.f32.mrb[2].mxu0 }
 0x115   : > { %v4590_v61 = vpop.f32.mrb[2].mxu1  ;;  %v343_v62 = vadd.f32 %v4567_v60, %v5601_v49  ;;  %v337_v63 = vpop.f32.mrb[3].mxu0  ;;  %4900 = vmatmul.mubr.msk.f32.gmra.mrb[108].mxu0 %vm218_vm0, %v4255_v35 }
 0x116   : > { %v547_v0 = vpop.f32.mrb[3].mxu1  ;;  %4923 = vmatmul.mubr.msk.f32.gmra.mrb[108].mxu1 %vm218_vm0, %v4299_v58  ;;  %v338_v1 = vadd.f32 %v5601_v49, %v337_v63  ;;  %4902 = vmatprep.mubr.msk.f32.mxu0 %vm218_vm0, %v4256_v37 }
 0x117   : > { %4925 = vmatprep.mubr.msk.f32.mxu1 %vm218_vm0, %v4300_v59  ;;  %400 = vst.msk [vmem:[#allocation2 + $0x18] sm:$0xff] %vm396_vm1, %v343_v62 }
 0x118   : > { %399 = vst.msk [vmem:[#allocation2 + $0x10] sm:$0xff] %vm396_vm1, %v338_v1  ;;  %v4570_v3 = vpop.f32.mrb[4].mxu0 }
 0x119   : > { %v4593_v4 = vpop.f32.mrb[4].mxu1  ;;  %v353_v5 = vadd.f32 %v4570_v3, %v5601_v49  ;;  %v347_v6 = vpop.f32.mrb[5].mxu0  ;;  %4903 = vmatmul.mubr.msk.f32.gmra.mrb[110].mxu0 %vm218_vm0, %v5571_v39 }
 0x11a   : > { %v557_v7 = vpop.f32.mrb[5].mxu1  ;;  %4926 = vmatmul.mubr.msk.f32.gmra.mrb[110].mxu1 %vm218_vm0, %v4301_v2  ;;  %v348_v8 = vadd.f32 %v5601_v49, %v347_v6  ;;  %v607_v9 = vld [vmem:[#allocation2 + $0x8] sm:$0xff] }
 0x11b   : > { %402 = vst.msk [vmem:[#allocation2 + $0x28] sm:$0xff] %vm396_vm1, %v353_v5  ;;  %v621_v10 = vadd.f32 %v4587_v53, %v607_v9  ;;  %v606_v11 = vld [vmem:[#allocation2] sm:$0xff] }
 0x11c   : > { %401 = vst.msk [vmem:[#allocation2 + $0x20] sm:$0xff] %vm396_vm1, %v348_v8  ;;  %v620_v12 = vadd.f32 %v606_v11, %v537_v56  ;;  %v4573_v13 = vpop.f32.mrb[6].mxu0 }
 0x11d   : > { %v4596_v14 = vpop.f32.mrb[6].mxu1  ;;  %635 = vst.msk [vmem:[#allocation2 + $0x8] sm:$0xff] %vm396_vm1, %v621_v10  ;;  %v363_v15 = vadd.f32 %v4573_v13, %v5601_v49  ;;  %v357_v16 = vpop.f32.mrb[7].mxu0 }
 0x11e   : > { %v567_v17 = vpop.f32.mrb[7].mxu1  ;;  %634 = vst.msk [vmem:[#allocation2] sm:$0xff] %vm396_vm1, %v620_v12  ;;  %v358_v18 = vadd.f32 %v5601_v49, %v357_v16  ;;  %v609_v19 = vld [vmem:[#allocation2 + $0x18] sm:$0xff] }
 0x11f   : > { %404 = vst.msk [vmem:[#allocation2 + $0x38] sm:$0xff] %vm396_vm1, %v363_v15  ;;  %v623_v20 = vadd.f32 %v4590_v61, %v609_v19  ;;  %v608_v21 = vld [vmem:[#allocation2 + $0x10] sm:$0xff] }
 0x120   : > { %403 = vst.msk [vmem:[#allocation2 + $0x30] sm:$0xff] %vm396_vm1, %v358_v18  ;;  %v622_v22 = vadd.f32 %v608_v21, %v547_v0  ;;  %v4576_v23 = vpop.f32.mrb[8].mxu0 }
 0x121   : > { %v4599_v24 = vpop.f32.mrb[8].mxu1  ;;  %637 = vst.msk [vmem:[#allocation2 + $0x18] sm:$0xff] %vm396_vm1, %v623_v20  ;;  %v373_v25 = vadd.f32 %v4576_v23, %v5601_v49  ;;  %v367_v26 = vpop.f32.mrb[9].mxu0 }
 0x122   : > { %v577_v27 = vpop.f32.mrb[9].mxu1  ;;  %636 = vst.msk [vmem:[#allocation2 + $0x10] sm:$0xff] %vm396_vm1, %v622_v22  ;;  %v368_v28 = vadd.f32 %v5601_v49, %v367_v26  ;;  %v611_v29 = vld [vmem:[#allocation2 + $0x28] sm:$0xff] }
 0x123   : > { %406 = vst.msk [vmem:[#allocation2 + $0x48] sm:$0xff] %vm396_vm1, %v373_v25  ;;  %v625_v30 = vadd.f32 %v4593_v4, %v611_v29  ;;  %v610_v31 = vld [vmem:[#allocation2 + $0x20] sm:$0xff] }
 0x124   : > { %405 = vst.msk [vmem:[#allocation2 + $0x40] sm:$0xff] %vm396_vm1, %v368_v28  ;;  %v624_v32 = vadd.f32 %v610_v31, %v557_v7  ;;  %v4579_v33 = vpop.f32.mrb[10].mxu0 }
 0x125   : > { %v4602_v34 = vpop.f32.mrb[10].mxu1  ;;  %639 = vst.msk [vmem:[#allocation2 + $0x28] sm:$0xff] %vm396_vm1, %v625_v30  ;;  %v383_v35 = vadd.f32 %v4579_v33, %v5601_v49  ;;  %v377_v36 = vpop.f32.mrb[11].mxu0 }
 0x126   : > { %v587_v37 = vpop.f32.mrb[11].mxu1  ;;  %638 = vst.msk [vmem:[#allocation2 + $0x20] sm:$0xff] %vm396_vm1, %v624_v32  ;;  %v378_v38 = vadd.f32 %v5601_v49, %v377_v36  ;;  %v613_v39 = vld [vmem:[#allocation2 + $0x38] sm:$0xff] }
 0x127   : > { %408 = vst.msk [vmem:[#allocation2 + $0x58] sm:$0xff] %vm396_vm1, %v383_v35  ;;  %v627_v40 = vadd.f32 %v4596_v14, %v613_v39  ;;  %v612_v41 = vld [vmem:[#allocation2 + $0x30] sm:$0xff] }
 0x128   : > { %407 = vst.msk [vmem:[#allocation2 + $0x50] sm:$0xff] %vm396_vm1, %v378_v38  ;;  %v626_v42 = vadd.f32 %v612_v41, %v567_v17  ;;  %v4582_v43 = vpop.f32.mrb[12].mxu0 }
 0x129   : > { %v4605_v44 = vpop.f32.mrb[12].mxu1  ;;  %641 = vst.msk [vmem:[#allocation2 + $0x38] sm:$0xff] %vm396_vm1, %v627_v40  ;;  %v393_v45 = vadd.f32 %v4582_v43, %v5601_v49  ;;  %v387_v46 = vpop.f32.mrb[13].mxu0 }
 0x12a   : > { %v597_v47 = vpop.f32.mrb[13].mxu1  ;;  %640 = vst.msk [vmem:[#allocation2 + $0x30] sm:$0xff] %vm396_vm1, %v626_v42  ;;  %v388_v48 = vadd.f32 %v5601_v49, %v387_v46  ;;  %v615_v50 = vld [vmem:[#allocation2 + $0x48] sm:$0xff] }
 0x12b   : > { %410 = vst.msk [vmem:[#allocation2 + $0x68] sm:$0xff] %vm396_vm1, %v393_v45  ;;  %v629_v51 = vadd.f32 %v4599_v24, %v615_v50  ;;  %v614_v52 = vld [vmem:[#allocation2 + $0x40] sm:$0xff] }
 0x12c   : > { %409 = vst.msk [vmem:[#allocation2 + $0x60] sm:$0xff] %vm396_vm1, %v388_v48  ;;  %v628_v53 = vadd.f32 %v614_v52, %v577_v27  ;;  %v4610_v54 = vpop.f32.mrb[14].mxu0 }
 0x12d   : > { %v4633_v55 = vpop.f32.mrb[14].mxu1  ;;  %643 = vst.msk [vmem:[#allocation2 + $0x48] sm:$0xff] %vm396_vm1, %v629_v51  ;;  %v722_v56 = vadd.f32 %v4610_v54, %v5601_v49  ;;  %v716_v57 = vpop.f32.mrb[15].mxu0 }
 0x12e   : > { %v926_v58 = vpop.f32.mrb[15].mxu1  ;;  %642 = vst.msk [vmem:[#allocation2 + $0x40] sm:$0xff] %vm396_vm1, %v628_v53  ;;  %v717_v59 = vadd.f32 %v5601_v49, %v716_v57  ;;  %v617_v60 = vld [vmem:[#allocation2 + $0x58] sm:$0xff] }
 0x12f   : > { %787 = vst.msk [vmem:[#allocation2 + $0x78] sm:$0xff] %vm396_vm1, %v722_v56  ;;  %v631_v61 = vadd.f32 %v4602_v34, %v617_v60  ;;  %v616_v62 = vld [vmem:[#allocation2 + $0x50] sm:$0xff] }
 0x130   : > { %786 = vst.msk [vmem:[#allocation2 + $0x70] sm:$0xff] %vm396_vm1, %v717_v59  ;;  %v630_v63 = vadd.f32 %v616_v62, %v587_v37  ;;  %v4613_v0 = vpop.f32.mrb[16].mxu0  ;;  %v1233_v62 = vld [vmem:[#allocation2 + $0x8] sm:$0xff] }
 0x131   : > { %v4636_v1 = vpop.f32.mrb[16].mxu1  ;;  %645 = vst.msk [vmem:[#allocation2 + $0x58] sm:$0xff] %vm396_vm1, %v631_v61  ;;  %v732_v2 = vadd.f32 %v4613_v0, %v5601_v49  ;;  %v726_v3 = vpop.f32.mrb[17].mxu0 }
 0x132   : > { %v936_v4 = vpop.f32.mrb[17].mxu1  ;;  %644 = vst.msk [vmem:[#allocation2 + $0x50] sm:$0xff] %vm396_vm1, %v630_v63  ;;  %v727_v5 = vadd.f32 %v5601_v49, %v726_v3  ;;  %v619_v6 = vld [vmem:[#allocation2 + $0x68] sm:$0xff] }
 0x133   : > { %789 = vst.msk [vmem:[#allocation2 + $0x88] sm:$0xff] %vm396_vm1, %v732_v2  ;;  %v633_v7 = vadd.f32 %v4605_v44, %v619_v6  ;;  %v618_v8 = vld [vmem:[#allocation2 + $0x60] sm:$0xff] }
 0x134   : > { %788 = vst.msk [vmem:[#allocation2 + $0x80] sm:$0xff] %vm396_vm1, %v727_v5  ;;  %v632_v9 = vadd.f32 %v618_v8, %v597_v47  ;;  %v4616_v10 = vpop.f32.mrb[18].mxu0  ;;  %v1232_v2 = vld [vmem:[#allocation2] sm:$0xff] }
 0x135   : > { %v4639_v11 = vpop.f32.mrb[18].mxu1  ;;  %647 = vst.msk [vmem:[#allocation2 + $0x68] sm:$0xff] %vm396_vm1, %v633_v7  ;;  %v742_v12 = vadd.f32 %v4616_v10, %v5601_v49  ;;  %v736_v13 = vpop.f32.mrb[19].mxu0 }
 0x136   : > { %v946_v14 = vpop.f32.mrb[19].mxu1  ;;  %646 = vst.msk [vmem:[#allocation2 + $0x60] sm:$0xff] %vm396_vm1, %v632_v9  ;;  %v737_v15 = vadd.f32 %v5601_v49, %v736_v13  ;;  %v996_v16 = vld [vmem:[#allocation2 + $0x78] sm:$0xff] }
 0x137   : > { %791 = vst.msk [vmem:[#allocation2 + $0x98] sm:$0xff] %vm396_vm1, %v742_v12  ;;  %v1010_v17 = vadd.f32 %v4633_v55, %v996_v16  ;;  %v995_v18 = vld [vmem:[#allocation2 + $0x70] sm:$0xff]  ;;  %v1235_v12 = vld [vmem:[#allocation2 + $0x18] sm:$0xff] }
 0x138   : > { %790 = vst.msk [vmem:[#allocation2 + $0x90] sm:$0xff] %vm396_vm1, %v737_v15  ;;  %v1009_v19 = vadd.f32 %v995_v18, %v926_v58  ;;  %v4619_v20 = vpop.f32.mrb[20].mxu0  ;;  %v1234_v16 = vld [vmem:[#allocation2 + $0x10] sm:$0xff] }
 0x139   : > { %v4642_v21 = vpop.f32.mrb[20].mxu1  ;;  %1024 = vst.msk [vmem:[#allocation2 + $0x78] sm:$0xff] %vm396_vm1, %v1010_v17  ;;  %v752_v22 = vadd.f32 %v4619_v20, %v5601_v49  ;;  %v746_v23 = vpop.f32.mrb[21].mxu0 }
 0x13a   : > { %v956_v24 = vpop.f32.mrb[21].mxu1  ;;  %1023 = vst.msk [vmem:[#allocation2 + $0x70] sm:$0xff] %vm396_vm1, %v1009_v19  ;;  %v747_v25 = vadd.f32 %v5601_v49, %v746_v23  ;;  %v998_v26 = vld [vmem:[#allocation2 + $0x88] sm:$0xff] }
 0x13b   : > { %793 = vst.msk [vmem:[#allocation2 + $0xa8] sm:$0xff] %vm396_vm1, %v752_v22  ;;  %v1012_v27 = vadd.f32 %v4636_v1, %v998_v26  ;;  %v997_v28 = vld [vmem:[#allocation2 + $0x80] sm:$0xff]  ;;  %v1237_v26 = vld [vmem:[#allocation2 + $0x28] sm:$0xff] }
 0x13c   : > { %792 = vst.msk [vmem:[#allocation2 + $0xa0] sm:$0xff] %vm396_vm1, %v747_v25  ;;  %v1011_v29 = vadd.f32 %v997_v28, %v936_v4  ;;  %v4622_v30 = vpop.f32.mrb[22].mxu0 }
 0x13d   : > { %v4645_v31 = vpop.f32.mrb[22].mxu1  ;;  %1026 = vst.msk [vmem:[#allocation2 + $0x88] sm:$0xff] %vm396_vm1, %v1012_v27  ;;  %v762_v32 = vadd.f32 %v4622_v30, %v5601_v49  ;;  %v756_v33 = vpop.f32.mrb[23].mxu0  ;;  %v1236_v30 = vld [vmem:[#allocation2 + $0x20] sm:$0xff] }
 0x13e   : > { %v966_v34 = vpop.f32.mrb[23].mxu1  ;;  %1025 = vst.msk [vmem:[#allocation2 + $0x80] sm:$0xff] %vm396_vm1, %v1011_v29  ;;  %v757_v35 = vadd.f32 %v5601_v49, %v756_v33  ;;  %v1000_v36 = vld [vmem:[#allocation2 + $0x98] sm:$0xff] }
 0x13f   : > { %795 = vst.msk [vmem:[#allocation2 + $0xb8] sm:$0xff] %vm396_vm1, %v762_v32  ;;  %v1014_v37 = vadd.f32 %v4639_v11, %v1000_v36  ;;  %v999_v38 = vld [vmem:[#allocation2 + $0x90] sm:$0xff]  ;;  %v1239_v36 = vld [vmem:[#allocation2 + $0x38] sm:$0xff] }
 0x140   : > { %794 = vst.msk [vmem:[#allocation2 + $0xb0] sm:$0xff] %vm396_vm1, %v757_v35  ;;  %v1013_v39 = vadd.f32 %v999_v38, %v946_v14  ;;  %v4625_v40 = vpop.f32.mrb[24].mxu0 }
 0x141   : > { %v4648_v41 = vpop.f32.mrb[24].mxu1  ;;  %1028 = vst.msk [vmem:[#allocation2 + $0x98] sm:$0xff] %vm396_vm1, %v1014_v37  ;;  %v772_v42 = vadd.f32 %v4625_v40, %v5601_v49  ;;  %v766_v43 = vpop.f32.mrb[25].mxu0  ;;  %v1238_v40 = vld [vmem:[#allocation2 + $0x30] sm:$0xff] }
 0x142   : > { %v976_v44 = vpop.f32.mrb[25].mxu1  ;;  %1027 = vst.msk [vmem:[#allocation2 + $0x90] sm:$0xff] %vm396_vm1, %v1013_v39  ;;  %v767_v45 = vadd.f32 %v5601_v49, %v766_v43  ;;  %v1002_v46 = vld [vmem:[#allocation2 + $0xa8] sm:$0xff] }
 0x143   : > { %797 = vst.msk [vmem:[#allocation2 + $0xc8] sm:$0xff] %vm396_vm1, %v772_v42  ;;  %v1016_v47 = vadd.f32 %v4642_v21, %v1002_v46  ;;  %v1001_v48 = vld [vmem:[#allocation2 + $0xa0] sm:$0xff]  ;;  %v1241_v46 = vld [vmem:[#allocation2 + $0x48] sm:$0xff] }
 0x144   : > { %796 = vst.msk [vmem:[#allocation2 + $0xc0] sm:$0xff] %vm396_vm1, %v767_v45  ;;  %v1015_v50 = vadd.f32 %v1001_v48, %v956_v24  ;;  %v4628_v51 = vpop.f32.mrb[26].mxu0 }
 0x145   : > { %v4651_v52 = vpop.f32.mrb[26].mxu1  ;;  %1030 = vst.msk [vmem:[#allocation2 + $0xa8] sm:$0xff] %vm396_vm1, %v1016_v47  ;;  %v782_v53 = vadd.f32 %v4628_v51, %v5601_v49  ;;  %v776_v54 = vpop.f32.mrb[27].mxu0  ;;  %v1240_v51 = vld [vmem:[#allocation2 + $0x40] sm:$0xff] }
 0x146   : > { %v986_v55 = vpop.f32.mrb[27].mxu1  ;;  %1029 = vst.msk [vmem:[#allocation2 + $0xa0] sm:$0xff] %vm396_vm1, %v1015_v50  ;;  %v777_v56 = vadd.f32 %v5601_v49, %v776_v54  ;;  %v1004_v57 = vld [vmem:[#allocation2 + $0xb8] sm:$0xff] }
 0x147   : > { %799 = vst.msk [vmem:[#allocation2 + $0xd8] sm:$0xff] %vm396_vm1, %v782_v53  ;;  %v1018_v58 = vadd.f32 %v4645_v31, %v1004_v57  ;;  %v1003_v59 = vld [vmem:[#allocation2 + $0xb0] sm:$0xff]  ;;  %v1243_v57 = vld [vmem:[#allocation2 + $0x58] sm:$0xff] }
 0x148   : > { %798 = vst.msk [vmem:[#allocation2 + $0xd0] sm:$0xff] %vm396_vm1, %v777_v56  ;;  %v1017_v60 = vadd.f32 %v1003_v59, %v966_v34  ;;  %v4656_v61 = vpop.f32.mrb[28].mxu0 }
 0x149   : > { %v4679_v63 = vpop.f32.mrb[28].mxu1  ;;  %1032 = vst.msk [vmem:[#allocation2 + $0xb8] sm:$0xff] %vm396_vm1, %v1018_v58  ;;  %v1247_v0 = vadd.f32 %v4656_v61, %v1233_v62  ;;  %v1163_v1 = vpop.f32.mrb[29].mxu0  ;;  %v1242_v61 = vld [vmem:[#allocation2 + $0x50] sm:$0xff] }
 0x14a   : > { %v1348_v3 = vadd.f32 %v4679_v63, %v5601_v49  ;;  %v1342_v4 = vpop.f32.mrb[29].mxu1  ;;  %1031 = vst.msk [vmem:[#allocation2 + $0xb0] sm:$0xff] %vm396_vm1, %v1017_v60  ;;  %v1246_v5 = vadd.f32 %v1232_v2, %v1163_v1  ;;  %v1006_v6 = vld [vmem:[#allocation2 + $0xc8] sm:$0xff] }
 0x14b   : > { %v1343_v7 = vadd.f32 %v5601_v49, %v1342_v4  ;;  %1261 = vst.msk [vmem:[#allocation2 + $0x8] sm:$0xff] %vm396_vm1, %v1247_v0  ;;  %v1020_v8 = vadd.f32 %v4648_v41, %v1006_v6  ;;  %v1005_v9 = vld [vmem:[#allocation2 + $0xc0] sm:$0xff] }
 0x14c   : > { %1413 = vst.msk [vmem:[#allocation2 + $0xe8] sm:$0xff] %vm396_vm1, %v1348_v3  ;;  %1260 = vst.msk [vmem:[#allocation2] sm:$0xff] %vm396_vm1, %v1246_v5  ;;  %v1019_v10 = vadd.f32 %v1005_v9, %v976_v44  ;;  %v4659_v11 = vpop.f32.mrb[30].mxu0  ;;  %v1245_v3 = vld [vmem:[#allocation2 + $0x68] sm:$0xff] }
 0x14d   : > { %1412 = vst.msk [vmem:[#allocation2 + $0xe0] sm:$0xff] %vm396_vm1, %v1343_v7  ;;  %v4682_v13 = vpop.f32.mrb[30].mxu1  ;;  %1034 = vst.msk [vmem:[#allocation2 + $0xc8] sm:$0xff] %vm396_vm1, %v1020_v8  ;;  %v1249_v14 = vadd.f32 %v4659_v11, %v1235_v12  ;;  %v1173_v15 = vpop.f32.mrb[31].mxu0  ;;  %v1244_v7 = vld [vmem:[#allocation2 + $0x60] sm:$0xff] }
 0x14e   : > { %v1358_v17 = vadd.f32 %v4682_v13, %v5601_v49  ;;  %v1352_v18 = vpop.f32.mrb[31].mxu1  ;;  %1033 = vst.msk [vmem:[#allocation2 + $0xc0] sm:$0xff] %vm396_vm1, %v1019_v10  ;;  %v1248_v19 = vadd.f32 %v1234_v16, %v1173_v15  ;;  %v1008_v20 = vld [vmem:[#allocation2 + $0xd8] sm:$0xff] }
 0x14f   : > { %v1353_v21 = vadd.f32 %v5601_v49, %v1352_v18  ;;  %1263 = vst.msk [vmem:[#allocation2 + $0x18] sm:$0xff] %vm396_vm1, %v1249_v14  ;;  %v1022_v22 = vadd.f32 %v4651_v52, %v1008_v20  ;;  %v1007_v23 = vld [vmem:[#allocation2 + $0xd0] sm:$0xff]  ;;  %v1800_v15 = vld [vmem:[#allocation2 + $0x78] sm:$0xff] }
 0x150   : > { %1415 = vst.msk [vmem:[#allocation2 + $0xf8] sm:$0xff] %vm396_vm1, %v1358_v17  ;;  %1262 = vst.msk [vmem:[#allocation2 + $0x10] sm:$0xff] %vm396_vm1, %v1248_v19  ;;  %v1021_v24 = vadd.f32 %v1007_v23, %v986_v55  ;;  %v4662_v25 = vpop.f32.mrb[32].mxu0 }
 0x151   : > { %1414 = vst.msk [vmem:[#allocation2 + $0xf0] sm:$0xff] %vm396_vm1, %v1353_v21  ;;  %v4685_v27 = vpop.f32.mrb[32].mxu1  ;;  %1036 = vst.msk [vmem:[#allocation2 + $0xd8] sm:$0xff] %vm396_vm1, %v1022_v22  ;;  %v1251_v28 = vadd.f32 %v4662_v25, %v1237_v26  ;;  %v1183_v29 = vpop.f32.mrb[33].mxu0  ;;  %v1799_v21 = vld [vmem:[#allocation2 + $0x70] sm:$0xff] }
 0x152   : > { %v1368_v31 = vadd.f32 %v4685_v27, %v5601_v49  ;;  %v1362_v32 = vpop.f32.mrb[33].mxu1  ;;  %1035 = vst.msk [vmem:[#allocation2 + $0xd0] sm:$0xff] %vm396_vm1, %v1021_v24  ;;  %v1250_v33 = vadd.f32 %v1236_v30, %v1183_v29  ;;  %v1621_v13 = vld [vmem:[#allocation2 + $0x8] sm:$0xff] }
 0x153   : > { %v1363_v34 = vadd.f32 %v5601_v49, %v1362_v32  ;;  %1265 = vst.msk [vmem:[#allocation2 + $0x28] sm:$0xff] %vm396_vm1, %v1251_v28  ;;  %v1620_v19 = vld [vmem:[#allocation2] sm:$0xff]  ;;  %v1802_v27 = vld [vmem:[#allocation2 + $0x88] sm:$0xff] }
 0x154   : > { %1417 = vst.msk [vmem:[#allocation2 + $0x108] sm:$0xff] %vm396_vm1, %v1368_v31  ;;  %1264 = vst.msk [vmem:[#allocation2 + $0x20] sm:$0xff] %vm396_vm1, %v1250_v33  ;;  %v4665_v35 = vpop.f32.mrb[34].mxu0  ;;  %v1801_v33 = vld [vmem:[#allocation2 + $0x80] sm:$0xff] }
 0x155   : > { %1416 = vst.msk [vmem:[#allocation2 + $0x100] sm:$0xff] %vm396_vm1, %v1363_v34  ;;  %v4688_v37 = vpop.f32.mrb[34].mxu1  ;;  %v1253_v38 = vadd.f32 %v4665_v35, %v1239_v36  ;;  %v1193_v39 = vpop.f32.mrb[35].mxu0 }
 0x156   : > { %v1378_v41 = vadd.f32 %v4688_v37, %v5601_v49  ;;  %v1372_v42 = vpop.f32.mrb[35].mxu1  ;;  %v1252_v43 = vadd.f32 %v1238_v40, %v1193_v39  ;;  %v1623_v25 = vld [vmem:[#allocation2 + $0x18] sm:$0xff] }
 0x157   : > { %v1373_v44 = vadd.f32 %v5601_v49, %v1372_v42  ;;  %1267 = vst.msk [vmem:[#allocation2 + $0x38] sm:$0xff] %vm396_vm1, %v1253_v38  ;;  %v1622_v31 = vld [vmem:[#allocation2 + $0x10] sm:$0xff]  ;;  %v1804_v39 = vld [vmem:[#allocation2 + $0x98] sm:$0xff] }
 0x158   : > { %1419 = vst.msk [vmem:[#allocation2 + $0x118] sm:$0xff] %vm396_vm1, %v1378_v41  ;;  %1266 = vst.msk [vmem:[#allocation2 + $0x30] sm:$0xff] %vm396_vm1, %v1252_v43  ;;  %v4668_v45 = vpop.f32.mrb[36].mxu0 }
 0x159   : > { %1418 = vst.msk [vmem:[#allocation2 + $0x110] sm:$0xff] %vm396_vm1, %v1373_v44  ;;  %v4691_v47 = vpop.f32.mrb[36].mxu1  ;;  %v1255_v48 = vadd.f32 %v4668_v45, %v1241_v46  ;;  %v1203_v50 = vpop.f32.mrb[37].mxu0  ;;  %v1803_v45 = vld [vmem:[#allocation2 + $0x90] sm:$0xff] }
 0x15a   : > { %v1388_v52 = vadd.f32 %v4691_v47, %v5601_v49  ;;  %v1382_v53 = vpop.f32.mrb[37].mxu1  ;;  %v1254_v54 = vadd.f32 %v1240_v51, %v1203_v50  ;;  %v1625_v37 = vld [vmem:[#allocation2 + $0x28] sm:$0xff] }
 0x15b   : > { %v1383_v55 = vadd.f32 %v5601_v49, %v1382_v53  ;;  %1269 = vst.msk [vmem:[#allocation2 + $0x48] sm:$0xff] %vm396_vm1, %v1255_v48  ;;  %v1624_v43 = vld [vmem:[#allocation2 + $0x20] sm:$0xff] }
 0x15c   : > { %1421 = vst.msk [vmem:[#allocation2 + $0x128] sm:$0xff] %vm396_vm1, %v1388_v52  ;;  %1268 = vst.msk [vmem:[#allocation2 + $0x40] sm:$0xff] %vm396_vm1, %v1254_v54  ;;  %v4671_v56 = vpop.f32.mrb[38].mxu0  ;;  %v1806_v54 = vld [vmem:[#allocation2 + $0xa8] sm:$0xff] }
 0x15d   : > { %1420 = vst.msk [vmem:[#allocation2 + $0x120] sm:$0xff] %vm396_vm1, %v1383_v55  ;;  %v4694_v58 = vpop.f32.mrb[38].mxu1  ;;  %v1257_v59 = vadd.f32 %v4671_v56, %v1243_v57  ;;  %v1213_v60 = vpop.f32.mrb[39].mxu0 }
 0x15e   : > { %v1398_v62 = vadd.f32 %v4694_v58, %v5601_v49  ;;  %v1392_v63 = vpop.f32.mrb[39].mxu1  ;;  %v1256_v0 = vadd.f32 %v1242_v61, %v1213_v60  ;;  %v1627_v52 = vld [vmem:[#allocation2 + $0x38] sm:$0xff]  ;;  %v1805_v60 = vld [vmem:[#allocation2 + $0xa0] sm:$0xff] }
 0x15f   : > { %v1393_v1 = vadd.f32 %v5601_v49, %v1392_v63  ;;  %1271 = vst.msk [vmem:[#allocation2 + $0x58] sm:$0xff] %vm396_vm1, %v1257_v59  ;;  %v1626_v58 = vld [vmem:[#allocation2 + $0x30] sm:$0xff] }
 0x160   : > { %1423 = vst.msk [vmem:[#allocation2 + $0x138] sm:$0xff] %vm396_vm1, %v1398_v62  ;;  %1270 = vst.msk [vmem:[#allocation2 + $0x50] sm:$0xff] %vm396_vm1, %v1256_v0  ;;  %v4674_v2 = vpop.f32.mrb[40].mxu0 }
 0x161   : > { %1422 = vst.msk [vmem:[#allocation2 + $0x130] sm:$0xff] %vm396_vm1, %v1393_v1  ;;  %v4697_v4 = vpop.f32.mrb[40].mxu1  ;;  %v1259_v5 = vadd.f32 %v4674_v2, %v1245_v3  ;;  %v1223_v6 = vpop.f32.mrb[41].mxu0 }
 0x162   : > { %v1408_v8 = vadd.f32 %v4697_v4, %v5601_v49  ;;  %v1402_v9 = vpop.f32.mrb[41].mxu1  ;;  %v1258_v10 = vadd.f32 %v1244_v7, %v1223_v6  ;;  %v1629_v2 = vld [vmem:[#allocation2 + $0x48] sm:$0xff]  ;;  %v1808_v4 = vld [vmem:[#allocation2 + $0xb8] sm:$0xff] }
 0x163   : > { %v1403_v11 = vadd.f32 %v5601_v49, %v1402_v9  ;;  %1273 = vst.msk [vmem:[#allocation2 + $0x68] sm:$0xff] %vm396_vm1, %v1259_v5 }
 0x164   : > { %1425 = vst.msk [vmem:[#allocation2 + $0x148] sm:$0xff] %vm396_vm1, %v1408_v8  ;;  %1272 = vst.msk [vmem:[#allocation2 + $0x60] sm:$0xff] %vm396_vm1, %v1258_v10  ;;  %v4702_v12 = vpop.f32.mrb[42].mxu0  ;;  %v1628_v8 = vld [vmem:[#allocation2 + $0x40] sm:$0xff]  ;;  %v1807_v10 = vld [vmem:[#allocation2 + $0xb0] sm:$0xff] }
 0x165   : > { %1424 = vst.msk [vmem:[#allocation2 + $0x140] sm:$0xff] %vm396_vm1, %v1403_v11  ;;  %v4725_v14 = vpop.f32.mrb[42].mxu1  ;;  %v1635_v16 = vadd.f32 %v4702_v12, %v1621_v13  ;;  %v1551_v18 = vpop.f32.mrb[43].mxu0 }
 0x166   : > { %v1814_v17 = vadd.f32 %v4725_v14, %v1800_v15  ;;  %v1730_v20 = vpop.f32.mrb[43].mxu1  ;;  %v1634_v22 = vadd.f32 %v1620_v19, %v1551_v18  ;;  %v1810_v18 = vld [vmem:[#allocation2 + $0xc8] sm:$0xff] }
 0x167   : > { %v1813_v23 = vadd.f32 %v1799_v21, %v1730_v20  ;;  %1649 = vst.msk [vmem:[#allocation2 + $0x8] sm:$0xff] %vm396_vm1, %v1635_v16  ;;  %v1631_v16 = vld [vmem:[#allocation2 + $0x58] sm:$0xff] }
 0x168   : > { %1828 = vst.msk [vmem:[#allocation2 + $0x78] sm:$0xff] %vm396_vm1, %v1814_v17  ;;  %1648 = vst.msk [vmem:[#allocation2] sm:$0xff] %vm396_vm1, %v1634_v22  ;;  %v4705_v24 = vpop.f32.mrb[44].mxu0  ;;  %v1630_v22 = vld [vmem:[#allocation2 + $0x50] sm:$0xff] }
 0x169   : > { %1827 = vst.msk [vmem:[#allocation2 + $0x70] sm:$0xff] %vm396_vm1, %v1813_v23  ;;  %v4728_v26 = vpop.f32.mrb[44].mxu1  ;;  %v1637_v28 = vadd.f32 %v4705_v24, %v1623_v25  ;;  %v1561_v30 = vpop.f32.mrb[45].mxu0  ;;  %v1809_v24 = vld [vmem:[#allocation2 + $0xc0] sm:$0xff] }
 0x16a   : > { %v1816_v29 = vadd.f32 %v4728_v26, %v1802_v27  ;;  %v1740_v32 = vpop.f32.mrb[45].mxu1  ;;  %v1636_v34 = vadd.f32 %v1622_v31, %v1561_v30  ;;  %v1633_v30 = vld [vmem:[#allocation2 + $0x68] sm:$0xff] }
 0x16b   : > { %v1815_v35 = vadd.f32 %v1801_v33, %v1740_v32  ;;  %1651 = vst.msk [vmem:[#allocation2 + $0x18] sm:$0xff] %vm396_vm1, %v1637_v28  ;;  %v1812_v32 = vld [vmem:[#allocation2 + $0xd8] sm:$0xff] }
 0x16c   : > { %1830 = vst.msk [vmem:[#allocation2 + $0x88] sm:$0xff] %vm396_vm1, %v1816_v29  ;;  %1650 = vst.msk [vmem:[#allocation2 + $0x10] sm:$0xff] %vm396_vm1, %v1636_v34  ;;  %v4708_v36 = vpop.f32.mrb[46].mxu0 }
 0x16d   : > { %1829 = vst.msk [vmem:[#allocation2 + $0x80] sm:$0xff] %vm396_vm1, %v1815_v35  ;;  %v4731_v38 = vpop.f32.mrb[46].mxu1  ;;  %v1639_v40 = vadd.f32 %v4708_v36, %v1625_v37  ;;  %v1571_v42 = vpop.f32.mrb[47].mxu0  ;;  %v1632_v36 = vld [vmem:[#allocation2 + $0x60] sm:$0xff] }
 0x16e   : > { %v1818_v41 = vadd.f32 %v4731_v38, %v1804_v39  ;;  %v1750_v44 = vpop.f32.mrb[47].mxu1  ;;  %v3479_v46 = vld [vmem:[#allocation2 + $0x8] sm:$0xff]  ;;  %v1638_v47 = vadd.f32 %v1624_v43, %v1571_v42  ;;  %v1811_v38 = vld [vmem:[#allocation2 + $0xd0] sm:$0xff] }
 0x16f   : > { %v1817_v48 = vadd.f32 %v1803_v45, %v1750_v44  ;;  %3535 = vst.msk [vmem:[%s5759_s12 + $0x8] sm:$0xff] %vm396_vm1, %v3479_v46  ;;  %v3478_v50 = vld [vmem:[#allocation2] sm:$0xff]  ;;  %1653 = vst.msk [vmem:[#allocation2 + $0x28] sm:$0xff] %vm396_vm1, %v1639_v40  ;;  %v1979_v44 = vld [vmem:[#allocation2 + $0xe8] sm:$0xff] }
 0x170   : > { %1832 = vst.msk [vmem:[#allocation2 + $0x98] sm:$0xff] %vm396_vm1, %v1818_v41  ;;  %3534 = vst.msk [vmem:[%s5759_s12] sm:$0xff] %vm396_vm1, %v3478_v50  ;;  %v4711_v51 = vpop.f32.mrb[48].mxu0 }
 0x171   : > { %1652 = vst.msk [vmem:[#allocation2 + $0x20] sm:$0xff] %vm396_vm1, %v1638_v47  ;;  %1831 = vst.msk [vmem:[#allocation2 + $0x90] sm:$0xff] %vm396_vm1, %v1817_v48  ;;  %v4734_v53 = vpop.f32.mrb[48].mxu1  ;;  %v1641_v55 = vadd.f32 %v4711_v51, %v1627_v52  ;;  %v1581_v57 = vpop.f32.mrb[49].mxu0  ;;  %v1978_v48 = vld [vmem:[#allocation2 + $0xe0] sm:$0xff] }
 0x172   : > { %v1820_v56 = vadd.f32 %v4734_v53, %v1806_v54  ;;  %v1760_v59 = vpop.f32.mrb[49].mxu1  ;;  %v3481_v61 = vld [vmem:[#allocation2 + $0x18] sm:$0xff]  ;;  %v1640_v62 = vadd.f32 %v1626_v58, %v1581_v57 }
 0x173   : > { %v1819_v63 = vadd.f32 %v1805_v60, %v1760_v59  ;;  %3537 = vst.msk [vmem:[%s5759_s12 + $0x18] sm:$0xff] %vm396_vm1, %v3481_v61  ;;  %v3480_v0 = vld [vmem:[#allocation2 + $0x10] sm:$0xff]  ;;  %1655 = vst.msk [vmem:[#allocation2 + $0x38] sm:$0xff] %vm396_vm1, %v1641_v55  ;;  %v1981_v57 = vld [vmem:[#allocation2 + $0xf8] sm:$0xff] }
 0x174   : > { %1834 = vst.msk [vmem:[#allocation2 + $0xa8] sm:$0xff] %vm396_vm1, %v1820_v56  ;;  %3536 = vst.msk [vmem:[%s5759_s12 + $0x10] sm:$0xff] %vm396_vm1, %v3480_v0  ;;  %v4714_v1 = vpop.f32.mrb[50].mxu0  ;;  %v1980_v61 = vld [vmem:[#allocation2 + $0xf0] sm:$0xff] }
 0x175   : > { %1654 = vst.msk [vmem:[#allocation2 + $0x30] sm:$0xff] %vm396_vm1, %v1640_v62  ;;  %1833 = vst.msk [vmem:[#allocation2 + $0xa0] sm:$0xff] %vm396_vm1, %v1819_v63  ;;  %v4737_v3 = vpop.f32.mrb[50].mxu1  ;;  %v1643_v5 = vadd.f32 %v4714_v1, %v1629_v2  ;;  %v1591_v7 = vpop.f32.mrb[51].mxu0 }
 0x176   : > { %v1822_v6 = vadd.f32 %v4737_v3, %v1808_v4  ;;  %v1770_v9 = vpop.f32.mrb[51].mxu1  ;;  %v3483_v11 = vld [vmem:[#allocation2 + $0x28] sm:$0xff]  ;;  %v1642_v12 = vadd.f32 %v1628_v8, %v1591_v7 }
 0x177   : > { %v1821_v13 = vadd.f32 %v1807_v10, %v1770_v9  ;;  %3539 = vst.msk [vmem:[%s5759_s12 + $0x28] sm:$0xff] %vm396_vm1, %v3483_v11  ;;  %1657 = vst.msk [vmem:[#allocation2 + $0x48] sm:$0xff] %vm396_vm1, %v1643_v5  ;;  %v1983_v5 = vld [vmem:[#allocation2 + $0x108] sm:$0xff]  ;;  %v1982_v9 = vld [vmem:[#allocation2 + $0x100] sm:$0xff] }
 0x178   : > { %v3482_v14 = vld [vmem:[#allocation2 + $0x20] sm:$0xff]  ;;  %1836 = vst.msk [vmem:[#allocation2 + $0xb8] sm:$0xff] %vm396_vm1, %v1822_v6  ;;  %1656 = vst.msk [vmem:[#allocation2 + $0x40] sm:$0xff] %vm396_vm1, %v1642_v12  ;;  %v4717_v15 = vpop.f32.mrb[52].mxu0 }
 0x179   : > { %3538 = vst.msk [vmem:[%s5759_s12 + $0x20] sm:$0xff] %vm396_vm1, %v3482_v14  ;;  %1835 = vst.msk [vmem:[#allocation2 + $0xb0] sm:$0xff] %vm396_vm1, %v1821_v13  ;;  %v4740_v17 = vpop.f32.mrb[52].mxu1  ;;  %v1645_v19 = vadd.f32 %v4717_v15, %v1631_v16  ;;  %v1601_v21 = vpop.f32.mrb[53].mxu0  ;;  %v1985_v15 = vld [vmem:[#allocation2 + $0x118] sm:$0xff] }
 0x17a   : > { %v1824_v20 = vadd.f32 %v4740_v17, %v1810_v18  ;;  %v1780_v23 = vpop.f32.mrb[53].mxu1  ;;  %v3485_v25 = vld [vmem:[#allocation2 + $0x38] sm:$0xff]  ;;  %v1644_v26 = vadd.f32 %v1630_v22, %v1601_v21 }
 0x17b   : > { %v1823_v27 = vadd.f32 %v1809_v24, %v1780_v23  ;;  %3541 = vst.msk [vmem:[%s5759_s12 + $0x38] sm:$0xff] %vm396_vm1, %v3485_v25  ;;  %1659 = vst.msk [vmem:[#allocation2 + $0x58] sm:$0xff] %vm396_vm1, %v1645_v19  ;;  %v1984_v19 = vld [vmem:[#allocation2 + $0x110] sm:$0xff]  ;;  %v1987_v25 = vld [vmem:[#allocation2 + $0x128] sm:$0xff] }
 0x17c   : > { %v3484_v28 = vld [vmem:[#allocation2 + $0x30] sm:$0xff]  ;;  %1838 = vst.msk [vmem:[#allocation2 + $0xc8] sm:$0xff] %vm396_vm1, %v1824_v20  ;;  %1658 = vst.msk [vmem:[#allocation2 + $0x50] sm:$0xff] %vm396_vm1, %v1644_v26  ;;  %v4720_v29 = vpop.f32.mrb[54].mxu0 }
 0x17d   : > { %3540 = vst.msk [vmem:[%s5759_s12 + $0x30] sm:$0xff] %vm396_vm1, %v3484_v28  ;;  %1837 = vst.msk [vmem:[#allocation2 + $0xc0] sm:$0xff] %vm396_vm1, %v1823_v27  ;;  %v4743_v31 = vpop.f32.mrb[54].mxu1  ;;  %v1647_v33 = vadd.f32 %v4720_v29, %v1633_v30  ;;  %v1611_v35 = vpop.f32.mrb[55].mxu0  ;;  %v1986_v29 = vld [vmem:[#allocation2 + $0x120] sm:$0xff] }
 0x17e   : > { %v1826_v34 = vadd.f32 %v4743_v31, %v1812_v32  ;;  %v1790_v37 = vpop.f32.mrb[55].mxu1  ;;  %v3487_v39 = vld [vmem:[#allocation2 + $0x48] sm:$0xff]  ;;  %v1646_v40 = vadd.f32 %v1632_v36, %v1611_v35  ;;  %v4998_v30 = vld [vmem:[#allocation3] ss:$0 sm:$0xff]  ;;  %v1989_v35 = vld [vmem:[#allocation2 + $0x138] sm:$0xff] }
 0x17f   : > { %v1825_v41 = vadd.f32 %v1811_v38, %v1790_v37  ;;  %3543 = vst.msk [vmem:[%s5759_s12 + $0x48] sm:$0xff] %vm396_vm1, %v3487_v39  ;;  %v3486_v42 = vld [vmem:[#allocation2 + $0x40] sm:$0xff]  ;;  %1661 = vst.msk [vmem:[#allocation2 + $0x68] sm:$0xff] %vm396_vm1, %v1647_v33  ;;  %v1988_v39 = vld [vmem:[#allocation2 + $0x130] sm:$0xff] }
 0x180   : > { %1840 = vst.msk [vmem:[#allocation2 + $0xd8] sm:$0xff] %vm396_vm1, %v1826_v34  ;;  %3542 = vst.msk [vmem:[%s5759_s12 + $0x40] sm:$0xff] %vm396_vm1, %v3486_v42  ;;  %v4748_v43 = vpop.f32.mrb[56].mxu0 }
 0x181   : > { %1660 = vst.msk [vmem:[#allocation2 + $0x60] sm:$0xff] %vm396_vm1, %v1646_v40  ;;  %1839 = vst.msk [vmem:[#allocation2 + $0xd0] sm:$0xff] %vm396_vm1, %v1825_v41  ;;  %v4771_v45 = vpop.f32.mrb[56].mxu1  ;;  %v1993_v46 = vadd.f32 %v4748_v43, %v1979_v44  ;;  %v1909_v47 = vpop.f32.mrb[57].mxu0 }
 0x182   : > { %v2094_v50 = vadd.f32 %v4771_v45, %v5601_v49  ;;  %v2088_v51 = vpop.f32.mrb[57].mxu1  ;;  %v3489_v52 = vld [vmem:[#allocation2 + $0x58] sm:$0xff]  ;;  %v1992_v53 = vadd.f32 %v1978_v48, %v1909_v47  ;;  %v1991_v45 = vld [vmem:[#allocation2 + $0x148] sm:$0xff] }
 0x183   : > { %v2089_v54 = vadd.f32 %v5601_v49, %v2088_v51  ;;  %3545 = vst.msk [vmem:[%s5759_s12 + $0x58] sm:$0xff] %vm396_vm1, %v3489_v52  ;;  %v3488_v55 = vld [vmem:[#allocation2 + $0x50] sm:$0xff]  ;;  %2007 = vst.msk [vmem:[#allocation2 + $0xe8] sm:$0xff] %vm396_vm1, %v1993_v46 }
 0x184   : > { %2159 = vst.msk [vmem:[#allocation2 + $0x158] sm:$0xff] %vm396_vm1, %v2094_v50  ;;  %3544 = vst.msk [vmem:[%s5759_s12 + $0x50] sm:$0xff] %vm396_vm1, %v3488_v55  ;;  %v4751_v56 = vpop.f32.mrb[58].mxu0  ;;  %v1990_v50 = vld [vmem:[#allocation2 + $0x140] sm:$0xff] }
 0x185   : > { %2006 = vst.msk [vmem:[#allocation2 + $0xe0] sm:$0xff] %vm396_vm1, %v1992_v53  ;;  %2158 = vst.msk [vmem:[#allocation2 + $0x150] sm:$0xff] %vm396_vm1, %v2089_v54  ;;  %v4774_v58 = vpop.f32.mrb[58].mxu1  ;;  %v1995_v59 = vadd.f32 %v4751_v56, %v1981_v57  ;;  %v1919_v60 = vpop.f32.mrb[59].mxu0  ;;  %v2368_v56 = vld [vmem:[#allocation2 + $0x78] sm:$0xff] }
 0x186   : > { %v2104_v62 = vadd.f32 %v4774_v58, %v5601_v49  ;;  %v2098_v63 = vpop.f32.mrb[59].mxu1  ;;  %v3491_v0 = vld [vmem:[#allocation2 + $0x68] sm:$0xff]  ;;  %v1994_v1 = vadd.f32 %v1980_v61, %v1919_v60 }
 0x187   : > { %v2099_v2 = vadd.f32 %v5601_v49, %v2098_v63  ;;  %3547 = vst.msk [vmem:[%s5759_s12 + $0x68] sm:$0xff] %vm396_vm1, %v3491_v0  ;;  %2009 = vst.msk [vmem:[#allocation2 + $0xf8] sm:$0xff] %vm396_vm1, %v1995_v59 }
 0x188   : > { %v3490_v3 = vld [vmem:[#allocation2 + $0x60] sm:$0xff]  ;;  %2161 = vst.msk [vmem:[#allocation2 + $0x168] sm:$0xff] %vm396_vm1, %v2104_v62  ;;  %2008 = vst.msk [vmem:[#allocation2 + $0xf0] sm:$0xff] %vm396_vm1, %v1994_v1  ;;  %v4754_v4 = vpop.f32.mrb[60].mxu0  ;;  %v2367_v62 = vld [vmem:[#allocation2 + $0x70] sm:$0xff] }
 0x189   : > { %3546 = vst.msk [vmem:[%s5759_s12 + $0x60] sm:$0xff] %vm396_vm1, %v3490_v3  ;;  %2160 = vst.msk [vmem:[#allocation2 + $0x160] sm:$0xff] %vm396_vm1, %v2099_v2  ;;  %v4777_v6 = vpop.f32.mrb[60].mxu1  ;;  %v1997_v7 = vadd.f32 %v4754_v4, %v1983_v5  ;;  %v1929_v8 = vpop.f32.mrb[61].mxu0  ;;  %v2370_v4 = vld [vmem:[#allocation2 + $0x88] sm:$0xff] }
 0x18a   : > { %v2114_v10 = vadd.f32 %v4777_v6, %v5601_v49  ;;  %v2108_v11 = vpop.f32.mrb[61].mxu1  ;;  %v1996_v12 = vadd.f32 %v1982_v9, %v1929_v8 }
 0x18b   : > { %v2109_v13 = vadd.f32 %v5601_v49, %v2108_v11  ;;  %2011 = vst.msk [vmem:[#allocation2 + $0x108] sm:$0xff] %vm396_vm1, %v1997_v7  ;;  %v2547_v58 = vld [vmem:[#allocation2 + $0x158] sm:$0xff] }
 0x18c   : > { %2163 = vst.msk [vmem:[#allocation2 + $0x178] sm:$0xff] %vm396_vm1, %v2114_v10  ;;  %2010 = vst.msk [vmem:[#allocation2 + $0x100] sm:$0xff] %vm396_vm1, %v1996_v12  ;;  %v4757_v14 = vpop.f32.mrb[62].mxu0  ;;  %v2546_v0 = vld [vmem:[#allocation2 + $0x150] sm:$0xff]  ;;  %v2369_v10 = vld [vmem:[#allocation2 + $0x80] sm:$0xff] }
 0x18d   : > { %2162 = vst.msk [vmem:[#allocation2 + $0x170] sm:$0xff] %vm396_vm1, %v2109_v13  ;;  %v4780_v16 = vpop.f32.mrb[62].mxu1  ;;  %v1999_v17 = vadd.f32 %v4757_v14, %v1985_v15  ;;  %v1939_v18 = vpop.f32.mrb[63].mxu0 }
 0x18e   : > { %v2124_v20 = vadd.f32 %v4780_v16, %v5601_v49  ;;  %v2118_v21 = vpop.f32.mrb[63].mxu1  ;;  %v1998_v22 = vadd.f32 %v1984_v19, %v1939_v18  ;;  %v2372_v16 = vld [vmem:[#allocation2 + $0x98] sm:$0xff] }
 0x18f   : > { %v2119_v23 = vadd.f32 %v5601_v49, %v2118_v21  ;;  %2013 = vst.msk [vmem:[#allocation2 + $0x118] sm:$0xff] %vm396_vm1, %v1999_v17  ;;  %v2549_v6 = vld [vmem:[#allocation2 + $0x168] sm:$0xff] }
 0x190   : > { %2165 = vst.msk [vmem:[#allocation2 + $0x188] sm:$0xff] %vm396_vm1, %v2124_v20  ;;  %2012 = vst.msk [vmem:[#allocation2 + $0x110] sm:$0xff] %vm396_vm1, %v1998_v22  ;;  %v4760_v24 = vpop.f32.mrb[64].mxu0  ;;  %v2548_v12 = vld [vmem:[#allocation2 + $0x160] sm:$0xff]  ;;  %v2371_v22 = vld [vmem:[#allocation2 + $0x90] sm:$0xff] }
 0x191   : > { %2164 = vst.msk [vmem:[#allocation2 + $0x180] sm:$0xff] %vm396_vm1, %v2119_v23  ;;  %v4783_v26 = vpop.f32.mrb[64].mxu1  ;;  %v2001_v27 = vadd.f32 %v4760_v24, %v1987_v25  ;;  %v1949_v28 = vpop.f32.mrb[65].mxu0 }
 0x192   : > { %v2134_v31 = vadd.f32 %v4998_v30, %v4783_v26  ;;  %v2128_v32 = vpop.f32.mrb[65].mxu1  ;;  %v2000_v33 = vadd.f32 %v1986_v29, %v1949_v28 }
 0x193   : > { %v2129_v34 = vadd.f32 %v4998_v30, %v2128_v32  ;;  %2015 = vst.msk [vmem:[#allocation2 + $0x128] sm:$0xff] %vm396_vm1, %v2001_v27  ;;  %v2551_v18 = vld [vmem:[#allocation2 + $0x178] sm:$0xff] }
 0x194   : > { %2167 = vst.msk [vmem:[#allocation2 + $0x198] sm:$0xff] %vm396_vm1, %v2134_v31  ;;  %2014 = vst.msk [vmem:[#allocation2 + $0x120] sm:$0xff] %vm396_vm1, %v2000_v33  ;;  %v4763_v49 = vpop.f32.mrb[66].mxu0  ;;  %v2550_v24 = vld [vmem:[#allocation2 + $0x170] sm:$0xff] }
 0x195   : > { %2166 = vst.msk [vmem:[#allocation2 + $0x190] sm:$0xff] %vm396_vm1, %v2129_v34  ;;  %v4786_v36 = vpop.f32.mrb[66].mxu1  ;;  %v2003_v37 = vadd.f32 %v4763_v49, %v1989_v35  ;;  %v1959_v38 = vpop.f32.mrb[67].mxu0  ;;  %v2373_v35 = vld [vmem:[#allocation2 + $0xa0] sm:$0xff] }
 0x196   : > { %v2144_v40 = vadd.f32 %v4998_v30, %v4786_v36  ;;  %v2138_v41 = vpop.f32.mrb[67].mxu1  ;;  %v2002_v42 = vadd.f32 %v1988_v39, %v1959_v38 }
 0x197   : > { %v2139_v43 = vadd.f32 %v4998_v30, %v2138_v41  ;;  %2017 = vst.msk [vmem:[#allocation2 + $0x138] sm:$0xff] %vm396_vm1, %v2003_v37  ;;  %v2553_v32 = vld [vmem:[#allocation2 + $0x188] sm:$0xff] }
 0x198   : > { %2169 = vst.msk [vmem:[#allocation2 + $0x1a8] sm:$0xff] %vm396_vm1, %v2144_v40  ;;  %2016 = vst.msk [vmem:[#allocation2 + $0x130] sm:$0xff] %vm396_vm1, %v2002_v42  ;;  %v4766_v44 = vpop.f32.mrb[68].mxu0  ;;  %v2552_v37 = vld [vmem:[#allocation2 + $0x180] sm:$0xff] }
 0x199   : > { %2168 = vst.msk [vmem:[#allocation2 + $0x1a0] sm:$0xff] %vm396_vm1, %v2139_v43  ;;  %v4789_v46 = vpop.f32.mrb[68].mxu1  ;;  %v2005_v47 = vadd.f32 %v4766_v44, %v1991_v45  ;;  %v1969_v48 = vpop.f32.mrb[69].mxu0  ;;  %v2376_v43 = vld [vmem:[#allocation2 + $0xb8] sm:$0xff] }
 0x19a   : > { %v2154_v51 = vadd.f32 %v4998_v30, %v4789_v46  ;;  %v2148_v52 = vpop.f32.mrb[69].mxu1  ;;  %v2004_v53 = vadd.f32 %v1990_v50, %v1969_v48  ;;  %v2375_v50 = vld [vmem:[#allocation2 + $0xb0] sm:$0xff] }
 0x19b   : > { %v2149_v54 = vadd.f32 %v4998_v30, %v2148_v52  ;;  %2019 = vst.msk [vmem:[#allocation2 + $0x148] sm:$0xff] %vm396_vm1, %v2005_v47  ;;  %v2374_v30 = vld [vmem:[#allocation2 + $0xa8] sm:$0xff]  ;;  %v2555_v45 = vld [vmem:[#allocation2 + $0x198] sm:$0xff] }
 0x19c   : > { %2171 = vst.msk [vmem:[#allocation2 + $0x1b8] sm:$0xff] %vm396_vm1, %v2154_v51  ;;  %2018 = vst.msk [vmem:[#allocation2 + $0x140] sm:$0xff] %vm396_vm1, %v2004_v53  ;;  %v4794_v55 = vpop.f32.mrb[70].mxu0  ;;  %v2554_v52 = vld [vmem:[#allocation2 + $0x190] sm:$0xff] }
 0x19d   : > { %2170 = vst.msk [vmem:[#allocation2 + $0x1b0] sm:$0xff] %vm396_vm1, %v2149_v54  ;;  %v4817_v57 = vpop.f32.mrb[70].mxu1  ;;  %v2382_v59 = vadd.f32 %v4794_v55, %v2368_v56  ;;  %v2298_v61 = vpop.f32.mrb[71].mxu0 }
 0x19e   : > { %v2561_v60 = vadd.f32 %v4817_v57, %v2547_v58  ;;  %v2477_v63 = vpop.f32.mrb[71].mxu1  ;;  %v2381_v1 = vadd.f32 %v2367_v62, %v2298_v61  ;;  %v2378_v58 = vld [vmem:[#allocation2 + $0xc8] sm:$0xff] }
 0x19f   : > { %v2560_v2 = vadd.f32 %v2546_v0, %v2477_v63  ;;  %2396 = vst.msk [vmem:[#allocation2 + $0x78] sm:$0xff] %vm396_vm1, %v2382_v59  ;;  %v2377_v0 = vld [vmem:[#allocation2 + $0xc0] sm:$0xff] }
 0x1a0   : > { %2575 = vst.msk [vmem:[#allocation2 + $0x158] sm:$0xff] %vm396_vm1, %v2561_v60  ;;  %2395 = vst.msk [vmem:[#allocation2 + $0x70] sm:$0xff] %vm396_vm1, %v2381_v1  ;;  %v4797_v3 = vpop.f32.mrb[72].mxu0  ;;  %v2557_v60 = vld [vmem:[#allocation2 + $0x1a8] sm:$0xff] }
 0x1a1   : > { %2574 = vst.msk [vmem:[#allocation2 + $0x150] sm:$0xff] %vm396_vm1, %v2560_v2  ;;  %v4820_v5 = vpop.f32.mrb[72].mxu1  ;;  %v2384_v7 = vadd.f32 %v4797_v3, %v2370_v4  ;;  %v2308_v9 = vpop.f32.mrb[73].mxu0  ;;  %v2556_v2 = vld [vmem:[#allocation2 + $0x1a0] sm:$0xff] }
 0x1a2   : > { %v2563_v8 = vadd.f32 %v4820_v5, %v2549_v6  ;;  %v2487_v11 = vpop.f32.mrb[73].mxu1  ;;  %v2383_v13 = vadd.f32 %v2369_v10, %v2308_v9 }
 0x1a3   : > { %v2562_v14 = vadd.f32 %v2548_v12, %v2487_v11  ;;  %2398 = vst.msk [vmem:[#allocation2 + $0x88] sm:$0xff] %vm396_vm1, %v2384_v7  ;;  %v2559_v10 = vld [vmem:[#allocation2 + $0x1b8] sm:$0xff] }
 0x1a4   : > { %2577 = vst.msk [vmem:[#allocation2 + $0x168] sm:$0xff] %vm396_vm1, %v2563_v8  ;;  %2397 = vst.msk [vmem:[#allocation2 + $0x80] sm:$0xff] %vm396_vm1, %v2383_v13  ;;  %v4800_v15 = vpop.f32.mrb[74].mxu0  ;;  %v2380_v8 = vld [vmem:[#allocation2 + $0xd8] sm:$0xff] }
 0x1a5   : > { %2576 = vst.msk [vmem:[#allocation2 + $0x160] sm:$0xff] %vm396_vm1, %v2562_v14  ;;  %v4823_v17 = vpop.f32.mrb[74].mxu1  ;;  %v2386_v19 = vadd.f32 %v4800_v15, %v2372_v16  ;;  %v2318_v21 = vpop.f32.mrb[75].mxu0  ;;  %v2379_v14 = vld [vmem:[#allocation2 + $0xd0] sm:$0xff] }
 0x1a6   : > { %v2565_v20 = vadd.f32 %v4823_v17, %v2551_v18  ;;  %v2497_v23 = vpop.f32.mrb[75].mxu1  ;;  %v3493_v25 = vld [vmem:[#allocation2 + $0x78] sm:$0xff]  ;;  %v2385_v26 = vadd.f32 %v2371_v22, %v2318_v21  ;;  %v2558_v16 = vld [vmem:[#allocation2 + $0x1b0] sm:$0xff]  ;;  %v2784_v22 = vld [vmem:[#allocation2 + $0xe8] sm:$0xff] }
 0x1a7   : > { %v2564_v27 = vadd.f32 %v2550_v24, %v2497_v23  ;;  %3549 = vst.msk [vmem:[%s5759_s12 + $0x78] sm:$0xff] %vm396_vm1, %v3493_v25  ;;  %v3492_v28 = vld [vmem:[#allocation2 + $0x70] sm:$0xff]  ;;  %2400 = vst.msk [vmem:[#allocation2 + $0x98] sm:$0xff] %vm396_vm1, %v2386_v19 }
 0x1a8   : > { %2579 = vst.msk [vmem:[#allocation2 + $0x178] sm:$0xff] %vm396_vm1, %v2565_v20  ;;  %3548 = vst.msk [vmem:[%s5759_s12 + $0x70] sm:$0xff] %vm396_vm1, %v3492_v28  ;;  %v4803_v29 = vpop.f32.mrb[76].mxu0 }
 0x1a9   : > { %2399 = vst.msk [vmem:[#allocation2 + $0x90] sm:$0xff] %vm396_vm1, %v2385_v26  ;;  %2578 = vst.msk [vmem:[#allocation2 + $0x170] sm:$0xff] %vm396_vm1, %v2564_v27  ;;  %v4826_v31 = vpop.f32.mrb[76].mxu1  ;;  %v2388_v33 = vadd.f32 %v4803_v29, %v2374_v30  ;;  %v2328_v49 = vpop.f32.mrb[77].mxu0  ;;  %v2783_v26 = vld [vmem:[#allocation2 + $0xe0] sm:$0xff] }
 0x1aa   : > { %v2567_v34 = vadd.f32 %v4826_v31, %v2553_v32  ;;  %v2507_v36 = vpop.f32.mrb[77].mxu1  ;;  %v3495_v38 = vld [vmem:[#allocation2 + $0x88] sm:$0xff]  ;;  %v2387_v39 = vadd.f32 %v2373_v35, %v2328_v49  ;;  %v2786_v32 = vld [vmem:[#allocation2 + $0xf8] sm:$0xff]  ;;  %v2785_v35 = vld [vmem:[#allocation2 + $0xf0] sm:$0xff] }
 0x1ab   : > { %v2566_v40 = vadd.f32 %v2552_v37, %v2507_v36  ;;  %3551 = vst.msk [vmem:[%s5759_s12 + $0x88] sm:$0xff] %vm396_vm1, %v3495_v38  ;;  %v3494_v41 = vld [vmem:[#allocation2 + $0x80] sm:$0xff]  ;;  %2402 = vst.msk [vmem:[#allocation2 + $0xa8] sm:$0xff] %vm396_vm1, %v2388_v33 }
 0x1ac   : > { %2581 = vst.msk [vmem:[#allocation2 + $0x188] sm:$0xff] %vm396_vm1, %v2567_v34  ;;  %3550 = vst.msk [vmem:[%s5759_s12 + $0x80] sm:$0xff] %vm396_vm1, %v3494_v41  ;;  %v4806_v42 = vpop.f32.mrb[78].mxu0  ;;  %v2788_v41 = vld [vmem:[#allocation2 + $0x108] sm:$0xff] }
 0x1ad   : > { %2401 = vst.msk [vmem:[#allocation2 + $0xa0] sm:$0xff] %vm396_vm1, %v2387_v39  ;;  %2580 = vst.msk [vmem:[#allocation2 + $0x180] sm:$0xff] %vm396_vm1, %v2566_v40  ;;  %v4829_v44 = vpop.f32.mrb[78].mxu1  ;;  %v2390_v46 = vadd.f32 %v4806_v42, %v2376_v43  ;;  %v2338_v48 = vpop.f32.mrb[79].mxu0 }
 0x1ae   : > { %v2569_v47 = vadd.f32 %v4829_v44, %v2555_v45  ;;  %v2517_v51 = vpop.f32.mrb[79].mxu1  ;;  %v3497_v53 = vld [vmem:[#allocation2 + $0x98] sm:$0xff]  ;;  %v2389_v54 = vadd.f32 %v2375_v50, %v2338_v48  ;;  %v2787_v45 = vld [vmem:[#allocation2 + $0x100] sm:$0xff] }
 0x1af   : > { %v2568_v55 = vadd.f32 %v2554_v52, %v2517_v51  ;;  %3553 = vst.msk [vmem:[%s5759_s12 + $0x98] sm:$0xff] %vm396_vm1, %v3497_v53  ;;  %2404 = vst.msk [vmem:[#allocation2 + $0xb8] sm:$0xff] %vm396_vm1, %v2390_v46 }
 0x1b0   : > { %v3496_v56 = vld [vmem:[#allocation2 + $0x90] sm:$0xff]  ;;  %2583 = vst.msk [vmem:[#allocation2 + $0x198] sm:$0xff] %vm396_vm1, %v2569_v47  ;;  %2403 = vst.msk [vmem:[#allocation2 + $0xb0] sm:$0xff] %vm396_vm1, %v2389_v54  ;;  %v4809_v57 = vpop.f32.mrb[80].mxu0  ;;  %v2790_v54 = vld [vmem:[#allocation2 + $0x118] sm:$0xff] }
 0x1b1   : > { %3552 = vst.msk [vmem:[%s5759_s12 + $0x90] sm:$0xff] %vm396_vm1, %v3496_v56  ;;  %2582 = vst.msk [vmem:[#allocation2 + $0x190] sm:$0xff] %vm396_vm1, %v2568_v55  ;;  %v4832_v59 = vpop.f32.mrb[80].mxu1  ;;  %v2392_v61 = vadd.f32 %v4809_v57, %v2378_v58  ;;  %v2348_v63 = vpop.f32.mrb[81].mxu0  ;;  %v2789_v58 = vld [vmem:[#allocation2 + $0x110] sm:$0xff] }
 0x1b2   : > { %v2571_v62 = vadd.f32 %v4832_v59, %v2557_v60  ;;  %v2527_v1 = vpop.f32.mrb[81].mxu1  ;;  %v3499_v3 = vld [vmem:[#allocation2 + $0xa8] sm:$0xff]  ;;  %v2391_v4 = vadd.f32 %v2377_v0, %v2348_v63 }
 0x1b3   : > { %v2570_v5 = vadd.f32 %v2556_v2, %v2527_v1  ;;  %3555 = vst.msk [vmem:[%s5759_s12 + $0xa8] sm:$0xff] %vm396_vm1, %v3499_v3  ;;  %2406 = vst.msk [vmem:[#allocation2 + $0xc8] sm:$0xff] %vm396_vm1, %v2392_v61  ;;  %v2792_v2 = vld [vmem:[#allocation2 + $0x128] sm:$0xff] }
 0x1b4   : > { %v3498_v6 = vld [vmem:[#allocation2 + $0xa0] sm:$0xff]  ;;  %2585 = vst.msk [vmem:[#allocation2 + $0x1a8] sm:$0xff] %vm396_vm1, %v2571_v62  ;;  %2405 = vst.msk [vmem:[#allocation2 + $0xc0] sm:$0xff] %vm396_vm1, %v2391_v4  ;;  %v4812_v7 = vpop.f32.mrb[82].mxu0 }
 0x1b5   : > { %3554 = vst.msk [vmem:[%s5759_s12 + $0xa0] sm:$0xff] %vm396_vm1, %v3498_v6  ;;  %2584 = vst.msk [vmem:[#allocation2 + $0x1a0] sm:$0xff] %vm396_vm1, %v2570_v5  ;;  %v4835_v9 = vpop.f32.mrb[82].mxu1  ;;  %v2394_v11 = vadd.f32 %v4812_v7, %v2380_v8  ;;  %v2358_v13 = vpop.f32.mrb[83].mxu0  ;;  %v2791_v6 = vld [vmem:[#allocation2 + $0x120] sm:$0xff] }
 0x1b6   : > { %v2573_v12 = vadd.f32 %v4835_v9, %v2559_v10  ;;  %v2537_v15 = vpop.f32.mrb[83].mxu1  ;;  %v3501_v17 = vld [vmem:[#allocation2 + $0xb8] sm:$0xff]  ;;  %v2393_v18 = vadd.f32 %v2379_v14, %v2358_v13 }
 0x1b7   : > { %v2572_v19 = vadd.f32 %v2558_v16, %v2537_v15  ;;  %3557 = vst.msk [vmem:[%s5759_s12 + $0xb8] sm:$0xff] %vm396_vm1, %v3501_v17  ;;  %v3500_v20 = vld [vmem:[#allocation2 + $0xb0] sm:$0xff]  ;;  %2408 = vst.msk [vmem:[#allocation2 + $0xd8] sm:$0xff] %vm396_vm1, %v2394_v11  ;;  %v2794_v15 = vld [vmem:[#allocation2 + $0x138] sm:$0xff] }
 0x1b8   : > { %2587 = vst.msk [vmem:[#allocation2 + $0x1b8] sm:$0xff] %vm396_vm1, %v2573_v12  ;;  %3556 = vst.msk [vmem:[%s5759_s12 + $0xb0] sm:$0xff] %vm396_vm1, %v3500_v20  ;;  %v4840_v21 = vpop.f32.mrb[84].mxu0  ;;  %v2793_v20 = vld [vmem:[#allocation2 + $0x130] sm:$0xff] }
 0x1b9   : > { %2407 = vst.msk [vmem:[#allocation2 + $0xd0] sm:$0xff] %vm396_vm1, %v2393_v18  ;;  %2586 = vst.msk [vmem:[#allocation2 + $0x1b0] sm:$0xff] %vm396_vm1, %v2572_v19  ;;  %v4863_v23 = vpop.f32.mrb[84].mxu1  ;;  %v2798_v24 = vadd.f32 %v4840_v21, %v2784_v22  ;;  %v2714_v25 = vpop.f32.mrb[85].mxu0 }
 0x1ba   : > { %v2951_v27 = vpop.f32.mrb[85].mxu1  ;;  %v3503_v28 = vld [vmem:[#allocation2 + $0xc8] sm:$0xff]  ;;  %v2797_v29 = vadd.f32 %v2783_v26, %v2714_v25 }
 0x1bb   : > { %3559 = vst.msk [vmem:[%s5759_s12 + $0xc8] sm:$0xff] %vm396_vm1, %v3503_v28  ;;  %v3502_v30 = vld [vmem:[#allocation2 + $0xc0] sm:$0xff]  ;;  %2812 = vst.msk [vmem:[#allocation2 + $0xe8] sm:$0xff] %vm396_vm1, %v2798_v24 }
 0x1bc   : > { %3558 = vst.msk [vmem:[%s5759_s12 + $0xc0] sm:$0xff] %vm396_vm1, %v3502_v30  ;;  %2811 = vst.msk [vmem:[#allocation2 + $0xe0] sm:$0xff] %vm396_vm1, %v2797_v29  ;;  %v4843_v31 = vpop.f32.mrb[86].mxu0  ;;  %v2796_v29 = vld [vmem:[#allocation2 + $0x148] sm:$0xff] }
 0x1bd   : > { %v4866_v33 = vpop.f32.mrb[86].mxu1  ;;  %v2800_v34 = vadd.f32 %v4843_v31, %v2786_v32  ;;  %v2724_v49 = vpop.f32.mrb[87].mxu0 }
 0x1be   : > { %v2961_v36 = vpop.f32.mrb[87].mxu1  ;;  %v3505_v37 = vld [vmem:[#allocation2 + $0xd8] sm:$0xff]  ;;  %v2799_v38 = vadd.f32 %v2785_v35, %v2724_v49 }
 0x1bf   : > { %3561 = vst.msk [vmem:[%s5759_s12 + $0xd8] sm:$0xff] %vm396_vm1, %v3505_v37  ;;  %2814 = vst.msk [vmem:[#allocation2 + $0xf8] sm:$0xff] %vm396_vm1, %v2800_v34  ;;  %v2795_v34 = vld [vmem:[#allocation2 + $0x140] sm:$0xff] }
 0x1c0   : > { %v3504_v39 = vld [vmem:[#allocation2 + $0xd0] sm:$0xff]  ;;  %2813 = vst.msk [vmem:[#allocation2 + $0xf0] sm:$0xff] %vm396_vm1, %v2799_v38  ;;  %v4846_v40 = vpop.f32.mrb[88].mxu0 }
 0x1c1   : > { %3560 = vst.msk [vmem:[%s5759_s12 + $0xd0] sm:$0xff] %vm396_vm1, %v3504_v39  ;;  %v4869_v42 = vpop.f32.mrb[88].mxu1  ;;  %v2802_v43 = vadd.f32 %v4846_v40, %v2788_v41  ;;  %v2734_v44 = vpop.f32.mrb[89].mxu0 }
 0x1c2   : > { %v2971_v46 = vpop.f32.mrb[89].mxu1  ;;  %v2801_v47 = vadd.f32 %v2787_v45, %v2734_v44  ;;  %v3021_v48 = vld [vmem:[#allocation2 + $0xe8] sm:$0xff] }
 0x1c3   : > { %2816 = vst.msk [vmem:[#allocation2 + $0x108] sm:$0xff] %vm396_vm1, %v2802_v43  ;;  %v3035_v50 = vadd.f32 %v4863_v23, %v3021_v48  ;;  %v3020_v51 = vld [vmem:[#allocation2 + $0xe0] sm:$0xff] }
 0x1c4   : > { %2815 = vst.msk [vmem:[#allocation2 + $0x100] sm:$0xff] %vm396_vm1, %v2801_v47  ;;  %v3034_v52 = vadd.f32 %v3020_v51, %v2951_v27  ;;  %v4849_v53 = vpop.f32.mrb[90].mxu0  ;;  %v3199_v47 = vld [vmem:[#allocation2 + $0x150] sm:$0xff] }
 0x1c5   : > { %v4872_v55 = vpop.f32.mrb[90].mxu1  ;;  %3049 = vst.msk [vmem:[#allocation2 + $0xe8] sm:$0xff] %vm396_vm1, %v3035_v50  ;;  %v2804_v56 = vadd.f32 %v4849_v53, %v2790_v54  ;;  %v2744_v57 = vpop.f32.mrb[91].mxu0 }
 0x1c6   : > { %v2981_v59 = vpop.f32.mrb[91].mxu1  ;;  %3048 = vst.msk [vmem:[#allocation2 + $0xe0] sm:$0xff] %vm396_vm1, %v3034_v52  ;;  %v2803_v60 = vadd.f32 %v2789_v58, %v2744_v57  ;;  %v3023_v61 = vld [vmem:[#allocation2 + $0xf8] sm:$0xff]  ;;  %v3202_v57 = vld [vmem:[#allocation2 + $0x168] sm:$0xff] }
 0x1c7   : > { %2818 = vst.msk [vmem:[#allocation2 + $0x118] sm:$0xff] %vm396_vm1, %v2804_v56  ;;  %v3037_v62 = vadd.f32 %v4866_v33, %v3023_v61  ;;  %v3022_v63 = vld [vmem:[#allocation2 + $0xf0] sm:$0xff] }
 0x1c8   : > { %2817 = vst.msk [vmem:[#allocation2 + $0x110] sm:$0xff] %vm396_vm1, %v2803_v60  ;;  %v3036_v0 = vadd.f32 %v3022_v63, %v2961_v36  ;;  %v4852_v1 = vpop.f32.mrb[92].mxu0 }
 0x1c9   : > { %v4875_v3 = vpop.f32.mrb[92].mxu1  ;;  %3051 = vst.msk [vmem:[#allocation2 + $0xf8] sm:$0xff] %vm396_vm1, %v3037_v62  ;;  %v2806_v4 = vadd.f32 %v4852_v1, %v2792_v2  ;;  %v2754_v5 = vpop.f32.mrb[93].mxu0  ;;  %v3201_v62 = vld [vmem:[#allocation2 + $0x160] sm:$0xff] }
 0x1ca   : > { %v2991_v7 = vpop.f32.mrb[93].mxu1  ;;  %3050 = vst.msk [vmem:[#allocation2 + $0xf0] sm:$0xff] %vm396_vm1, %v3036_v0  ;;  %v2805_v8 = vadd.f32 %v2791_v6, %v2754_v5  ;;  %v3025_v9 = vld [vmem:[#allocation2 + $0x108] sm:$0xff] }
 0x1cb   : > { %2820 = vst.msk [vmem:[#allocation2 + $0x128] sm:$0xff] %vm396_vm1, %v2806_v4  ;;  %v3039_v10 = vadd.f32 %v4869_v42, %v3025_v9  ;;  %v3024_v11 = vld [vmem:[#allocation2 + $0x100] sm:$0xff]  ;;  %v3200_v42 = vld [vmem:[#allocation2 + $0x158] sm:$0xff] }
 0x1cc   : > { %v3507_v12 = vld [vmem:[#allocation2 + $0xe8] sm:$0xff]  ;;  %2819 = vst.msk [vmem:[#allocation2 + $0x120] sm:$0xff] %vm396_vm1, %v2805_v8  ;;  %v3038_v13 = vadd.f32 %v3024_v11, %v2971_v46  ;;  %v4855_v14 = vpop.f32.mrb[94].mxu0 }
 0x1cd   : > { %v4878_v16 = vpop.f32.mrb[94].mxu1  ;;  %3563 = vst.msk [vmem:[%s5759_s12 + $0xe8] sm:$0xff] %vm396_vm1, %v3507_v12  ;;  %v3506_v17 = vld [vmem:[#allocation2 + $0xe0] sm:$0xff]  ;;  %3053 = vst.msk [vmem:[#allocation2 + $0x108] sm:$0xff] %vm396_vm1, %v3039_v10  ;;  %v2808_v18 = vadd.f32 %v4855_v14, %v2794_v15  ;;  %v2764_v19 = vpop.f32.mrb[95].mxu0  ;;  %v3203_v12 = vld [vmem:[#allocation2 + $0x170] sm:$0xff] }
 0x1ce   : > { %v3001_v21 = vpop.f32.mrb[95].mxu1  ;;  %3562 = vst.msk [vmem:[%s5759_s12 + $0xe0] sm:$0xff] %vm396_vm1, %v3506_v17  ;;  %3052 = vst.msk [vmem:[#allocation2 + $0x100] sm:$0xff] %vm396_vm1, %v3038_v13  ;;  %v2807_v22 = vadd.f32 %v2793_v20, %v2764_v19  ;;  %v3027_v23 = vld [vmem:[#allocation2 + $0x118] sm:$0xff] }
 0x1cf   : > { %2822 = vst.msk [vmem:[#allocation2 + $0x138] sm:$0xff] %vm396_vm1, %v2808_v18  ;;  %v3041_v24 = vadd.f32 %v4872_v55, %v3027_v23  ;;  %v3026_v25 = vld [vmem:[#allocation2 + $0x110] sm:$0xff] }
 0x1d0   : > { %v3509_v26 = vld [vmem:[#allocation2 + $0xf8] sm:$0xff]  ;;  %2821 = vst.msk [vmem:[#allocation2 + $0x130] sm:$0xff] %vm396_vm1, %v2807_v22  ;;  %v3040_v27 = vadd.f32 %v3026_v25, %v2981_v59  ;;  %v4858_v28 = vpop.f32.mrb[96].mxu0 }
 0x1d1   : > { %v4881_v30 = vpop.f32.mrb[96].mxu1  ;;  %3565 = vst.msk [vmem:[%s5759_s12 + $0xf8] sm:$0xff] %vm396_vm1, %v3509_v26  ;;  %v3508_v31 = vld [vmem:[#allocation2 + $0xf0] sm:$0xff]  ;;  %3055 = vst.msk [vmem:[#allocation2 + $0x118] sm:$0xff] %vm396_vm1, %v3041_v24  ;;  %v2810_v32 = vadd.f32 %v4858_v28, %v2796_v29  ;;  %v2774_v33 = vpop.f32.mrb[97].mxu0  ;;  %v3205_v26 = vld [vmem:[#allocation2 + $0x180] sm:$0xff] }
 0x1d2   : > { %v3011_v49 = vpop.f32.mrb[97].mxu1  ;;  %3564 = vst.msk [vmem:[%s5759_s12 + $0xf0] sm:$0xff] %vm396_vm1, %v3508_v31  ;;  %3054 = vst.msk [vmem:[#allocation2 + $0x110] sm:$0xff] %vm396_vm1, %v3040_v27  ;;  %v2809_v35 = vadd.f32 %v2795_v34, %v2774_v33  ;;  %v3029_v36 = vld [vmem:[#allocation2 + $0x128] sm:$0xff] }
 0x1d3   : > { %2824 = vst.msk [vmem:[#allocation2 + $0x148] sm:$0xff] %vm396_vm1, %v2810_v32  ;;  %v3043_v37 = vadd.f32 %v4875_v3, %v3029_v36  ;;  %v3028_v38 = vld [vmem:[#allocation2 + $0x120] sm:$0xff] }
 0x1d4   : > { %v3511_v39 = vld [vmem:[#allocation2 + $0x108] sm:$0xff]  ;;  %2823 = vst.msk [vmem:[#allocation2 + $0x140] sm:$0xff] %vm396_vm1, %v2809_v35  ;;  %v3042_v40 = vadd.f32 %v3028_v38, %v2991_v7  ;;  %v4886_v41 = vpop.f32.mrb[98].mxu0  ;;  %v3204_v7 = vld [vmem:[#allocation2 + $0x178] sm:$0xff] }
 0x1d5   : > { %v4909_v43 = vpop.f32.mrb[98].mxu1  ;;  %3567 = vst.msk [vmem:[%s5759_s12 + $0x108] sm:$0xff] %vm396_vm1, %v3511_v39  ;;  %v3510_v44 = vld [vmem:[#allocation2 + $0x100] sm:$0xff]  ;;  %3057 = vst.msk [vmem:[#allocation2 + $0x128] sm:$0xff] %vm396_vm1, %v3043_v37  ;;  %v3214_v45 = vadd.f32 %v4886_v41, %v3200_v42  ;;  %v3130_v46 = vpop.f32.mrb[99].mxu0  ;;  %v3207_v39 = vld [vmem:[#allocation2 + $0x190] sm:$0xff] }
 0x1d6   : > { %v3367_v48 = vpop.f32.mrb[99].mxu1  ;;  %3566 = vst.msk [vmem:[%s5759_s12 + $0x100] sm:$0xff] %vm396_vm1, %v3510_v44  ;;  %3056 = vst.msk [vmem:[#allocation2 + $0x120] sm:$0xff] %vm396_vm1, %v3042_v40  ;;  %v3213_v50 = vadd.f32 %v3199_v47, %v3130_v46  ;;  %v3031_v51 = vld [vmem:[#allocation2 + $0x138] sm:$0xff] }
 0x1d7   : > { %3228 = vst.msk [vmem:[#allocation2 + $0x158] sm:$0xff] %vm396_vm1, %v3214_v45  ;;  %v3045_v52 = vadd.f32 %v4878_v16, %v3031_v51  ;;  %v3030_v53 = vld [vmem:[#allocation2 + $0x130] sm:$0xff] }
 0x1d8   : > { %v3513_v54 = vld [vmem:[#allocation2 + $0x118] sm:$0xff]  ;;  %3227 = vst.msk [vmem:[#allocation2 + $0x150] sm:$0xff] %vm396_vm1, %v3213_v50  ;;  %v3044_v55 = vadd.f32 %v3030_v53, %v3001_v21  ;;  %v4889_v56 = vpop.f32.mrb[100].mxu0  ;;  %v3206_v21 = vld [vmem:[#allocation2 + $0x188] sm:$0xff] }
 0x1d9   : > { %v4912_v58 = vpop.f32.mrb[100].mxu1  ;;  %3569 = vst.msk [vmem:[%s5759_s12 + $0x118] sm:$0xff] %vm396_vm1, %v3513_v54  ;;  %v3512_v59 = vld [vmem:[#allocation2 + $0x110] sm:$0xff]  ;;  %3059 = vst.msk [vmem:[#allocation2 + $0x138] sm:$0xff] %vm396_vm1, %v3045_v52  ;;  %v3216_v60 = vadd.f32 %v4889_v56, %v3202_v57  ;;  %v3140_v61 = vpop.f32.mrb[101].mxu0  ;;  %v3209_v54 = vld [vmem:[#allocation2 + $0x1a0] sm:$0xff] }
 0x1da   : > { %v3377_v63 = vpop.f32.mrb[101].mxu1  ;;  %3568 = vst.msk [vmem:[%s5759_s12 + $0x110] sm:$0xff] %vm396_vm1, %v3512_v59  ;;  %3058 = vst.msk [vmem:[#allocation2 + $0x130] sm:$0xff] %vm396_vm1, %v3044_v55  ;;  %v3215_v0 = vadd.f32 %v3201_v62, %v3140_v61  ;;  %v3033_v1 = vld [vmem:[#allocation2 + $0x148] sm:$0xff] }
 0x1db   : > { %3230 = vst.msk [vmem:[#allocation2 + $0x168] sm:$0xff] %vm396_vm1, %v3216_v60  ;;  %v3047_v2 = vadd.f32 %v4881_v30, %v3033_v1  ;;  %v3032_v3 = vld [vmem:[#allocation2 + $0x140] sm:$0xff] }
 0x1dc   : > { %v3515_v4 = vld [vmem:[#allocation2 + $0x128] sm:$0xff]  ;;  %3229 = vst.msk [vmem:[#allocation2 + $0x160] sm:$0xff] %vm396_vm1, %v3215_v0  ;;  %v3046_v5 = vadd.f32 %v3032_v3, %v3011_v49  ;;  %v4892_v6 = vpop.f32.mrb[102].mxu0  ;;  %v3208_v49 = vld [vmem:[#allocation2 + $0x198] sm:$0xff] }
 0x1dd   : > { %v4915_v8 = vpop.f32.mrb[102].mxu1  ;;  %3571 = vst.msk [vmem:[%s5759_s12 + $0x128] sm:$0xff] %vm396_vm1, %v3515_v4  ;;  %v3514_v9 = vld [vmem:[#allocation2 + $0x120] sm:$0xff]  ;;  %3061 = vst.msk [vmem:[#allocation2 + $0x148] sm:$0xff] %vm396_vm1, %v3047_v2  ;;  %v3218_v10 = vadd.f32 %v4892_v6, %v3204_v7  ;;  %v3150_v11 = vpop.f32.mrb[103].mxu0  ;;  %v3211_v4 = vld [vmem:[#allocation2 + $0x1b0] sm:$0xff] }
 0x1de   : > { %v3387_v13 = vpop.f32.mrb[103].mxu1  ;;  %3570 = vst.msk [vmem:[%s5759_s12 + $0x120] sm:$0xff] %vm396_vm1, %v3514_v9  ;;  %3060 = vst.msk [vmem:[#allocation2 + $0x140] sm:$0xff] %vm396_vm1, %v3046_v5  ;;  %v3217_v14 = vadd.f32 %v3203_v12, %v3150_v11  ;;  %v3437_v15 = vld [vmem:[#allocation2 + $0x158] sm:$0xff] }
 0x1df   : > { %3232 = vst.msk [vmem:[#allocation2 + $0x178] sm:$0xff] %vm396_vm1, %v3218_v10  ;;  %v3451_v16 = vadd.f32 %v4909_v43, %v3437_v15  ;;  %v3436_v17 = vld [vmem:[#allocation2 + $0x150] sm:$0xff] }
 0x1e0   : > { %v3517_v18 = vld [vmem:[#allocation2 + $0x138] sm:$0xff]  ;;  %3231 = vst.msk [vmem:[#allocation2 + $0x170] sm:$0xff] %vm396_vm1, %v3217_v14  ;;  %v3450_v19 = vadd.f32 %v3436_v17, %v3367_v48  ;;  %v4895_v20 = vpop.f32.mrb[104].mxu0  ;;  %v3210_v48 = vld [vmem:[#allocation2 + $0x1a8] sm:$0xff] }
 0x1e1   : > { %v4918_v22 = vpop.f32.mrb[104].mxu1  ;;  %3573 = vst.msk [vmem:[%s5759_s12 + $0x138] sm:$0xff] %vm396_vm1, %v3517_v18  ;;  %v3516_v23 = vld [vmem:[#allocation2 + $0x130] sm:$0xff]  ;;  %3465 = vst.msk [vmem:[#allocation2 + $0x158] sm:$0xff] %vm396_vm1, %v3451_v16  ;;  %v3220_v24 = vadd.f32 %v4895_v20, %v3206_v21  ;;  %v3160_v25 = vpop.f32.mrb[105].mxu0 }
 0x1e2   : > { %v3397_v27 = vpop.f32.mrb[105].mxu1  ;;  %3572 = vst.msk [vmem:[%s5759_s12 + $0x130] sm:$0xff] %vm396_vm1, %v3516_v23  ;;  %3464 = vst.msk [vmem:[#allocation2 + $0x150] sm:$0xff] %vm396_vm1, %v3450_v19  ;;  %v3219_v28 = vadd.f32 %v3205_v26, %v3160_v25  ;;  %v3439_v29 = vld [vmem:[#allocation2 + $0x168] sm:$0xff] }
 0x1e3   : > { %3234 = vst.msk [vmem:[#allocation2 + $0x188] sm:$0xff] %vm396_vm1, %v3220_v24  ;;  %v3453_v30 = vadd.f32 %v4912_v58, %v3439_v29  ;;  %v3438_v31 = vld [vmem:[#allocation2 + $0x160] sm:$0xff] }
 0x1e4   : > { %v3519_v32 = vld [vmem:[#allocation2 + $0x148] sm:$0xff]  ;;  %3233 = vst.msk [vmem:[#allocation2 + $0x180] sm:$0xff] %vm396_vm1, %v3219_v28  ;;  %v3452_v33 = vadd.f32 %v3438_v31, %v3377_v63  ;;  %v4898_v34 = vpop.f32.mrb[106].mxu0  ;;  %v3212_v63 = vld [vmem:[#allocation2 + $0x1b8] sm:$0xff] }
 0x1e5   : > { %v4921_v35 = vpop.f32.mrb[106].mxu1  ;;  %3575 = vst.msk [vmem:[%s5759_s12 + $0x148] sm:$0xff] %vm396_vm1, %v3519_v32  ;;  %v3518_v36 = vld [vmem:[#allocation2 + $0x140] sm:$0xff]  ;;  %3467 = vst.msk [vmem:[#allocation2 + $0x168] sm:$0xff] %vm396_vm1, %v3453_v30  ;;  %v3222_v37 = vadd.f32 %v4898_v34, %v3208_v49  ;;  %v3170_v38 = vpop.f32.mrb[107].mxu0  ;;  %v3741_v30 = vld [vmem:[%s5759_s12 + $0x8] sm:$0xff] (%p6168_p7) }
 0x1e6   : > { %v3407_v40 = vpop.f32.mrb[107].mxu1  ;;  %3574 = vst.msk [vmem:[%s5759_s12 + $0x140] sm:$0xff] %vm396_vm1, %v3518_v36  ;;  %3466 = vst.msk [vmem:[#allocation2 + $0x160] sm:$0xff] %vm396_vm1, %v3452_v33  ;;  %v3221_v41 = vadd.f32 %v3207_v39, %v3170_v38  ;;  %v3441_v42 = vld [vmem:[#allocation2 + $0x178] sm:$0xff]  ;;  %v3739_v29 = vld [vmem:[%s5759_s12] sm:$0xff] (%p6168_p7) }
 0x1e7   : > { %3236 = vst.msk [vmem:[#allocation2 + $0x198] sm:$0xff] %vm396_vm1, %v3222_v37  ;;  %v3455_v43 = vadd.f32 %v4915_v8, %v3441_v42  ;;  %v3440_v44 = vld [vmem:[#allocation2 + $0x170] sm:$0xff]  ;;  %v3745_v32 = vld [vmem:[%s5759_s12 + $0x18] sm:$0xff] (%p6168_p7)  ;;  %v3747_v33 = vld [vmem:[%s5759_s12 + $0x20] sm:$0xff] (%p6168_p7) }
 0x1e8   : > { %v3521_v45 = vld [vmem:[#allocation2 + $0x158] sm:$0xff]  ;;  %3235 = vst.msk [vmem:[#allocation2 + $0x190] sm:$0xff] %vm396_vm1, %v3221_v41  ;;  %v3454_v46 = vadd.f32 %v3440_v44, %v3387_v13  ;;  %v4901_v47 = vpop.f32.mrb[108].mxu0  ;;  %v3749_v34 = vld [vmem:[%s5759_s12 + $0x28] sm:$0xff] (%p6168_p7)  ;;  %v3755_v36 = vld [vmem:[%s5759_s12 + $0x40] sm:$0xff] (%p6168_p7) }
 0x1e9   : > { %v4924_v50 = vpop.f32.mrb[108].mxu1  ;;  %3577 = vst.msk [vmem:[%s5759_s12 + $0x158] sm:$0xff] %vm396_vm1, %v3521_v45  ;;  %v3520_v51 = vld [vmem:[#allocation2 + $0x150] sm:$0xff]  ;;  %3469 = vst.msk [vmem:[#allocation2 + $0x178] sm:$0xff] %vm396_vm1, %v3455_v43  ;;  %v3224_v52 = vadd.f32 %v4901_v47, %v3210_v48  ;;  %v3180_v53 = vpop.f32.mrb[109].mxu0  ;;  %v3761_v39 = vld [vmem:[%s5759_s12 + $0x58] sm:$0xff] (%p6168_p7) }
 0x1ea   : > { %v3417_v55 = vpop.f32.mrb[109].mxu1  ;;  %3576 = vst.msk [vmem:[%s5759_s12 + $0x150] sm:$0xff] %vm396_vm1, %v3520_v51  ;;  %3468 = vst.msk [vmem:[#allocation2 + $0x170] sm:$0xff] %vm396_vm1, %v3454_v46  ;;  %v3223_v56 = vadd.f32 %v3209_v54, %v3180_v53  ;;  %v3443_v57 = vld [vmem:[#allocation2 + $0x188] sm:$0xff]  ;;  %v3743_v31 = vld [vmem:[%s5759_s12 + $0x10] sm:$0xff] (%p6168_p7) }
 0x1eb   : > { %3238 = vst.msk [vmem:[#allocation2 + $0x1a8] sm:$0xff] %vm396_vm1, %v3224_v52  ;;  %v3457_v58 = vadd.f32 %v4918_v22, %v3443_v57  ;;  %v3442_v59 = vld [vmem:[#allocation2 + $0x180] sm:$0xff]  ;;  %v3751_v49 = vld [vmem:[%s5759_s12 + $0x30] sm:$0xff] (%p6168_p7)  ;;  %v3757_v37 = vld [vmem:[%s5759_s12 + $0x48] sm:$0xff] (%p6168_p7) }
 0x1ec   : > { %v3523_v60 = vld [vmem:[#allocation2 + $0x168] sm:$0xff]  ;;  %3237 = vst.msk [vmem:[#allocation2 + $0x1a0] sm:$0xff] %vm396_vm1, %v3223_v56  ;;  %v3456_v61 = vadd.f32 %v3442_v59, %v3397_v27  ;;  %v4904_v62 = vpop.f32.mrb[110].mxu0  ;;  %v3759_v38 = vld [vmem:[%s5759_s12 + $0x50] sm:$0xff] (%p6168_p7)  ;;  %v3769_v43 = vld [vmem:[%s5759_s12 + $0x78] sm:$0xff] (%p6168_p7) }
 0x1ed   : > { %v4927_v0 = vpop.f32.mrb[110].mxu1  ;;  %3579 = vst.msk [vmem:[%s5759_s12 + $0x168] sm:$0xff] %vm396_vm1, %v3523_v60  ;;  %v3522_v1 = vld [vmem:[#allocation2 + $0x160] sm:$0xff]  ;;  %3471 = vst.msk [vmem:[#allocation2 + $0x188] sm:$0xff] %vm396_vm1, %v3457_v58  ;;  %v3226_v2 = vadd.f32 %v4904_v62, %v3212_v63  ;;  %v3190_v3 = vpop.f32.mrb[111].mxu0  ;;  %v3765_v41 = vld [vmem:[%s5759_s12 + $0x68] sm:$0xff] (%p6168_p7) }
 0x1ee   : > { %v3427_v5 = vpop.f32.mrb[111].mxu1  ;;  %3578 = vst.msk [vmem:[%s5759_s12 + $0x160] sm:$0xff] %vm396_vm1, %v3522_v1  ;;  %3470 = vst.msk [vmem:[#allocation2 + $0x180] sm:$0xff] %vm396_vm1, %v3456_v61  ;;  %v3225_v6 = vadd.f32 %v3211_v4, %v3190_v3  ;;  %v3445_v7 = vld [vmem:[#allocation2 + $0x198] sm:$0xff]  ;;  %v3771_v44 = vld [vmem:[%s5759_s12 + $0x80] sm:$0xff] (%p6168_p7) }
 0x1ef   : > { %3240 = vst.msk [vmem:[#allocation2 + $0x1b8] sm:$0xff] %vm396_vm1, %v3226_v2  ;;  %v3459_v8 = vadd.f32 %v4921_v35, %v3445_v7  ;;  %v3444_v9 = vld [vmem:[#allocation2 + $0x190] sm:$0xff]  ;;  %v3753_v35 = vld [vmem:[%s5759_s12 + $0x38] sm:$0xff] (%p6168_p7)  ;;  %3740 = vst [vmem:[%s6035_s23] sm:$0xff] (%p6168_p7), %v3739_v29 }
 0x1f0   : > { %v3525_v10 = vld [vmem:[#allocation2 + $0x178] sm:$0xff]  ;;  %3239 = vst.msk [vmem:[#allocation2 + $0x1b0] sm:$0xff] %vm396_vm1, %v3225_v6  ;;  %v3458_v11 = vadd.f32 %v3444_v9, %v3407_v40  ;;  %v3763_v40 = vld [vmem:[%s5759_s12 + $0x60] sm:$0xff] (%p6168_p7)  ;;  %v3773_v45 = vld [vmem:[%s5759_s12 + $0x88] sm:$0xff] (%p6168_p7) }
 0x1f1   : > { %3581 = vst.msk [vmem:[%s5759_s12 + $0x178] sm:$0xff] %vm396_vm1, %v3525_v10  ;;  %v3524_v12 = vld [vmem:[#allocation2 + $0x170] sm:$0xff]  ;;  %3473 = vst.msk [vmem:[#allocation2 + $0x198] sm:$0xff] %vm396_vm1, %v3459_v8  ;;  %v3777_v47 = vld [vmem:[%s5759_s12 + $0x98] sm:$0xff] (%p6168_p7) }
 0x1f2   : > { %3580 = vst.msk [vmem:[%s5759_s12 + $0x170] sm:$0xff] %vm396_vm1, %v3524_v12  ;;  %3472 = vst.msk [vmem:[#allocation2 + $0x190] sm:$0xff] %vm396_vm1, %v3458_v11  ;;  %v3447_v13 = vld [vmem:[#allocation2 + $0x1a8] sm:$0xff]  ;;  %v3767_v42 = vld [vmem:[%s5759_s12 + $0x70] sm:$0xff] (%p6168_p7) }
 0x1f3   : > { %v3461_v14 = vadd.f32 %v4924_v50, %v3447_v13  ;;  %v3446_v15 = vld [vmem:[#allocation2 + $0x1a0] sm:$0xff]  ;;  %3742 = vst [vmem:[%s6035_s23 + $0x8] sm:$0xff] (%p6168_p7), %v3741_v30  ;;  %3744 = vst [vmem:[%s6035_s23 + $0x10] sm:$0xff] (%p6168_p7), %v3743_v31  ;;  %v3775_v46 = vld [vmem:[%s5759_s12 + $0x90] sm:$0xff] (%p6168_p7) }
 0x1f4   : > { %v3527_v16 = vld [vmem:[#allocation2 + $0x188] sm:$0xff]  ;;  %v3460_v17 = vadd.f32 %v3446_v15, %v3417_v55  ;;  %3746 = vst [vmem:[%s6035_s23 + $0x18] sm:$0xff] (%p6168_p7), %v3745_v32  ;;  %3748 = vst [vmem:[%s6035_s23 + $0x20] sm:$0xff] (%p6168_p7), %v3747_v33  ;;  %v3783_v51 = vld [vmem:[%s5759_s12 + $0xb0] sm:$0xff] (%p6168_p7) }
 0x1f5   : > { %3583 = vst.msk [vmem:[%s5759_s12 + $0x188] sm:$0xff] %vm396_vm1, %v3527_v16  ;;  %v3526_v18 = vld [vmem:[#allocation2 + $0x180] sm:$0xff]  ;;  %3475 = vst.msk [vmem:[#allocation2 + $0x1a8] sm:$0xff] %vm396_vm1, %v3461_v14  ;;  %v3781_v50 = vld [vmem:[%s5759_s12 + $0xa8] sm:$0xff] (%p6168_p7) }
 0x1f6   : > { %3582 = vst.msk [vmem:[%s5759_s12 + $0x180] sm:$0xff] %vm396_vm1, %v3526_v18  ;;  %3474 = vst.msk [vmem:[#allocation2 + $0x1a0] sm:$0xff] %vm396_vm1, %v3460_v17  ;;  %v3449_v19 = vld [vmem:[#allocation2 + $0x1b8] sm:$0xff]  ;;  %v3779_v48 = vld [vmem:[%s5759_s12 + $0xa0] sm:$0xff] (%p6168_p7) }
 0x1f7   : > { %v3463_v20 = vadd.f32 %v4927_v0, %v3449_v19  ;;  %v3448_v21 = vld [vmem:[#allocation2 + $0x1b0] sm:$0xff]  ;;  %3750 = vst [vmem:[%s6035_s23 + $0x28] sm:$0xff] (%p6168_p7), %v3749_v34  ;;  %3752 = vst [vmem:[%s6035_s23 + $0x30] sm:$0xff] (%p6168_p7), %v3751_v49  ;;  %v3785_v52 = vld [vmem:[%s5759_s12 + $0xb8] sm:$0xff] (%p6168_p7) }
 0x1f8   : > { %v3529_v22 = vld [vmem:[#allocation2 + $0x198] sm:$0xff]  ;;  %v3462_v23 = vadd.f32 %v3448_v21, %v3427_v5  ;;  %3754 = vst [vmem:[%s6035_s23 + $0x38] sm:$0xff] (%p6168_p7), %v3753_v35  ;;  %3756 = vst [vmem:[%s6035_s23 + $0x40] sm:$0xff] (%p6168_p7), %v3755_v36  ;;  %v3787_v53 = vld [vmem:[%s5759_s12 + $0xc0] sm:$0xff] (%p6168_p7) }
 0x1f9   : > { %3585 = vst.msk [vmem:[%s5759_s12 + $0x198] sm:$0xff] %vm396_vm1, %v3529_v22  ;;  %v3528_v24 = vld [vmem:[#allocation2 + $0x190] sm:$0xff]  ;;  %3477 = vst.msk [vmem:[#allocation2 + $0x1b8] sm:$0xff] %vm396_vm1, %v3463_v20  ;;  %v3793_v56 = vld [vmem:[%s5759_s12 + $0xd8] sm:$0xff] (%p6168_p7) }
 0x1fa   : > { %3584 = vst.msk [vmem:[%s5759_s12 + $0x190] sm:$0xff] %vm396_vm1, %v3528_v24  ;;  %3476 = vst.msk [vmem:[#allocation2 + $0x1b0] sm:$0xff] %vm396_vm1, %v3462_v23  ;;  %v3789_v54 = vld [vmem:[%s5759_s12 + $0xc8] sm:$0xff] (%p6168_p7)  ;;  %v3791_v55 = vld [vmem:[%s5759_s12 + $0xd0] sm:$0xff] (%p6168_p7) }
 0x1fb   : > { %3758 = vst [vmem:[%s6035_s23 + $0x48] sm:$0xff] (%p6168_p7), %v3757_v37  ;;  %3760 = vst [vmem:[%s6035_s23 + $0x50] sm:$0xff] (%p6168_p7), %v3759_v38  ;;  %v3795_v57 = vld [vmem:[%s5759_s12 + $0xe0] sm:$0xff] (%p6168_p7)  ;;  %v3797_v58 = vld [vmem:[%s5759_s12 + $0xe8] sm:$0xff] (%p6168_p7) }
 0x1fc   : > { %v3531_v25 = vld [vmem:[#allocation2 + $0x1a8] sm:$0xff]  ;;  %3596 = sbr.rel (!%p6168_p7) target bundleno = 533 (0x215), region = 40  ;;  %3762 = vst [vmem:[%s6035_s23 + $0x58] sm:$0xff] (%p6168_p7), %v3761_v39  ;;  %3764 = vst [vmem:[%s6035_s23 + $0x60] sm:$0xff] (%p6168_p7), %v3763_v40  ;;  %v3799_v59 = vld [vmem:[%s5759_s12 + $0xf0] sm:$0xff] (%p6168_p7) }
 0x1fd   : > { %3587 = vst.msk [vmem:[%s5759_s12 + $0x1a8] sm:$0xff] %vm396_vm1, %v3531_v25  ;;  %v3530_v26 = vld [vmem:[#allocation2 + $0x1a0] sm:$0xff]  ;;  %3766 = vst [vmem:[%s6035_s23 + $0x68] sm:$0xff] (%p6168_p7), %v3765_v41  ;;  %v3805_v62 = vld [vmem:[%s5759_s12 + $0x108] sm:$0xff] (%p6168_p7) }
 0x1fe   : > { %3586 = vst.msk [vmem:[%s5759_s12 + $0x1a0] sm:$0xff] %vm396_vm1, %v3530_v26  ;;  %3768 = vst [vmem:[%s6035_s23 + $0x150] sm:$0xff] (%p6168_p7), %v3767_v42  ;;  %v3801_v60 = vld [vmem:[%s5759_s12 + $0xf8] sm:$0xff] (%p6168_p7)  ;;  %v3803_v61 = vld [vmem:[%s5759_s12 + $0x100] sm:$0xff] (%p6168_p7) }
 0x1ff   : > { %3770 = vst [vmem:[%s6035_s23 + $0x158] sm:$0xff] (%p6168_p7), %v3769_v43  ;;  %3772 = vst [vmem:[%s6035_s23 + $0x160] sm:$0xff] (%p6168_p7), %v3771_v44  ;;  %v3807_v63 = vld [vmem:[%s5759_s12 + $0x110] sm:$0xff] (%p6168_p7)  ;;  %v3809_v0 = vld [vmem:[%s5759_s12 + $0x118] sm:$0xff] (%p6168_p7) }
 0x200   : > { %v3533_v27 = vld [vmem:[#allocation2 + $0x1b8] sm:$0xff]  ;;  %3774 = vst [vmem:[%s6035_s23 + $0x168] sm:$0xff] (%p6168_p7), %v3773_v45  ;;  %3776 = vst [vmem:[%s6035_s23 + $0x170] sm:$0xff] (%p6168_p7), %v3775_v46  ;;  %v3811_v1 = vld [vmem:[%s5759_s12 + $0x120] sm:$0xff] (%p6168_p7) }
 0x201   : > { %3589 = vst.msk [vmem:[%s5759_s12 + $0x1b8] sm:$0xff] %vm396_vm1, %v3533_v27  ;;  %v3532_v28 = vld [vmem:[#allocation2 + $0x1b0] sm:$0xff]  ;;  %3778 = vst [vmem:[%s6035_s23 + $0x178] sm:$0xff] (%p6168_p7), %v3777_v47  ;;  %v3817_v4 = vld [vmem:[%s5759_s12 + $0x138] sm:$0xff] (%p6168_p7) }
 0x202   : > { %3588 = vst.msk [vmem:[%s5759_s12 + $0x1b0] sm:$0xff] %vm396_vm1, %v3532_v28  ;;  %3780 = vst [vmem:[%s6035_s23 + $0x180] sm:$0xff] (%p6168_p7), %v3779_v48  ;;  %v3813_v2 = vld [vmem:[%s5759_s12 + $0x128] sm:$0xff] (%p6168_p7)  ;;  %v3815_v3 = vld [vmem:[%s5759_s12 + $0x130] sm:$0xff] (%p6168_p7) }
 0x203   : > { %3782 = vst [vmem:[%s6035_s23 + $0x188] sm:$0xff] %v3781_v50  ;;  %3784 = vst [vmem:[%s6035_s23 + $0x190] sm:$0xff] %v3783_v51  ;;  %v3819_v5 = vld [vmem:[%s5759_s12 + $0x140] sm:$0xff]  ;;  %v3821_v6 = vld [vmem:[%s5759_s12 + $0x148] sm:$0xff] }
 0x204   : > { %3786 = vst [vmem:[%s6035_s23 + $0x198] sm:$0xff] %v3785_v52  ;;  %3788 = vst [vmem:[%s6035_s23 + $0x1a0] sm:$0xff] %v3787_v53  ;;  %v3823_v7 = vld [vmem:[%s5759_s12 + $0x150] sm:$0xff]  ;;  %v3825_v8 = vld [vmem:[%s5759_s12 + $0x158] sm:$0xff] }
 0x205   : > { %3790 = vst [vmem:[%s6035_s23 + $0x1a8] sm:$0xff] %v3789_v54  ;;  %3792 = vst [vmem:[%s6035_s23 + $0x1b0] sm:$0xff] %v3791_v55  ;;  %v3827_v9 = vld [vmem:[%s5759_s12 + $0x160] sm:$0xff]  ;;  %v3829_v10 = vld [vmem:[%s5759_s12 + $0x168] sm:$0xff] }
 0x206   : > { %3794 = vst [vmem:[%s6035_s23 + $0x1b8] sm:$0xff] %v3793_v56  ;;  %3796 = vst [vmem:[%s6035_s23 + $0x2a0] sm:$0xff] %v3795_v57  ;;  %v3831_v11 = vld [vmem:[%s5759_s12 + $0x170] sm:$0xff]  ;;  %v3833_v12 = vld [vmem:[%s5759_s12 + $0x178] sm:$0xff] }
 0x207   : > { %3798 = vst [vmem:[%s6035_s23 + $0x2a8] sm:$0xff] %v3797_v58  ;;  %3800 = vst [vmem:[%s6035_s23 + $0x2b0] sm:$0xff] %v3799_v59  ;;  %v3835_v13 = vld [vmem:[%s5759_s12 + $0x180] sm:$0xff]  ;;  %v3837_v14 = vld [vmem:[%s5759_s12 + $0x188] sm:$0xff] }
 0x208   : > { %3802 = vst [vmem:[%s6035_s23 + $0x2b8] sm:$0xff] %v3801_v60  ;;  %3804 = vst [vmem:[%s6035_s23 + $0x2c0] sm:$0xff] %v3803_v61  ;;  %v3839_v15 = vld [vmem:[%s5759_s12 + $0x190] sm:$0xff]  ;;  %v3841_v16 = vld [vmem:[%s5759_s12 + $0x198] sm:$0xff] }
 0x209   : > { %3806 = vst [vmem:[%s6035_s23 + $0x2c8] sm:$0xff] %v3805_v62  ;;  %3808 = vst [vmem:[%s6035_s23 + $0x2d0] sm:$0xff] %v3807_v63  ;;  %v3843_v17 = vld [vmem:[%s5759_s12 + $0x1a0] sm:$0xff]  ;;  %v3845_v18 = vld [vmem:[%s5759_s12 + $0x1a8] sm:$0xff] }
 0x20a   : > { %3810 = vst [vmem:[%s6035_s23 + $0x2d8] sm:$0xff] %v3809_v0  ;;  %3812 = vst [vmem:[%s6035_s23 + $0x2e0] sm:$0xff] %v3811_v1  ;;  %v3847_v19 = vld [vmem:[%s5759_s12 + $0x1b0] sm:$0xff]  ;;  %v3849_v20 = vld [vmem:[%s5759_s12 + $0x1b8] sm:$0xff] }
 0x20b   : > { %3814 = vst [vmem:[%s6035_s23 + $0x2e8] sm:$0xff] %v3813_v2  ;;  %3816 = vst [vmem:[%s6035_s23 + $0x2f0] sm:$0xff] %v3815_v3 }
 0x20c   : > { %3818 = vst [vmem:[%s6035_s23 + $0x2f8] sm:$0xff] %v3817_v4  ;;  %3820 = vst [vmem:[%s6035_s23 + $0x300] sm:$0xff] %v3819_v5 }
 0x20d   : > { %3822 = vst [vmem:[%s6035_s23 + $0x308] sm:$0xff] %v3821_v6  ;;  %3824 = vst [vmem:[%s6035_s23 + $0x3f0] sm:$0xff] %v3823_v7 }
 0x20e   : > { %3826 = vst [vmem:[%s6035_s23 + $0x3f8] sm:$0xff] %v3825_v8  ;;  %3828 = vst [vmem:[%s6035_s23 + $0x400] sm:$0xff] %v3827_v9 }
 0x20f   : > { %3830 = vst [vmem:[%s6035_s23 + $0x408] sm:$0xff] %v3829_v10  ;;  %3832 = vst [vmem:[%s6035_s23 + $0x410] sm:$0xff] %v3831_v11 }
 0x210   : > { %3834 = vst [vmem:[%s6035_s23 + $0x418] sm:$0xff] %v3833_v12  ;;  %3836 = vst [vmem:[%s6035_s23 + $0x420] sm:$0xff] %v3835_v13 }
 0x211   : > { %3838 = vst [vmem:[%s6035_s23 + $0x428] sm:$0xff] %v3837_v14  ;;  %3840 = vst [vmem:[%s6035_s23 + $0x430] sm:$0xff] %v3839_v15 }
 0x212   : > { %3842 = vst [vmem:[%s6035_s23 + $0x438] sm:$0xff] %v3841_v16  ;;  %3844 = vst [vmem:[%s6035_s23 + $0x440] sm:$0xff] %v3843_v17 }
 0x213   : > { %3846 = vst [vmem:[%s6035_s23 + $0x448] sm:$0xff] %v3845_v18  ;;  %3848 = vst [vmem:[%s6035_s23 + $0x450] sm:$0xff] %v3847_v19 }
 0x214   : > { %3850 = vst [vmem:[%s6035_s23 + $0x458] sm:$0xff] %v3849_v20 }
 0x215 PF: > { %s14_s18 = sadd.s32 1, %s5085_s18   ;;  %s6169_s12 = smov %s5065_s13 }
 0x216   : > { %p11_p8 = scmp.ge.s32.totalorder %s14_s18, 8   ;;  %s6170_s13 = smov %s5181_s5 }
 0x217   : > { %s6171_s14 = smov %s5077_s16  ;;  %s6172_s15 = smov %s5081_s17 }
 0x218   : > { %s6173_s16 = smov %s6176_s20  ;;  %s6174_s17 = smov %s6180_s21 }
 0x219   :  { %13 = sbr.rel (!%p11_p8) target bundleno = 4 (0x4), region = 132 }
 0x220   :  { %3866 = vsyncpa [#allocation4], 1 }
 0x221   :  { %3868 = vsyncpa [#allocation4 + $0x1], 1 }

</bundles_post_ra>
